<compile_context>
chip_gen: v7x
topology: tpu7x:2x2x1
jax: 0.10.0
libtpu: 0.0.40
codegen_flags: <defaults>
</compile_context>

<pallas_src>
import numpy as np
import jax
import jax.numpy as jnp
from jax.experimental import pallas as pl
from jax.experimental.pallas import tpu as pltpu


# -----------------------------------------------------------------------------
# Diffusion schedule (mirrors linear_beta_schedule + the registered buffers)
# -----------------------------------------------------------------------------
def make_schedule(n_timesteps, beta_start=1e-4, beta_end=0.02):
    betas = np.linspace(beta_start, beta_end, n_timesteps).astype(np.float32)
    alphas = 1.0 - betas
    ac = np.cumprod(alphas, axis=0)
    ac_prev = np.concatenate([np.ones(1, np.float32), ac[:-1]])

    sqrt_recip_ac = np.sqrt(1.0 / ac)
    sqrt_recipm1_ac = np.sqrt(1.0 / ac - 1.0)
    post_var = betas * (1.0 - ac_prev) / (1.0 - ac)
    post_log_var = np.log(np.clip(post_var, 1e-20, None))
    coef1 = betas * np.sqrt(ac_prev) / (1.0 - ac)
    coef2 = (1.0 - ac_prev) * np.sqrt(alphas) / (1.0 - ac)

    # sigma[t] = nonzero_mask * exp(0.5 * posterior_log_variance_clipped)  (mask folded in)
    sigma = np.exp(0.5 * post_log_var).astype(np.float32)
    sigma[0] = 0.0

    coefs = np.stack([sqrt_recip_ac, sqrt_recipm1_ac, coef1, coef2],
                     axis=1).astype(np.float32)          # (T, 4)
    return coefs, sigma


def sinusoidal_time_embedding(n_timesteps, dim):
    t = np.arange(n_timesteps)[:, None].astype(np.float32)
    half = dim // 2
    freqs = np.exp(-np.log(10000.0) * np.arange(half) / max(half, 1)).astype(np.float32)
    ang = t * freqs[None, :]
    emb = np.concatenate([np.sin(ang), np.cos(ang)], axis=1).astype(np.float32)
    return jnp.asarray(emb)  # (T, dim)


# -----------------------------------------------------------------------------
# Row tiling: pad rows to a multiple of 16 (so the intra-tile half-split is
# sublane-aligned), split into >=2 tiles when possible so the "parallel" grid
# axis shards across both TensorCores on v7x, cap tiles at 512 rows.
# -----------------------------------------------------------------------------
def _choose_row_tiling(n_rows):
    def rup(x, m):
        return ((x + m - 1) // m) * m

    n16 = max(16, rup(n_rows, 16))
    if n16 <= 32:                       # too small to split across cores
        return n16, n16
    if n16 <= 1024:                     # two tiles -> both TCs get work
        tile = rup((n16 + 1) // 2, 16)
        return 2 * tile, tile
    tile = 512                          # large N: 512-row tiles
    return rup(n16, tile), tile


# -----------------------------------------------------------------------------
# Kernel factory: full p_sample_loop (all T reverse steps) in ONE invocation.
# Schedule coefficients are folded and baked in as trace-time constants; the
# loop over T is a static Python loop (T is small), i.e. fully unrolled.
# The row tile is split into two independent half-tile streams whose per-step
# chains are interleaved to hide MXU/EUP result-FIFO latency.
# -----------------------------------------------------------------------------
def make_diffusion_sample_kernel(T, coefs_np, sigma_np, row_tile):
    c_recip = coefs_np[:, 0]
    c_recipm1 = coefs_np[:, 1]
    c1 = coefs_np[:, 2]
    c2 = coefs_np[:, 3]
    # Folded posterior-mean scalars: x <- a_t * x + b_t * eps (+ sigma_t * z)
    a_t = [float(c1[t] * c_recip[t] + c2[t]) for t in range(T)]
    b_t = [float(-c1[t] * c_recipm1[t]) for t in range(T)]
    add_noise = [bool(sigma_np[t] != 0.0) for t in range(T)]
    half = row_tile // 2  # multiple of 8 by construction

    def kernel(x_init_ref,                 # (RT, A)    initial x = randn
               sf_ref,                     # (RT, S)    expanded state features (row tile)
               tproj_ref,                  # (T, H)     temb @ W1t + b1 (precomputed, f32)
               noise_ref,                  # (T, RT, A) per-step sigma[t]*randn_like
               w1x_ref,                    # (A, H)  bf16
               w1s_ref,                    # (S, H)  f32
               w2_ref, b2_ref,             # (H, H) bf16, (1, H) f32
               w3_ref, b3_ref,             # (H, A) bf16, (1, A) f32
               out_ref):                   # (RT, A)
        # --- hoisted, x-independent work (done once, not T times) ---
        cond = jnp.dot(sf_ref[...], w1s_ref[...],
                       preferred_element_type=jnp.float32)        # (RT, H) f32
        cond_a = cond[:half]
        cond_b = cond[half:]

        w1x = w1x_ref[...]   # bf16
        w2 = w2_ref[...]     # bf16
        w3 = w3_ref[...]     # bf16
        b2 = b2_ref[...]     # f32
        b3 = b3_ref[...]     # f32

        xa = x_init_ref[:half, :]                                  # two independent streams
        xb = x_init_ref[half:, :]

        # reversed(range(n_timesteps)) -- static trip count, fully unrolled.
        # TODO(synk): for realistic n_timesteps (>= ~50) switch this full unroll to a
        # lax.fori_loop(unroll=2-4) with the (a_t, b_t) table in SMEM to avoid compile-time
        # and vreg live-range blowup.
        for t in range(T - 1, -1, -1):
            te = tproj_ref[pl.ds(t, 1), :]                         # (1, H) static slice
            # ---- layer 1 (both half-tile streams interleaved; bf16 MXU, f32 acc) ----
            s1a = jnp.dot(xa.astype(jnp.bfloat16), w1x, preferred_element_type=jnp.float32)
            s1b = jnp.dot(xb.astype(jnp.bfloat16), w1x, preferred_element_type=jnp.float32)
            h1a = jnp.tanh(s1a + cond_a + te)
            h1b = jnp.tanh(s1b + cond_b + te)
            # ---- layer 2 ----
            s2a = jnp.dot(h1a.astype(jnp.bfloat16), w2, preferred_element_type=jnp.float32)
            s2b = jnp.dot(h1b.astype(jnp.bfloat16), w2, preferred_element_type=jnp.float32)
            h2a = jnp.tanh(s2a + b2)
            h2b = jnp.tanh(s2b + b2)
            # ---- layer 3: eps-prediction ----
            ea = jnp.dot(h2a.astype(jnp.bfloat16), w3, preferred_element_type=jnp.float32) + b3
            eb = jnp.dot(h2b.astype(jnp.bfloat16), w3, preferred_element_type=jnp.float32) + b3
            # ---- folded p_sample update: x = a_t*x + b_t*eps (+ pre-scaled noise) ----
            xa_new = a_t[t] * xa + b_t[t] * ea
            xb_new = a_t[t] * xb + b_t[t] * eb
            if add_noise[t]:               # t == 0: nonzero_mask == 0 (baked at trace time)
                xa_new = xa_new + noise_ref[t, :half, :]
                xb_new = xb_new + noise_ref[t, half:, :]
            xa, xb = xa_new, xb_new

        out_ref[:half, :] = xa
        out_ref[half:, :] = xb

    return kernel


# -----------------------------------------------------------------------------
# Wrapper (parameter / schedule setup + pallas_call glue)
# -----------------------------------------------------------------------------
def diffusion_policy_forward(state_feat, params, *, n_actions=1, n_timesteps=10,
                             action_dim=8, time_dim=16, key=None):
    B, S = state_feat.shape
    A = action_dim
    T = n_timesteps
    N = B * n_actions

    (w1x, w1s, w1t, b1, w2, b2, w3, b3) = params
    H = w2.shape[0]

    # ---- row padding / tiling ----
    N_pad, ROW_TILE = _choose_row_tiling(N)
    num_row_tiles = N_pad // ROW_TILE

    # state_feat.unsqueeze(1).expand(-1, n_actions, -1) -> flatten rows, pad to N_pad
    sf = jnp.broadcast_to(state_feat.astype(jnp.float32)[:, None, :],
                          (B, n_actions, S)).reshape(N, S)
    sf = jnp.pad(sf, ((0, N_pad - N), (0, 0)))

    # ---- schedule (host constants) and hoisted time-conditioning table ----
    coefs_np, sigma_np = make_schedule(T)
    temb = sinusoidal_time_embedding(T, time_dim)                  # (T, E)
    tproj = (jnp.dot(temb, w1t) + b1).astype(jnp.float32)          # (T, H)

    # ---- random draws (th.randn for x, per-step randn_like), sigma pre-folded ----
    k_init, k_noise = jax.random.split(key)
    x_init = jax.random.normal(k_init, (N_pad, A), dtype=jnp.float32)
    noise = jax.random.normal(k_noise, (T, N_pad, A), dtype=jnp.float32)
    noise = noise * jnp.asarray(sigma_np)[:, None, None]           # sigma[t] * z (sigma[0]=0)
    # TODO(synk): for realistic T / row counts, stream the noise per step via
    # memory_space=pl.ANY + make_async_copy (or generate it in-kernel with pltpu.prng_*)
    # instead of DMA-ing the whole (T, ROW_TILE, A) slab into VMEM.

    # ---- bf16 weights on the MXU path (f32 accumulation inside the kernel) ----
    w1x_b = w1x.astype(jnp.bfloat16)
    w2_b = w2.astype(jnp.bfloat16)
    w3_b = w3.astype(jnp.bfloat16)
    w1s_f = w1s.astype(jnp.float32)
    b2_f = b2.astype(jnp.float32)
    b3_f = b3.astype(jnp.float32)

    kernel = make_diffusion_sample_kernel(T, coefs_np, sigma_np, ROW_TILE)

    grid_spec = pltpu.PrefetchScalarGridSpec(
        num_scalar_prefetch=0,
        grid=(num_row_tiles,),
        in_specs=[
            pl.BlockSpec((ROW_TILE, A), lambda i: (i, 0)),         # x_init (row tile)
            pl.BlockSpec((ROW_TILE, S), lambda i: (i, 0)),         # state features (row tile)
            pl.BlockSpec((T, H), lambda i: (0, 0)),                # time-conditioning table
            pl.BlockSpec((T, ROW_TILE, A), lambda i: (0, i, 0)),   # pre-scaled per-step noise
            pl.BlockSpec((A, H), lambda i: (0, 0)),                # w1x (bf16)
            pl.BlockSpec((S, H), lambda i: (0, 0)),                # w1s (f32)
            pl.BlockSpec((H, H), lambda i: (0, 0)),                # w2  (bf16)
            pl.BlockSpec((1, H), lambda i: (0, 0)),                # b2
            pl.BlockSpec((H, A), lambda i: (0, 0)),                # w3  (bf16)
            pl.BlockSpec((1, A), lambda i: (0, 0)),                # b3
        ],
        out_specs=pl.BlockSpec((ROW_TILE, A), lambda i: (i, 0)),
    )

    # Advisory cost estimate so XLA schedules the wrapper-side ops around the call.
    flops = int(2 * N_pad * S * H + 2 * T * N_pad * (A * H + H * H + H * A))
    transcendentals = int(2 * T * N_pad * H)
    bytes_accessed = int(
        x_init.size * 4 + sf.size * 4 + tproj.size * 4 + noise.size * 4
        + w1x_b.size * 2 + w1s_f.size * 4 + w2_b.size * 2 + b2_f.size * 4
        + w3_b.size * 2 + b3_f.size * 4 + N_pad * A * 4)
    cost = pl.CostEstimate(flops=flops, transcendentals=transcendentals,
                           bytes_accessed=bytes_accessed)

    x_final = pl.pallas_call(
        kernel,
        out_shape=jax.ShapeDtypeStruct((N_pad, A), jnp.float32),
        grid_spec=grid_spec,
        compiler_params=pltpu.CompilerParams(
            dimension_semantics=("parallel",)),                    # rows shard across TCs (v7x)
        cost_estimate=cost,
    )(x_init, sf, tproj, noise, w1x_b, w1s_f, w2_b, b2_f, w3_b, b3_f)

    actions = x_final[:N].reshape(B, n_actions, A)
    return jnp.squeeze(actions)  # matches torch .squeeze()


def init_params(key, *, state_feat_dim, action_dim, hidden, time_dim):
    ks = jax.random.split(key, 8)
    sc = 0.1
    w1x = sc * jax.random.normal(ks[0], (action_dim, hidden), jnp.float32)
    w1s = sc * jax.random.normal(ks[1], (state_feat_dim, hidden), jnp.float32)
    w1t = sc * jax.random.normal(ks[2], (time_dim, hidden), jnp.float32)
    b1 = jnp.zeros((1, hidden), jnp.float32)
    w2 = sc * jax.random.normal(ks[3], (hidden, hidden), jnp.float32)
    b2 = jnp.zeros((1, hidden), jnp.float32)
    w3 = sc * jax.random.normal(ks[4], (hidden, action_dim), jnp.float32)
    b3 = jnp.zeros((1, action_dim), jnp.float32)
    return (w1x, w1s, w1t, b1, w2, b2, w3, b3)


if __name__ == "__main__":
    # TODO(synk): the reference module takes an arbitrary `model` class; a concrete
    # deterministic MLP eps-predictor is instantiated here in its place.
    B = 2
    STATE_FEAT_DIM = 16
    ACTION_DIM = 8
    N_ACTIONS = 1
    N_TIMESTEPS = 10
    HIDDEN = 128          # lane-dense hidden dim (multiple of 128)
    TIME_DIM = 16

    root = jax.random.PRNGKey(0)
    k_params, k_sf, k_sample = jax.random.split(root, 3)

    params = init_params(k_params, state_feat_dim=STATE_FEAT_DIM,
                         action_dim=ACTION_DIM, hidden=HIDDEN, time_dim=TIME_DIM)
    state_feat = jax.random.normal(k_sf, (B, STATE_FEAT_DIM), dtype=jnp.float32)

    actions = diffusion_policy_forward(
        state_feat, params,
        n_actions=N_ACTIONS, n_timesteps=N_TIMESTEPS,
        action_dim=ACTION_DIM, time_dim=TIME_DIM, key=k_sample)

    actions = jax.block_until_ready(actions)
    assert actions.shape == (B, ACTION_DIM), actions.shape
    assert bool(jnp.all(jnp.isfinite(actions)))
    print("KERNEL_OK")
</pallas_src>

<mosaic_0001>
module attributes {stable_mosaic.version = 11 : i64} {
  func.func @kernel(%arg0: i32, %arg1: memref<16x8xf32, #tpu.memory_space<vmem>>, %arg2: memref<16x16xf32, #tpu.memory_space<vmem>>, %arg3: memref<10x128xf32, #tpu.memory_space<vmem>>, %arg4: memref<10x16x8xf32, #tpu.memory_space<vmem>>, %arg5: memref<8x128xbf16, #tpu.memory_space<vmem>>, %arg6: memref<16x128xf32, #tpu.memory_space<vmem>>, %arg7: memref<128x128xbf16, #tpu.memory_space<vmem>>, %arg8: memref<1x128xf32, #tpu.memory_space<vmem>>, %arg9: memref<128x8xbf16, #tpu.memory_space<vmem>>, %arg10: memref<1x8xf32, #tpu.memory_space<vmem>>, %arg11: memref<16x8xf32, #tpu.memory_space<vmem>>) attributes {dimension_semantics = [#tpu.dimension_semantics<parallel>], iteration_bounds = array<i64: 1>, scalar_prefetch = 0 : i64, scratch_operands = 0 : i64, tpu.core_type = #tpu.core_type<tc>, window_params = [{transform_indices = @transform_0, window_bounds = array<i64: 16, 8>}, {transform_indices = @transform_1, window_bounds = array<i64: 16, 16>}, {pipeline_mode = #tpu.pipeline_mode<synchronous>, transform_indices = @transform_2, window_bounds = array<i64: 10, 128>}, {transform_indices = @transform_3, window_bounds = array<i64: 10, 16, 8>}, {pipeline_mode = #tpu.pipeline_mode<synchronous>, transform_indices = @transform_4, window_bounds = array<i64: 8, 128>}, {pipeline_mode = #tpu.pipeline_mode<synchronous>, transform_indices = @transform_5, window_bounds = array<i64: 16, 128>}, {pipeline_mode = #tpu.pipeline_mode<synchronous>, transform_indices = @transform_6, window_bounds = array<i64: 128, 128>}, {pipeline_mode = #tpu.pipeline_mode<synchronous>, transform_indices = @transform_7, window_bounds = array<i64: 1, 128>}, {pipeline_mode = #tpu.pipeline_mode<synchronous>, transform_indices = @transform_8, window_bounds = array<i64: 128, 8>}, {pipeline_mode = #tpu.pipeline_mode<synchronous>, transform_indices = @transform_9, window_bounds = array<i64: 1, 8>}, {transform_indices = @transform_10, window_bounds = array<i64: 16, 8>}]} {
    %c0 = arith.constant 0 : index
    %c0_0 = arith.constant 0 : index
    %0 = vector.load %arg2[%c0, %c0_0] : memref<16x16xf32, #tpu.memory_space<vmem>>, vector<16x16xf32>
    %c0_1 = arith.constant 0 : index
    %c0_2 = arith.constant 0 : index
    %1 = vector.load %arg6[%c0_1, %c0_2] : memref<16x128xf32, #tpu.memory_space<vmem>>, vector<16x128xf32>
    %cst = arith.constant dense<0.000000e+00> : vector<16x128xf32>
    %2 = tpu.matmul %0, %1, %cst {dimension_numbers = #tpu.dot_dimension_numbers<[1], [0], [0], [1], [0, 0, 1, 1], [], []>} : vector<16x16xf32>, vector<16x128xf32>, vector<16x128xf32> -> vector<16x128xf32>
    %3 = vector.extract_strided_slice %2 {offsets = [0, 0], sizes = [8, 128], strides = [1, 1]} : vector<16x128xf32> to vector<8x128xf32>
    %4 = vector.extract_strided_slice %2 {offsets = [8, 0], sizes = [8, 128], strides = [1, 1]} : vector<16x128xf32> to vector<8x128xf32>
    %c0_3 = arith.constant 0 : index
    %c0_4 = arith.constant 0 : index
    %5 = vector.load %arg5[%c0_3, %c0_4] : memref<8x128xbf16, #tpu.memory_space<vmem>>, vector<8x128xbf16>
    %c0_5 = arith.constant 0 : index
    %c0_6 = arith.constant 0 : index
    %6 = vector.load %arg7[%c0_5, %c0_6] : memref<128x128xbf16, #tpu.memory_space<vmem>>, vector<128x128xbf16>
    %c0_7 = arith.constant 0 : index
    %c0_8 = arith.constant 0 : index
    %7 = vector.load %arg9[%c0_7, %c0_8] : memref<128x8xbf16, #tpu.memory_space<vmem>>, vector<128x8xbf16>
    %c0_9 = arith.constant 0 : index
    %c0_10 = arith.constant 0 : index
    %8 = vector.load %arg8[%c0_9, %c0_10] : memref<1x128xf32, #tpu.memory_space<vmem>>, vector<1x128xf32>
    %c0_11 = arith.constant 0 : index
    %c0_12 = arith.constant 0 : index
    %9 = vector.load %arg10[%c0_11, %c0_12] : memref<1x8xf32, #tpu.memory_space<vmem>>, vector<1x8xf32>
    %c0_13 = arith.constant 0 : index
    %c0_14 = arith.constant 0 : index
    %10 = vector.load %arg1[%c0_13, %c0_14] : memref<16x8xf32, #tpu.memory_space<vmem>>, vector<8x8xf32>
    %c8 = arith.constant 8 : index
    %c0_15 = arith.constant 0 : index
    %11 = vector.load %arg1[%c8, %c0_15] : memref<16x8xf32, #tpu.memory_space<vmem>>, vector<8x8xf32>
    %c9 = arith.constant 9 : index
    %c0_16 = arith.constant 0 : index
    %12 = vector.load %arg3[%c9, %c0_16] : memref<10x128xf32, #tpu.memory_space<vmem>>, vector<1x128xf32>
    %13 = arith.truncf %10 : vector<8x8xf32> to vector<8x8xbf16>
    %cst_17 = arith.constant dense<0.000000e+00> : vector<8x128xf32>
    %14 = tpu.matmul %13, %5, %cst_17 {dimension_numbers = #tpu.dot_dimension_numbers<[1], [0], [0], [1], [0, 0, 1, 1], [], []>} : vector<8x8xbf16>, vector<8x128xbf16>, vector<8x128xf32> -> vector<8x128xf32>
    %15 = arith.truncf %11 : vector<8x8xf32> to vector<8x8xbf16>
    %cst_18 = arith.constant dense<0.000000e+00> : vector<8x128xf32>
    %16 = tpu.matmul %15, %5, %cst_18 {dimension_numbers = #tpu.dot_dimension_numbers<[1], [0], [0], [1], [0, 0, 1, 1], [], []>} : vector<8x8xbf16>, vector<8x128xbf16>, vector<8x128xf32> -> vector<8x128xf32>
    %17 = arith.addf %14, %3 : vector<8x128xf32>
    %18 = vector.broadcast %12 : vector<1x128xf32> to vector<8x128xf32>
    %19 = arith.addf %17, %18 : vector<8x128xf32>
    %20 = math.tanh %19 : vector<8x128xf32>
    %21 = arith.addf %16, %4 : vector<8x128xf32>
    %22 = vector.broadcast %12 : vector<1x128xf32> to vector<8x128xf32>
    %23 = arith.addf %21, %22 : vector<8x128xf32>
    %24 = math.tanh %23 : vector<8x128xf32>
    %25 = arith.truncf %20 : vector<8x128xf32> to vector<8x128xbf16>
    %cst_19 = arith.constant dense<0.000000e+00> : vector<8x128xf32>
    %26 = tpu.matmul %25, %6, %cst_19 {dimension_numbers = #tpu.dot_dimension_numbers<[1], [0], [0], [1], [0, 0, 1, 1], [], []>} : vector<8x128xbf16>, vector<128x128xbf16>, vector<8x128xf32> -> vector<8x128xf32>
    %27 = arith.truncf %24 : vector<8x128xf32> to vector<8x128xbf16>
    %cst_20 = arith.constant dense<0.000000e+00> : vector<8x128xf32>
    %28 = tpu.matmul %27, %6, %cst_20 {dimension_numbers = #tpu.dot_dimension_numbers<[1], [0], [0], [1], [0, 0, 1, 1], [], []>} : vector<8x128xbf16>, vector<128x128xbf16>, vector<8x128xf32> -> vector<8x128xf32>
    %29 = vector.broadcast %8 : vector<1x128xf32> to vector<8x128xf32>
    %30 = arith.addf %26, %29 : vector<8x128xf32>
    %31 = math.tanh %30 : vector<8x128xf32>
    %32 = vector.broadcast %8 : vector<1x128xf32> to vector<8x128xf32>
    %33 = arith.addf %28, %32 : vector<8x128xf32>
    %34 = math.tanh %33 : vector<8x128xf32>
    %35 = arith.truncf %31 : vector<8x128xf32> to vector<8x128xbf16>
    %cst_21 = arith.constant dense<0.000000e+00> : vector<8x8xf32>
    %36 = tpu.matmul %35, %7, %cst_21 {dimension_numbers = #tpu.dot_dimension_numbers<[1], [0], [0], [1], [0, 0, 1, 1], [], []>} : vector<8x128xbf16>, vector<128x8xbf16>, vector<8x8xf32> -> vector<8x8xf32>
    %37 = vector.broadcast %9 : vector<1x8xf32> to vector<8x8xf32>
    %38 = arith.addf %36, %37 : vector<8x8xf32>
    %39 = arith.truncf %34 : vector<8x128xf32> to vector<8x128xbf16>
    %cst_22 = arith.constant dense<0.000000e+00> : vector<8x8xf32>
    %40 = tpu.matmul %39, %7, %cst_22 {dimension_numbers = #tpu.dot_dimension_numbers<[1], [0], [0], [1], [0, 0, 1, 1], [], []>} : vector<8x128xbf16>, vector<128x8xbf16>, vector<8x8xf32> -> vector<8x8xf32>
    %41 = vector.broadcast %9 : vector<1x8xf32> to vector<8x8xf32>
    %42 = arith.addf %40, %41 : vector<8x8xf32>
    %cst_23 = arith.constant 1.01015282 : f32
    %43 = vector.broadcast %cst_23 : f32 to vector<8x8xf32>
    %44 = arith.mulf %43, %10 : vector<8x8xf32>
    %cst_24 = arith.constant -0.0651167631 : f32
    %45 = vector.broadcast %cst_24 : f32 to vector<8x8xf32>
    %46 = arith.mulf %45, %38 : vector<8x8xf32>
    %47 = arith.addf %44, %46 : vector<8x8xf32>
    %cst_25 = arith.constant 1.01015282 : f32
    %48 = vector.broadcast %cst_25 : f32 to vector<8x8xf32>
    %49 = arith.mulf %48, %11 : vector<8x8xf32>
    %cst_26 = arith.constant -0.0651167631 : f32
    %50 = vector.broadcast %cst_26 : f32 to vector<8x8xf32>
    %51 = arith.mulf %50, %42 : vector<8x8xf32>
    %52 = arith.addf %49, %51 : vector<8x8xf32>
    %c9_27 = arith.constant 9 : index
    %c0_28 = arith.constant 0 : index
    %c0_29 = arith.constant 0 : index
    %53 = vector.load %arg4[%c9_27, %c0_28, %c0_29] : memref<10x16x8xf32, #tpu.memory_space<vmem>>, vector<1x8x8xf32>
    %54 = vector.shape_cast %53 : vector<1x8x8xf32> to vector<8x8xf32>
    %55 = arith.addf %47, %54 : vector<8x8xf32>
    %c9_30 = arith.constant 9 : index
    %c8_31 = arith.constant 8 : index
    %c0_32 = arith.constant 0 : index
    %56 = vector.load %arg4[%c9_30, %c8_31, %c0_32] : memref<10x16x8xf32, #tpu.memory_space<vmem>>, vector<1x8x8xf32>
    %57 = vector.shape_cast %56 : vector<1x8x8xf32> to vector<8x8xf32>
    %58 = arith.addf %52, %57 : vector<8x8xf32>
    %c8_33 = arith.constant 8 : index
    %c0_34 = arith.constant 0 : index
    %59 = vector.load %arg3[%c8_33, %c0_34] : memref<10x128xf32, #tpu.memory_space<vmem>>, vector<1x128xf32>
    %60 = arith.truncf %55 : vector<8x8xf32> to vector<8x8xbf16>
    %cst_35 = arith.constant dense<0.000000e+00> : vector<8x128xf32>
    %61 = tpu.matmul %60, %5, %cst_35 {dimension_numbers = #tpu.dot_dimension_numbers<[1], [0], [0], [1], [0, 0, 1, 1], [], []>} : vector<8x8xbf16>, vector<8x128xbf16>, vector<8x128xf32> -> vector<8x128xf32>
    %62 = arith.truncf %58 : vector<8x8xf32> to vector<8x8xbf16>
    %cst_36 = arith.constant dense<0.000000e+00> : vector<8x128xf32>
    %63 = tpu.matmul %62, %5, %cst_36 {dimension_numbers = #tpu.dot_dimension_numbers<[1], [0], [0], [1], [0, 0, 1, 1], [], []>} : vector<8x8xbf16>, vector<8x128xbf16>, vector<8x128xf32> -> vector<8x128xf32>
    %64 = arith.addf %61, %3 : vector<8x128xf32>
    %65 = vector.broadcast %59 : vector<1x128xf32> to vector<8x128xf32>
    %66 = arith.addf %64, %65 : vector<8x128xf32>
    %67 = math.tanh %66 : vector<8x128xf32>
    %68 = arith.addf %63, %4 : vector<8x128xf32>
    %69 = vector.broadcast %59 : vector<1x128xf32> to vector<8x128xf32>
    %70 = arith.addf %68, %69 : vector<8x128xf32>
    %71 = math.tanh %70 : vector<8x128xf32>
    %72 = arith.truncf %67 : vector<8x128xf32> to vector<8x128xbf16>
    %cst_37 = arith.constant dense<0.000000e+00> : vector<8x128xf32>
    %73 = tpu.matmul %72, %6, %cst_37 {dimension_numbers = #tpu.dot_dimension_numbers<[1], [0], [0], [1], [0, 0, 1, 1], [], []>} : vector<8x128xbf16>, vector<128x128xbf16>, vector<8x128xf32> -> vector<8x128xf32>
    %74 = arith.truncf %71 : vector<8x128xf32> to vector<8x128xbf16>
    %cst_38 = arith.constant dense<0.000000e+00> : vector<8x128xf32>
    %75 = tpu.matmul %74, %6, %cst_38 {dimension_numbers = #tpu.dot_dimension_numbers<[1], [0], [0], [1], [0, 0, 1, 1], [], []>} : vector<8x128xbf16>, vector<128x128xbf16>, vector<8x128xf32> -> vector<8x128xf32>
    %76 = vector.broadcast %8 : vector<1x128xf32> to vector<8x128xf32>
    %77 = arith.addf %73, %76 : vector<8x128xf32>
    %78 = math.tanh %77 : vector<8x128xf32>
    %79 = vector.broadcast %8 : vector<1x128xf32> to vector<8x128xf32>
    %80 = arith.addf %75, %79 : vector<8x128xf32>
    %81 = math.tanh %80 : vector<8x128xf32>
    %82 = arith.truncf %78 : vector<8x128xf32> to vector<8x128xbf16>
    %cst_39 = arith.constant dense<0.000000e+00> : vector<8x8xf32>
    %83 = tpu.matmul %82, %7, %cst_39 {dimension_numbers = #tpu.dot_dimension_numbers<[1], [0], [0], [1], [0, 0, 1, 1], [], []>} : vector<8x128xbf16>, vector<128x8xbf16>, vector<8x8xf32> -> vector<8x8xf32>
    %84 = vector.broadcast %9 : vector<1x8xf32> to vector<8x8xf32>
    %85 = arith.addf %83, %84 : vector<8x8xf32>
    %86 = arith.truncf %81 : vector<8x128xf32> to vector<8x128xbf16>
    %cst_40 = arith.constant dense<0.000000e+00> : vector<8x8xf32>
    %87 = tpu.matmul %86, %7, %cst_40 {dimension_numbers = #tpu.dot_dimension_numbers<[1], [0], [0], [1], [0, 0, 1, 1], [], []>} : vector<8x128xbf16>, vector<128x8xbf16>, vector<8x8xf32> -> vector<8x8xf32>
    %88 = vector.broadcast %9 : vector<1x8xf32> to vector<8x8xf32>
    %89 = arith.addf %87, %88 : vector<8x8xf32>
    %cst_41 = arith.constant 1.00901508 : f32
    %90 = vector.broadcast %cst_41 : f32 to vector<8x8xf32>
    %91 = arith.mulf %90, %55 : vector<8x8xf32>
    %cst_42 = arith.constant -0.064344205 : f32
    %92 = vector.broadcast %cst_42 : f32 to vector<8x8xf32>
    %93 = arith.mulf %92, %85 : vector<8x8xf32>
    %94 = arith.addf %91, %93 : vector<8x8xf32>
    %cst_43 = arith.constant 1.00901508 : f32
    %95 = vector.broadcast %cst_43 : f32 to vector<8x8xf32>
    %96 = arith.mulf %95, %58 : vector<8x8xf32>
    %cst_44 = arith.constant -0.064344205 : f32
    %97 = vector.broadcast %cst_44 : f32 to vector<8x8xf32>
    %98 = arith.mulf %97, %89 : vector<8x8xf32>
    %99 = arith.addf %96, %98 : vector<8x8xf32>
    %c8_45 = arith.constant 8 : index
    %c0_46 = arith.constant 0 : index
    %c0_47 = arith.constant 0 : index
    %100 = vector.load %arg4[%c8_45, %c0_46, %c0_47] : memref<10x16x8xf32, #tpu.memory_space<vmem>>, vector<1x8x8xf32>
    %101 = vector.shape_cast %100 : vector<1x8x8xf32> to vector<8x8xf32>
    %102 = arith.addf %94, %101 : vector<8x8xf32>
    %c8_48 = arith.constant 8 : index
    %c8_49 = arith.constant 8 : index
    %c0_50 = arith.constant 0 : index
    %103 = vector.load %arg4[%c8_48, %c8_49, %c0_50] : memref<10x16x8xf32, #tpu.memory_space<vmem>>, vector<1x8x8xf32>
    %104 = vector.shape_cast %103 : vector<1x8x8xf32> to vector<8x8xf32>
    %105 = arith.addf %99, %104 : vector<8x8xf32>
    %c7 = arith.constant 7 : index
    %c0_51 = arith.constant 0 : index
    %106 = vector.load %arg3[%c7, %c0_51] : memref<10x128xf32, #tpu.memory_space<vmem>>, vector<1x128xf32>
    %107 = arith.truncf %102 : vector<8x8xf32> to vector<8x8xbf16>
    %cst_52 = arith.constant dense<0.000000e+00> : vector<8x128xf32>
    %108 = tpu.matmul %107, %5, %cst_52 {dimension_numbers = #tpu.dot_dimension_numbers<[1], [0], [0], [1], [0, 0, 1, 1], [], []>} : vector<8x8xbf16>, vector<8x128xbf16>, vector<8x128xf32> -> vector<8x128xf32>
    %109 = arith.truncf %105 : vector<8x8xf32> to vector<8x8xbf16>
    %cst_53 = arith.constant dense<0.000000e+00> : vector<8x128xf32>
    %110 = tpu.matmul %109, %5, %cst_53 {dimension_numbers = #tpu.dot_dimension_numbers<[1], [0], [0], [1], [0, 0, 1, 1], [], []>} : vector<8x8xbf16>, vector<8x128xbf16>, vector<8x128xf32> -> vector<8x128xf32>
    %111 = arith.addf %108, %3 : vector<8x128xf32>
    %112 = vector.broadcast %106 : vector<1x128xf32> to vector<8x128xf32>
    %113 = arith.addf %111, %112 : vector<8x128xf32>
    %114 = math.tanh %113 : vector<8x128xf32>
    %115 = arith.addf %110, %4 : vector<8x128xf32>
    %116 = vector.broadcast %106 : vector<1x128xf32> to vector<8x128xf32>
    %117 = arith.addf %115, %116 : vector<8x128xf32>
    %118 = math.tanh %117 : vector<8x128xf32>
    %119 = arith.truncf %114 : vector<8x128xf32> to vector<8x128xbf16>
    %cst_54 = arith.constant dense<0.000000e+00> : vector<8x128xf32>
    %120 = tpu.matmul %119, %6, %cst_54 {dimension_numbers = #tpu.dot_dimension_numbers<[1], [0], [0], [1], [0, 0, 1, 1], [], []>} : vector<8x128xbf16>, vector<128x128xbf16>, vector<8x128xf32> -> vector<8x128xf32>
    %121 = arith.truncf %118 : vector<8x128xf32> to vector<8x128xbf16>
    %cst_55 = arith.constant dense<0.000000e+00> : vector<8x128xf32>
    %122 = tpu.matmul %121, %6, %cst_55 {dimension_numbers = #tpu.dot_dimension_numbers<[1], [0], [0], [1], [0, 0, 1, 1], [], []>} : vector<8x128xbf16>, vector<128x128xbf16>, vector<8x128xf32> -> vector<8x128xf32>
    %123 = vector.broadcast %8 : vector<1x128xf32> to vector<8x128xf32>
    %124 = arith.addf %120, %123 : vector<8x128xf32>
    %125 = math.tanh %124 : vector<8x128xf32>
    %126 = vector.broadcast %8 : vector<1x128xf32> to vector<8x128xf32>
    %127 = arith.addf %122, %126 : vector<8x128xf32>
    %128 = math.tanh %127 : vector<8x128xf32>
    %129 = arith.truncf %125 : vector<8x128xf32> to vector<8x128xbf16>
    %cst_56 = arith.constant dense<0.000000e+00> : vector<8x8xf32>
    %130 = tpu.matmul %129, %7, %cst_56 {dimension_numbers = #tpu.dot_dimension_numbers<[1], [0], [0], [1], [0, 0, 1, 1], [], []>} : vector<8x128xbf16>, vector<128x8xbf16>, vector<8x8xf32> -> vector<8x8xf32>
    %131 = vector.broadcast %9 : vector<1x8xf32> to vector<8x8xf32>
    %132 = arith.addf %130, %131 : vector<8x8xf32>
    %133 = arith.truncf %128 : vector<8x128xf32> to vector<8x128xbf16>
    %cst_57 = arith.constant dense<0.000000e+00> : vector<8x8xf32>
    %134 = tpu.matmul %133, %7, %cst_57 {dimension_numbers = #tpu.dot_dimension_numbers<[1], [0], [0], [1], [0, 0, 1, 1], [], []>} : vector<8x128xbf16>, vector<128x8xbf16>, vector<8x8xf32> -> vector<8x8xf32>
    %135 = vector.broadcast %9 : vector<1x8xf32> to vector<8x8xf32>
    %136 = arith.addf %134, %135 : vector<8x8xf32>
    %cst_58 = arith.constant 1.00788116 : f32
    %137 = vector.broadcast %cst_58 : f32 to vector<8x8xf32>
    %138 = arith.mulf %137, %102 : vector<8x8xf32>
    %cst_59 = arith.constant -0.0635097101 : f32
    %139 = vector.broadcast %cst_59 : f32 to vector<8x8xf32>
    %140 = arith.mulf %139, %132 : vector<8x8xf32>
    %141 = arith.addf %138, %140 : vector<8x8xf32>
    %cst_60 = arith.constant 1.00788116 : f32
    %142 = vector.broadcast %cst_60 : f32 to vector<8x8xf32>
    %143 = arith.mulf %142, %105 : vector<8x8xf32>
    %cst_61 = arith.constant -0.0635097101 : f32
    %144 = vector.broadcast %cst_61 : f32 to vector<8x8xf32>
    %145 = arith.mulf %144, %136 : vector<8x8xf32>
    %146 = arith.addf %143, %145 : vector<8x8xf32>
    %c7_62 = arith.constant 7 : index
    %c0_63 = arith.constant 0 : index
    %c0_64 = arith.constant 0 : index
    %147 = vector.load %arg4[%c7_62, %c0_63, %c0_64] : memref<10x16x8xf32, #tpu.memory_space<vmem>>, vector<1x8x8xf32>
    %148 = vector.shape_cast %147 : vector<1x8x8xf32> to vector<8x8xf32>
    %149 = arith.addf %141, %148 : vector<8x8xf32>
    %c7_65 = arith.constant 7 : index
    %c8_66 = arith.constant 8 : index
    %c0_67 = arith.constant 0 : index
    %150 = vector.load %arg4[%c7_65, %c8_66, %c0_67] : memref<10x16x8xf32, #tpu.memory_space<vmem>>, vector<1x8x8xf32>
    %151 = vector.shape_cast %150 : vector<1x8x8xf32> to vector<8x8xf32>
    %152 = arith.addf %146, %151 : vector<8x8xf32>
    %c6 = arith.constant 6 : index
    %c0_68 = arith.constant 0 : index
    %153 = vector.load %arg3[%c6, %c0_68] : memref<10x128xf32, #tpu.memory_space<vmem>>, vector<1x128xf32>
    %154 = arith.truncf %149 : vector<8x8xf32> to vector<8x8xbf16>
    %cst_69 = arith.constant dense<0.000000e+00> : vector<8x128xf32>
    %155 = tpu.matmul %154, %5, %cst_69 {dimension_numbers = #tpu.dot_dimension_numbers<[1], [0], [0], [1], [0, 0, 1, 1], [], []>} : vector<8x8xbf16>, vector<8x128xbf16>, vector<8x128xf32> -> vector<8x128xf32>
    %156 = arith.truncf %152 : vector<8x8xf32> to vector<8x8xbf16>
    %cst_70 = arith.constant dense<0.000000e+00> : vector<8x128xf32>
    %157 = tpu.matmul %156, %5, %cst_70 {dimension_numbers = #tpu.dot_dimension_numbers<[1], [0], [0], [1], [0, 0, 1, 1], [], []>} : vector<8x8xbf16>, vector<8x128xbf16>, vector<8x128xf32> -> vector<8x128xf32>
    %158 = arith.addf %155, %3 : vector<8x128xf32>
    %159 = vector.broadcast %153 : vector<1x128xf32> to vector<8x128xf32>
    %160 = arith.addf %158, %159 : vector<8x128xf32>
    %161 = math.tanh %160 : vector<8x128xf32>
    %162 = arith.addf %157, %4 : vector<8x128xf32>
    %163 = vector.broadcast %153 : vector<1x128xf32> to vector<8x128xf32>
    %164 = arith.addf %162, %163 : vector<8x128xf32>
    %165 = math.tanh %164 : vector<8x128xf32>
    %166 = arith.truncf %161 : vector<8x128xf32> to vector<8x128xbf16>
    %cst_71 = arith.constant dense<0.000000e+00> : vector<8x128xf32>
    %167 = tpu.matmul %166, %6, %cst_71 {dimension_numbers = #tpu.dot_dimension_numbers<[1], [0], [0], [1], [0, 0, 1, 1], [], []>} : vector<8x128xbf16>, vector<128x128xbf16>, vector<8x128xf32> -> vector<8x128xf32>
    %168 = arith.truncf %165 : vector<8x128xf32> to vector<8x128xbf16>
    %cst_72 = arith.constant dense<0.000000e+00> : vector<8x128xf32>
    %169 = tpu.matmul %168, %6, %cst_72 {dimension_numbers = #tpu.dot_dimension_numbers<[1], [0], [0], [1], [0, 0, 1, 1], [], []>} : vector<8x128xbf16>, vector<128x128xbf16>, vector<8x128xf32> -> vector<8x128xf32>
    %170 = vector.broadcast %8 : vector<1x128xf32> to vector<8x128xf32>
    %171 = arith.addf %167, %170 : vector<8x128xf32>
    %172 = math.tanh %171 : vector<8x128xf32>
    %173 = vector.broadcast %8 : vector<1x128xf32> to vector<8x128xf32>
    %174 = arith.addf %169, %173 : vector<8x128xf32>
    %175 = math.tanh %174 : vector<8x128xf32>
    %176 = arith.truncf %172 : vector<8x128xf32> to vector<8x128xbf16>
    %cst_73 = arith.constant dense<0.000000e+00> : vector<8x8xf32>
    %177 = tpu.matmul %176, %7, %cst_73 {dimension_numbers = #tpu.dot_dimension_numbers<[1], [0], [0], [1], [0, 0, 1, 1], [], []>} : vector<8x128xbf16>, vector<128x8xbf16>, vector<8x8xf32> -> vector<8x8xf32>
    %178 = vector.broadcast %9 : vector<1x8xf32> to vector<8x8xf32>
    %179 = arith.addf %177, %178 : vector<8x8xf32>
    %180 = arith.truncf %175 : vector<8x128xf32> to vector<8x128xbf16>
    %cst_74 = arith.constant dense<0.000000e+00> : vector<8x8xf32>
    %181 = tpu.matmul %180, %7, %cst_74 {dimension_numbers = #tpu.dot_dimension_numbers<[1], [0], [0], [1], [0, 0, 1, 1], [], []>} : vector<8x128xbf16>, vector<128x8xbf16>, vector<8x8xf32> -> vector<8x8xf32>
    %182 = vector.broadcast %9 : vector<1x8xf32> to vector<8x8xf32>
    %183 = arith.addf %181, %182 : vector<8x8xf32>
    %cst_75 = arith.constant 1.00675166 : f32
    %184 = vector.broadcast %cst_75 : f32 to vector<8x8xf32>
    %185 = arith.mulf %184, %149 : vector<8x8xf32>
    %cst_76 = arith.constant -0.0625679046 : f32
    %186 = vector.broadcast %cst_76 : f32 to vector<8x8xf32>
    %187 = arith.mulf %186, %179 : vector<8x8xf32>
    %188 = arith.addf %185, %187 : vector<8x8xf32>
    %cst_77 = arith.constant 1.00675166 : f32
    %189 = vector.broadcast %cst_77 : f32 to vector<8x8xf32>
    %190 = arith.mulf %189, %152 : vector<8x8xf32>
    %cst_78 = arith.constant -0.0625679046 : f32
    %191 = vector.broadcast %cst_78 : f32 to vector<8x8xf32>
    %192 = arith.mulf %191, %183 : vector<8x8xf32>
    %193 = arith.addf %190, %192 : vector<8x8xf32>
    %c6_79 = arith.constant 6 : index
    %c0_80 = arith.constant 0 : index
    %c0_81 = arith.constant 0 : index
    %194 = vector.load %arg4[%c6_79, %c0_80, %c0_81] : memref<10x16x8xf32, #tpu.memory_space<vmem>>, vector<1x8x8xf32>
    %195 = vector.shape_cast %194 : vector<1x8x8xf32> to vector<8x8xf32>
    %196 = arith.addf %188, %195 : vector<8x8xf32>
    %c6_82 = arith.constant 6 : index
    %c8_83 = arith.constant 8 : index
    %c0_84 = arith.constant 0 : index
    %197 = vector.load %arg4[%c6_82, %c8_83, %c0_84] : memref<10x16x8xf32, #tpu.memory_space<vmem>>, vector<1x8x8xf32>
    %198 = vector.shape_cast %197 : vector<1x8x8xf32> to vector<8x8xf32>
    %199 = arith.addf %193, %198 : vector<8x8xf32>
    %c5 = arith.constant 5 : index
    %c0_85 = arith.constant 0 : index
    %200 = vector.load %arg3[%c5, %c0_85] : memref<10x128xf32, #tpu.memory_space<vmem>>, vector<1x128xf32>
    %201 = arith.truncf %196 : vector<8x8xf32> to vector<8x8xbf16>
    %cst_86 = arith.constant dense<0.000000e+00> : vector<8x128xf32>
    %202 = tpu.matmul %201, %5, %cst_86 {dimension_numbers = #tpu.dot_dimension_numbers<[1], [0], [0], [1], [0, 0, 1, 1], [], []>} : vector<8x8xbf16>, vector<8x128xbf16>, vector<8x128xf32> -> vector<8x128xf32>
    %203 = arith.truncf %199 : vector<8x8xf32> to vector<8x8xbf16>
    %cst_87 = arith.constant dense<0.000000e+00> : vector<8x128xf32>
    %204 = tpu.matmul %203, %5, %cst_87 {dimension_numbers = #tpu.dot_dimension_numbers<[1], [0], [0], [1], [0, 0, 1, 1], [], []>} : vector<8x8xbf16>, vector<8x128xbf16>, vector<8x128xf32> -> vector<8x128xf32>
    %205 = arith.addf %202, %3 : vector<8x128xf32>
    %206 = vector.broadcast %200 : vector<1x128xf32> to vector<8x128xf32>
    %207 = arith.addf %205, %206 : vector<8x128xf32>
    %208 = math.tanh %207 : vector<8x128xf32>
    %209 = arith.addf %204, %4 : vector<8x128xf32>
    %210 = vector.broadcast %200 : vector<1x128xf32> to vector<8x128xf32>
    %211 = arith.addf %209, %210 : vector<8x128xf32>
    %212 = math.tanh %211 : vector<8x128xf32>
    %213 = arith.truncf %208 : vector<8x128xf32> to vector<8x128xbf16>
    %cst_88 = arith.constant dense<0.000000e+00> : vector<8x128xf32>
    %214 = tpu.matmul %213, %6, %cst_88 {dimension_numbers = #tpu.dot_dimension_numbers<[1], [0], [0], [1], [0, 0, 1, 1], [], []>} : vector<8x128xbf16>, vector<128x128xbf16>, vector<8x128xf32> -> vector<8x128xf32>
    %215 = arith.truncf %212 : vector<8x128xf32> to vector<8x128xbf16>
    %cst_89 = arith.constant dense<0.000000e+00> : vector<8x128xf32>
    %216 = tpu.matmul %215, %6, %cst_89 {dimension_numbers = #tpu.dot_dimension_numbers<[1], [0], [0], [1], [0, 0, 1, 1], [], []>} : vector<8x128xbf16>, vector<128x128xbf16>, vector<8x128xf32> -> vector<8x128xf32>
    %217 = vector.broadcast %8 : vector<1x128xf32> to vector<8x128xf32>
    %218 = arith.addf %214, %217 : vector<8x128xf32>
    %219 = math.tanh %218 : vector<8x128xf32>
    %220 = vector.broadcast %8 : vector<1x128xf32> to vector<8x128xf32>
    %221 = arith.addf %216, %220 : vector<8x128xf32>
    %222 = math.tanh %221 : vector<8x128xf32>
    %223 = arith.truncf %219 : vector<8x128xf32> to vector<8x128xbf16>
    %cst_90 = arith.constant dense<0.000000e+00> : vector<8x8xf32>
    %224 = tpu.matmul %223, %7, %cst_90 {dimension_numbers = #tpu.dot_dimension_numbers<[1], [0], [0], [1], [0, 0, 1, 1], [], []>} : vector<8x128xbf16>, vector<128x8xbf16>, vector<8x8xf32> -> vector<8x8xf32>
    %225 = vector.broadcast %9 : vector<1x8xf32> to vector<8x8xf32>
    %226 = arith.addf %224, %225 : vector<8x8xf32>
    %227 = arith.truncf %222 : vector<8x128xf32> to vector<8x128xbf16>
    %cst_91 = arith.constant dense<0.000000e+00> : vector<8x8xf32>
    %228 = tpu.matmul %227, %7, %cst_91 {dimension_numbers = #tpu.dot_dimension_numbers<[1], [0], [0], [1], [0, 0, 1, 1], [], []>} : vector<8x128xbf16>, vector<128x8xbf16>, vector<8x8xf32> -> vector<8x8xf32>
    %229 = vector.broadcast %9 : vector<1x8xf32> to vector<8x8xf32>
    %230 = arith.addf %228, %229 : vector<8x8xf32>
    %cst_92 = arith.constant 1.00562453 : f32
    %231 = vector.broadcast %cst_92 : f32 to vector<8x8xf32>
    %232 = arith.mulf %231, %196 : vector<8x8xf32>
    %cst_93 = arith.constant -0.0614417791 : f32
    %233 = vector.broadcast %cst_93 : f32 to vector<8x8xf32>
    %234 = arith.mulf %233, %226 : vector<8x8xf32>
    %235 = arith.addf %232, %234 : vector<8x8xf32>
    %cst_94 = arith.constant 1.00562453 : f32
    %236 = vector.broadcast %cst_94 : f32 to vector<8x8xf32>
    %237 = arith.mulf %236, %199 : vector<8x8xf32>
    %cst_95 = arith.constant -0.0614417791 : f32
    %238 = vector.broadcast %cst_95 : f32 to vector<8x8xf32>
    %239 = arith.mulf %238, %230 : vector<8x8xf32>
    %240 = arith.addf %237, %239 : vector<8x8xf32>
    %c5_96 = arith.constant 5 : index
    %c0_97 = arith.constant 0 : index
    %c0_98 = arith.constant 0 : index
    %241 = vector.load %arg4[%c5_96, %c0_97, %c0_98] : memref<10x16x8xf32, #tpu.memory_space<vmem>>, vector<1x8x8xf32>
    %242 = vector.shape_cast %241 : vector<1x8x8xf32> to vector<8x8xf32>
    %243 = arith.addf %235, %242 : vector<8x8xf32>
    %c5_99 = arith.constant 5 : index
    %c8_100 = arith.constant 8 : index
    %c0_101 = arith.constant 0 : index
    %244 = vector.load %arg4[%c5_99, %c8_100, %c0_101] : memref<10x16x8xf32, #tpu.memory_space<vmem>>, vector<1x8x8xf32>
    %245 = vector.shape_cast %244 : vector<1x8x8xf32> to vector<8x8xf32>
    %246 = arith.addf %240, %245 : vector<8x8xf32>
    %c4 = arith.constant 4 : index
    %c0_102 = arith.constant 0 : index
    %247 = vector.load %arg3[%c4, %c0_102] : memref<10x128xf32, #tpu.memory_space<vmem>>, vector<1x128xf32>
    %248 = arith.truncf %243 : vector<8x8xf32> to vector<8x8xbf16>
    %cst_103 = arith.constant dense<0.000000e+00> : vector<8x128xf32>
    %249 = tpu.matmul %248, %5, %cst_103 {dimension_numbers = #tpu.dot_dimension_numbers<[1], [0], [0], [1], [0, 0, 1, 1], [], []>} : vector<8x8xbf16>, vector<8x128xbf16>, vector<8x128xf32> -> vector<8x128xf32>
    %250 = arith.truncf %246 : vector<8x8xf32> to vector<8x8xbf16>
    %cst_104 = arith.constant dense<0.000000e+00> : vector<8x128xf32>
    %251 = tpu.matmul %250, %5, %cst_104 {dimension_numbers = #tpu.dot_dimension_numbers<[1], [0], [0], [1], [0, 0, 1, 1], [], []>} : vector<8x8xbf16>, vector<8x128xbf16>, vector<8x128xf32> -> vector<8x128xf32>
    %252 = arith.addf %249, %3 : vector<8x128xf32>
    %253 = vector.broadcast %247 : vector<1x128xf32> to vector<8x128xf32>
    %254 = arith.addf %252, %253 : vector<8x128xf32>
    %255 = math.tanh %254 : vector<8x128xf32>
    %256 = arith.addf %251, %4 : vector<8x128xf32>
    %257 = vector.broadcast %247 : vector<1x128xf32> to vector<8x128xf32>
    %258 = arith.addf %256, %257 : vector<8x128xf32>
    %259 = math.tanh %258 : vector<8x128xf32>
    %260 = arith.truncf %255 : vector<8x128xf32> to vector<8x128xbf16>
    %cst_105 = arith.constant dense<0.000000e+00> : vector<8x128xf32>
    %261 = tpu.matmul %260, %6, %cst_105 {dimension_numbers = #tpu.dot_dimension_numbers<[1], [0], [0], [1], [0, 0, 1, 1], [], []>} : vector<8x128xbf16>, vector<128x128xbf16>, vector<8x128xf32> -> vector<8x128xf32>
    %262 = arith.truncf %259 : vector<8x128xf32> to vector<8x128xbf16>
    %cst_106 = arith.constant dense<0.000000e+00> : vector<8x128xf32>
    %263 = tpu.matmul %262, %6, %cst_106 {dimension_numbers = #tpu.dot_dimension_numbers<[1], [0], [0], [1], [0, 0, 1, 1], [], []>} : vector<8x128xbf16>, vector<128x128xbf16>, vector<8x128xf32> -> vector<8x128xf32>
    %264 = vector.broadcast %8 : vector<1x128xf32> to vector<8x128xf32>
    %265 = arith.addf %261, %264 : vector<8x128xf32>
    %266 = math.tanh %265 : vector<8x128xf32>
    %267 = vector.broadcast %8 : vector<1x128xf32> to vector<8x128xf32>
    %268 = arith.addf %263, %267 : vector<8x128xf32>
    %269 = math.tanh %268 : vector<8x128xf32>
    %270 = arith.truncf %266 : vector<8x128xf32> to vector<8x128xbf16>
    %cst_107 = arith.constant dense<0.000000e+00> : vector<8x8xf32>
    %271 = tpu.matmul %270, %7, %cst_107 {dimension_numbers = #tpu.dot_dimension_numbers<[1], [0], [0], [1], [0, 0, 1, 1], [], []>} : vector<8x128xbf16>, vector<128x8xbf16>, vector<8x8xf32> -> vector<8x8xf32>
    %272 = vector.broadcast %9 : vector<1x8xf32> to vector<8x8xf32>
    %273 = arith.addf %271, %272 : vector<8x8xf32>
    %274 = arith.truncf %269 : vector<8x128xf32> to vector<8x128xbf16>
    %cst_108 = arith.constant dense<0.000000e+00> : vector<8x8xf32>
    %275 = tpu.matmul %274, %7, %cst_108 {dimension_numbers = #tpu.dot_dimension_numbers<[1], [0], [0], [1], [0, 0, 1, 1], [], []>} : vector<8x128xbf16>, vector<128x8xbf16>, vector<8x8xf32> -> vector<8x8xf32>
    %276 = vector.broadcast %9 : vector<1x8xf32> to vector<8x8xf32>
    %277 = arith.addf %275, %276 : vector<8x8xf32>
    %cst_109 = arith.constant 1.00450158 : f32
    %278 = vector.broadcast %cst_109 : f32 to vector<8x8xf32>
    %279 = arith.mulf %278, %243 : vector<8x8xf32>
    %cst_110 = arith.constant -0.0599892177 : f32
    %280 = vector.broadcast %cst_110 : f32 to vector<8x8xf32>
    %281 = arith.mulf %280, %273 : vector<8x8xf32>
    %282 = arith.addf %279, %281 : vector<8x8xf32>
    %cst_111 = arith.constant 1.00450158 : f32
    %283 = vector.broadcast %cst_111 : f32 to vector<8x8xf32>
    %284 = arith.mulf %283, %246 : vector<8x8xf32>
    %cst_112 = arith.constant -0.0599892177 : f32
    %285 = vector.broadcast %cst_112 : f32 to vector<8x8xf32>
    %286 = arith.mulf %285, %277 : vector<8x8xf32>
    %287 = arith.addf %284, %286 : vector<8x8xf32>
    %c4_113 = arith.constant 4 : index
    %c0_114 = arith.constant 0 : index
    %c0_115 = arith.constant 0 : index
    %288 = vector.load %arg4[%c4_113, %c0_114, %c0_115] : memref<10x16x8xf32, #tpu.memory_space<vmem>>, vector<1x8x8xf32>
    %289 = vector.shape_cast %288 : vector<1x8x8xf32> to vector<8x8xf32>
    %290 = arith.addf %282, %289 : vector<8x8xf32>
    %c4_116 = arith.constant 4 : index
    %c8_117 = arith.constant 8 : index
    %c0_118 = arith.constant 0 : index
    %291 = vector.load %arg4[%c4_116, %c8_117, %c0_118] : memref<10x16x8xf32, #tpu.memory_space<vmem>>, vector<1x8x8xf32>
    %292 = vector.shape_cast %291 : vector<1x8x8xf32> to vector<8x8xf32>
    %293 = arith.addf %287, %292 : vector<8x8xf32>
    %c3 = arith.constant 3 : index
    %c0_119 = arith.constant 0 : index
    %294 = vector.load %arg3[%c3, %c0_119] : memref<10x128xf32, #tpu.memory_space<vmem>>, vector<1x128xf32>
    %295 = arith.truncf %290 : vector<8x8xf32> to vector<8x8xbf16>
    %cst_120 = arith.constant dense<0.000000e+00> : vector<8x128xf32>
    %296 = tpu.matmul %295, %5, %cst_120 {dimension_numbers = #tpu.dot_dimension_numbers<[1], [0], [0], [1], [0, 0, 1, 1], [], []>} : vector<8x8xbf16>, vector<8x128xbf16>, vector<8x128xf32> -> vector<8x128xf32>
    %297 = arith.truncf %293 : vector<8x8xf32> to vector<8x8xbf16>
    %cst_121 = arith.constant dense<0.000000e+00> : vector<8x128xf32>
    %298 = tpu.matmul %297, %5, %cst_121 {dimension_numbers = #tpu.dot_dimension_numbers<[1], [0], [0], [1], [0, 0, 1, 1], [], []>} : vector<8x8xbf16>, vector<8x128xbf16>, vector<8x128xf32> -> vector<8x128xf32>
    %299 = arith.addf %296, %3 : vector<8x128xf32>
    %300 = vector.broadcast %294 : vector<1x128xf32> to vector<8x128xf32>
    %301 = arith.addf %299, %300 : vector<8x128xf32>
    %302 = math.tanh %301 : vector<8x128xf32>
    %303 = arith.addf %298, %4 : vector<8x128xf32>
    %304 = vector.broadcast %294 : vector<1x128xf32> to vector<8x128xf32>
    %305 = arith.addf %303, %304 : vector<8x128xf32>
    %306 = math.tanh %305 : vector<8x128xf32>
    %307 = arith.truncf %302 : vector<8x128xf32> to vector<8x128xbf16>
    %cst_122 = arith.constant dense<0.000000e+00> : vector<8x128xf32>
    %308 = tpu.matmul %307, %6, %cst_122 {dimension_numbers = #tpu.dot_dimension_numbers<[1], [0], [0], [1], [0, 0, 1, 1], [], []>} : vector<8x128xbf16>, vector<128x128xbf16>, vector<8x128xf32> -> vector<8x128xf32>
    %309 = arith.truncf %306 : vector<8x128xf32> to vector<8x128xbf16>
    %cst_123 = arith.constant dense<0.000000e+00> : vector<8x128xf32>
    %310 = tpu.matmul %309, %6, %cst_123 {dimension_numbers = #tpu.dot_dimension_numbers<[1], [0], [0], [1], [0, 0, 1, 1], [], []>} : vector<8x128xbf16>, vector<128x128xbf16>, vector<8x128xf32> -> vector<8x128xf32>
    %311 = vector.broadcast %8 : vector<1x128xf32> to vector<8x128xf32>
    %312 = arith.addf %308, %311 : vector<8x128xf32>
    %313 = math.tanh %312 : vector<8x128xf32>
    %314 = vector.broadcast %8 : vector<1x128xf32> to vector<8x128xf32>
    %315 = arith.addf %310, %314 : vector<8x128xf32>
    %316 = math.tanh %315 : vector<8x128xf32>
    %317 = arith.truncf %313 : vector<8x128xf32> to vector<8x128xbf16>
    %cst_124 = arith.constant dense<0.000000e+00> : vector<8x8xf32>
    %318 = tpu.matmul %317, %7, %cst_124 {dimension_numbers = #tpu.dot_dimension_numbers<[1], [0], [0], [1], [0, 0, 1, 1], [], []>} : vector<8x128xbf16>, vector<128x8xbf16>, vector<8x8xf32> -> vector<8x8xf32>
    %319 = vector.broadcast %9 : vector<1x8xf32> to vector<8x8xf32>
    %320 = arith.addf %318, %319 : vector<8x8xf32>
    %321 = arith.truncf %316 : vector<8x128xf32> to vector<8x128xbf16>
    %cst_125 = arith.constant dense<0.000000e+00> : vector<8x8xf32>
    %322 = tpu.matmul %321, %7, %cst_125 {dimension_numbers = #tpu.dot_dimension_numbers<[1], [0], [0], [1], [0, 0, 1, 1], [], []>} : vector<8x128xbf16>, vector<128x8xbf16>, vector<8x8xf32> -> vector<8x8xf32>
    %323 = vector.broadcast %9 : vector<1x8xf32> to vector<8x8xf32>
    %324 = arith.addf %322, %323 : vector<8x8xf32>
    %cst_126 = arith.constant 1.00338197 : f32
    %325 = vector.broadcast %cst_126 : f32 to vector<8x8xf32>
    %326 = arith.mulf %325, %290 : vector<8x8xf32>
    %cst_127 = arith.constant -0.0579142049 : f32
    %327 = vector.broadcast %cst_127 : f32 to vector<8x8xf32>
    %328 = arith.mulf %327, %320 : vector<8x8xf32>
    %329 = arith.addf %326, %328 : vector<8x8xf32>
    %cst_128 = arith.constant 1.00338197 : f32
    %330 = vector.broadcast %cst_128 : f32 to vector<8x8xf32>
    %331 = arith.mulf %330, %293 : vector<8x8xf32>
    %cst_129 = arith.constant -0.0579142049 : f32
    %332 = vector.broadcast %cst_129 : f32 to vector<8x8xf32>
    %333 = arith.mulf %332, %324 : vector<8x8xf32>
    %334 = arith.addf %331, %333 : vector<8x8xf32>
    %c3_130 = arith.constant 3 : index
    %c0_131 = arith.constant 0 : index
    %c0_132 = arith.constant 0 : index
    %335 = vector.load %arg4[%c3_130, %c0_131, %c0_132] : memref<10x16x8xf32, #tpu.memory_space<vmem>>, vector<1x8x8xf32>
    %336 = vector.shape_cast %335 : vector<1x8x8xf32> to vector<8x8xf32>
    %337 = arith.addf %329, %336 : vector<8x8xf32>
    %c3_133 = arith.constant 3 : index
    %c8_134 = arith.constant 8 : index
    %c0_135 = arith.constant 0 : index
    %338 = vector.load %arg4[%c3_133, %c8_134, %c0_135] : memref<10x16x8xf32, #tpu.memory_space<vmem>>, vector<1x8x8xf32>
    %339 = vector.shape_cast %338 : vector<1x8x8xf32> to vector<8x8xf32>
    %340 = arith.addf %334, %339 : vector<8x8xf32>
    %c2 = arith.constant 2 : index
    %c0_136 = arith.constant 0 : index
    %341 = vector.load %arg3[%c2, %c0_136] : memref<10x128xf32, #tpu.memory_space<vmem>>, vector<1x128xf32>
    %342 = arith.truncf %337 : vector<8x8xf32> to vector<8x8xbf16>
    %cst_137 = arith.constant dense<0.000000e+00> : vector<8x128xf32>
    %343 = tpu.matmul %342, %5, %cst_137 {dimension_numbers = #tpu.dot_dimension_numbers<[1], [0], [0], [1], [0, 0, 1, 1], [], []>} : vector<8x8xbf16>, vector<8x128xbf16>, vector<8x128xf32> -> vector<8x128xf32>
    %344 = arith.truncf %340 : vector<8x8xf32> to vector<8x8xbf16>
    %cst_138 = arith.constant dense<0.000000e+00> : vector<8x128xf32>
    %345 = tpu.matmul %344, %5, %cst_138 {dimension_numbers = #tpu.dot_dimension_numbers<[1], [0], [0], [1], [0, 0, 1, 1], [], []>} : vector<8x8xbf16>, vector<8x128xbf16>, vector<8x128xf32> -> vector<8x128xf32>
    %346 = arith.addf %343, %3 : vector<8x128xf32>
    %347 = vector.broadcast %341 : vector<1x128xf32> to vector<8x128xf32>
    %348 = arith.addf %346, %347 : vector<8x128xf32>
    %349 = math.tanh %348 : vector<8x128xf32>
    %350 = arith.addf %345, %4 : vector<8x128xf32>
    %351 = vector.broadcast %341 : vector<1x128xf32> to vector<8x128xf32>
    %352 = arith.addf %350, %351 : vector<8x128xf32>
    %353 = math.tanh %352 : vector<8x128xf32>
    %354 = arith.truncf %349 : vector<8x128xf32> to vector<8x128xbf16>
    %cst_139 = arith.constant dense<0.000000e+00> : vector<8x128xf32>
    %355 = tpu.matmul %354, %6, %cst_139 {dimension_numbers = #tpu.dot_dimension_numbers<[1], [0], [0], [1], [0, 0, 1, 1], [], []>} : vector<8x128xbf16>, vector<128x128xbf16>, vector<8x128xf32> -> vector<8x128xf32>
    %356 = arith.truncf %353 : vector<8x128xf32> to vector<8x128xbf16>
    %cst_140 = arith.constant dense<0.000000e+00> : vector<8x128xf32>
    %357 = tpu.matmul %356, %6, %cst_140 {dimension_numbers = #tpu.dot_dimension_numbers<[1], [0], [0], [1], [0, 0, 1, 1], [], []>} : vector<8x128xbf16>, vector<128x128xbf16>, vector<8x128xf32> -> vector<8x128xf32>
    %358 = vector.broadcast %8 : vector<1x128xf32> to vector<8x128xf32>
    %359 = arith.addf %355, %358 : vector<8x128xf32>
    %360 = math.tanh %359 : vector<8x128xf32>
    %361 = vector.broadcast %8 : vector<1x128xf32> to vector<8x128xf32>
    %362 = arith.addf %357, %361 : vector<8x128xf32>
    %363 = math.tanh %362 : vector<8x128xf32>
    %364 = arith.truncf %360 : vector<8x128xf32> to vector<8x128xbf16>
    %cst_141 = arith.constant dense<0.000000e+00> : vector<8x8xf32>
    %365 = tpu.matmul %364, %7, %cst_141 {dimension_numbers = #tpu.dot_dimension_numbers<[1], [0], [0], [1], [0, 0, 1, 1], [], []>} : vector<8x128xbf16>, vector<128x8xbf16>, vector<8x8xf32> -> vector<8x8xf32>
    %366 = vector.broadcast %9 : vector<1x8xf32> to vector<8x8xf32>
    %367 = arith.addf %365, %366 : vector<8x8xf32>
    %368 = arith.truncf %363 : vector<8x128xf32> to vector<8x128xbf16>
    %cst_142 = arith.constant dense<0.000000e+00> : vector<8x8xf32>
    %369 = tpu.matmul %368, %7, %cst_142 {dimension_numbers = #tpu.dot_dimension_numbers<[1], [0], [0], [1], [0, 0, 1, 1], [], []>} : vector<8x128xbf16>, vector<128x8xbf16>, vector<8x8xf32> -> vector<8x8xf32>
    %370 = vector.broadcast %9 : vector<1x8xf32> to vector<8x8xf32>
    %371 = arith.addf %369, %370 : vector<8x8xf32>
    %cst_143 = arith.constant 1.00227213 : f32
    %372 = vector.broadcast %cst_143 : f32 to vector<8x8xf32>
    %373 = arith.mulf %372, %337 : vector<8x8xf32>
    %cst_144 = arith.constant -0.0544770509 : f32
    %374 = vector.broadcast %cst_144 : f32 to vector<8x8xf32>
    %375 = arith.mulf %374, %367 : vector<8x8xf32>
    %376 = arith.addf %373, %375 : vector<8x8xf32>
    %cst_145 = arith.constant 1.00227213 : f32
    %377 = vector.broadcast %cst_145 : f32 to vector<8x8xf32>
    %378 = arith.mulf %377, %340 : vector<8x8xf32>
    %cst_146 = arith.constant -0.0544770509 : f32
    %379 = vector.broadcast %cst_146 : f32 to vector<8x8xf32>
    %380 = arith.mulf %379, %371 : vector<8x8xf32>
    %381 = arith.addf %378, %380 : vector<8x8xf32>
    %c2_147 = arith.constant 2 : index
    %c0_148 = arith.constant 0 : index
    %c0_149 = arith.constant 0 : index
    %382 = vector.load %arg4[%c2_147, %c0_148, %c0_149] : memref<10x16x8xf32, #tpu.memory_space<vmem>>, vector<1x8x8xf32>
    %383 = vector.shape_cast %382 : vector<1x8x8xf32> to vector<8x8xf32>
    %384 = arith.addf %376, %383 : vector<8x8xf32>
    %c2_150 = arith.constant 2 : index
    %c8_151 = arith.constant 8 : index
    %c0_152 = arith.constant 0 : index
    %385 = vector.load %arg4[%c2_150, %c8_151, %c0_152] : memref<10x16x8xf32, #tpu.memory_space<vmem>>, vector<1x8x8xf32>
    %386 = vector.shape_cast %385 : vector<1x8x8xf32> to vector<8x8xf32>
    %387 = arith.addf %381, %386 : vector<8x8xf32>
    %c1 = arith.constant 1 : index
    %c0_153 = arith.constant 0 : index
    %388 = vector.load %arg3[%c1, %c0_153] : memref<10x128xf32, #tpu.memory_space<vmem>>, vector<1x128xf32>
    %389 = arith.truncf %384 : vector<8x8xf32> to vector<8x8xbf16>
    %cst_154 = arith.constant dense<0.000000e+00> : vector<8x128xf32>
    %390 = tpu.matmul %389, %5, %cst_154 {dimension_numbers = #tpu.dot_dimension_numbers<[1], [0], [0], [1], [0, 0, 1, 1], [], []>} : vector<8x8xbf16>, vector<8x128xbf16>, vector<8x128xf32> -> vector<8x128xf32>
    %391 = arith.truncf %387 : vector<8x8xf32> to vector<8x8xbf16>
    %cst_155 = arith.constant dense<0.000000e+00> : vector<8x128xf32>
    %392 = tpu.matmul %391, %5, %cst_155 {dimension_numbers = #tpu.dot_dimension_numbers<[1], [0], [0], [1], [0, 0, 1, 1], [], []>} : vector<8x8xbf16>, vector<8x128xbf16>, vector<8x128xf32> -> vector<8x128xf32>
    %393 = arith.addf %390, %3 : vector<8x128xf32>
    %394 = vector.broadcast %388 : vector<1x128xf32> to vector<8x128xf32>
    %395 = arith.addf %393, %394 : vector<8x128xf32>
    %396 = math.tanh %395 : vector<8x128xf32>
    %397 = arith.addf %392, %4 : vector<8x128xf32>
    %398 = vector.broadcast %388 : vector<1x128xf32> to vector<8x128xf32>
    %399 = arith.addf %397, %398 : vector<8x128xf32>
    %400 = math.tanh %399 : vector<8x128xf32>
    %401 = arith.truncf %396 : vector<8x128xf32> to vector<8x128xbf16>
    %cst_156 = arith.constant dense<0.000000e+00> : vector<8x128xf32>
    %402 = tpu.matmul %401, %6, %cst_156 {dimension_numbers = #tpu.dot_dimension_numbers<[1], [0], [0], [1], [0, 0, 1, 1], [], []>} : vector<8x128xbf16>, vector<128x128xbf16>, vector<8x128xf32> -> vector<8x128xf32>
    %403 = arith.truncf %400 : vector<8x128xf32> to vector<8x128xbf16>
    %cst_157 = arith.constant dense<0.000000e+00> : vector<8x128xf32>
    %404 = tpu.matmul %403, %6, %cst_157 {dimension_numbers = #tpu.dot_dimension_numbers<[1], [0], [0], [1], [0, 0, 1, 1], [], []>} : vector<8x128xbf16>, vector<128x128xbf16>, vector<8x128xf32> -> vector<8x128xf32>
    %405 = vector.broadcast %8 : vector<1x128xf32> to vector<8x128xf32>
    %406 = arith.addf %402, %405 : vector<8x128xf32>
    %407 = math.tanh %406 : vector<8x128xf32>
    %408 = vector.broadcast %8 : vector<1x128xf32> to vector<8x128xf32>
    %409 = arith.addf %404, %408 : vector<8x128xf32>
    %410 = math.tanh %409 : vector<8x128xf32>
    %411 = arith.truncf %407 : vector<8x128xf32> to vector<8x128xbf16>
    %cst_158 = arith.constant dense<0.000000e+00> : vector<8x8xf32>
    %412 = tpu.matmul %411, %7, %cst_158 {dimension_numbers = #tpu.dot_dimension_numbers<[1], [0], [0], [1], [0, 0, 1, 1], [], []>} : vector<8x128xbf16>, vector<128x8xbf16>, vector<8x8xf32> -> vector<8x8xf32>
    %413 = vector.broadcast %9 : vector<1x8xf32> to vector<8x8xf32>
    %414 = arith.addf %412, %413 : vector<8x8xf32>
    %415 = arith.truncf %410 : vector<8x128xf32> to vector<8x128xbf16>
    %cst_159 = arith.constant dense<0.000000e+00> : vector<8x8xf32>
    %416 = tpu.matmul %415, %7, %cst_159 {dimension_numbers = #tpu.dot_dimension_numbers<[1], [0], [0], [1], [0, 0, 1, 1], [], []>} : vector<8x128xbf16>, vector<128x8xbf16>, vector<8x8xf32> -> vector<8x8xf32>
    %417 = vector.broadcast %9 : vector<1x8xf32> to vector<8x8xf32>
    %418 = arith.addf %416, %417 : vector<8x8xf32>
    %cst_160 = arith.constant 1.00116086 : f32
    %419 = vector.broadcast %cst_160 : f32 to vector<8x8xf32>
    %420 = arith.mulf %419, %384 : vector<8x8xf32>
    %cst_161 = arith.constant -0.0471233353 : f32
    %421 = vector.broadcast %cst_161 : f32 to vector<8x8xf32>
    %422 = arith.mulf %421, %414 : vector<8x8xf32>
    %423 = arith.addf %420, %422 : vector<8x8xf32>
    %cst_162 = arith.constant 1.00116086 : f32
    %424 = vector.broadcast %cst_162 : f32 to vector<8x8xf32>
    %425 = arith.mulf %424, %387 : vector<8x8xf32>
    %cst_163 = arith.constant -0.0471233353 : f32
    %426 = vector.broadcast %cst_163 : f32 to vector<8x8xf32>
    %427 = arith.mulf %426, %418 : vector<8x8xf32>
    %428 = arith.addf %425, %427 : vector<8x8xf32>
    %c1_164 = arith.constant 1 : index
    %c0_165 = arith.constant 0 : index
    %c0_166 = arith.constant 0 : index
    %429 = vector.load %arg4[%c1_164, %c0_165, %c0_166] : memref<10x16x8xf32, #tpu.memory_space<vmem>>, vector<1x8x8xf32>
    %430 = vector.shape_cast %429 : vector<1x8x8xf32> to vector<8x8xf32>
    %431 = arith.addf %423, %430 : vector<8x8xf32>
    %c1_167 = arith.constant 1 : index
    %c8_168 = arith.constant 8 : index
    %c0_169 = arith.constant 0 : index
    %432 = vector.load %arg4[%c1_167, %c8_168, %c0_169] : memref<10x16x8xf32, #tpu.memory_space<vmem>>, vector<1x8x8xf32>
    %433 = vector.shape_cast %432 : vector<1x8x8xf32> to vector<8x8xf32>
    %434 = arith.addf %428, %433 : vector<8x8xf32>
    %c0_170 = arith.constant 0 : index
    %c0_171 = arith.constant 0 : index
    %435 = vector.load %arg3[%c0_170, %c0_171] : memref<10x128xf32, #tpu.memory_space<vmem>>, vector<1x128xf32>
    %436 = arith.truncf %431 : vector<8x8xf32> to vector<8x8xbf16>
    %cst_172 = arith.constant dense<0.000000e+00> : vector<8x128xf32>
    %437 = tpu.matmul %436, %5, %cst_172 {dimension_numbers = #tpu.dot_dimension_numbers<[1], [0], [0], [1], [0, 0, 1, 1], [], []>} : vector<8x8xbf16>, vector<8x128xbf16>, vector<8x128xf32> -> vector<8x128xf32>
    %438 = arith.truncf %434 : vector<8x8xf32> to vector<8x8xbf16>
    %cst_173 = arith.constant dense<0.000000e+00> : vector<8x128xf32>
    %439 = tpu.matmul %438, %5, %cst_173 {dimension_numbers = #tpu.dot_dimension_numbers<[1], [0], [0], [1], [0, 0, 1, 1], [], []>} : vector<8x8xbf16>, vector<8x128xbf16>, vector<8x128xf32> -> vector<8x128xf32>
    %440 = arith.addf %437, %3 : vector<8x128xf32>
    %441 = vector.broadcast %435 : vector<1x128xf32> to vector<8x128xf32>
    %442 = arith.addf %440, %441 : vector<8x128xf32>
    %443 = math.tanh %442 : vector<8x128xf32>
    %444 = arith.addf %439, %4 : vector<8x128xf32>
    %445 = vector.broadcast %435 : vector<1x128xf32> to vector<8x128xf32>
    %446 = arith.addf %444, %445 : vector<8x128xf32>
    %447 = math.tanh %446 : vector<8x128xf32>
    %448 = arith.truncf %443 : vector<8x128xf32> to vector<8x128xbf16>
    %cst_174 = arith.constant dense<0.000000e+00> : vector<8x128xf32>
    %449 = tpu.matmul %448, %6, %cst_174 {dimension_numbers = #tpu.dot_dimension_numbers<[1], [0], [0], [1], [0, 0, 1, 1], [], []>} : vector<8x128xbf16>, vector<128x128xbf16>, vector<8x128xf32> -> vector<8x128xf32>
    %450 = arith.truncf %447 : vector<8x128xf32> to vector<8x128xbf16>
    %cst_175 = arith.constant dense<0.000000e+00> : vector<8x128xf32>
    %451 = tpu.matmul %450, %6, %cst_175 {dimension_numbers = #tpu.dot_dimension_numbers<[1], [0], [0], [1], [0, 0, 1, 1], [], []>} : vector<8x128xbf16>, vector<128x128xbf16>, vector<8x128xf32> -> vector<8x128xf32>
    %452 = vector.broadcast %8 : vector<1x128xf32> to vector<8x128xf32>
    %453 = arith.addf %449, %452 : vector<8x128xf32>
    %454 = math.tanh %453 : vector<8x128xf32>
    %455 = vector.broadcast %8 : vector<1x128xf32> to vector<8x128xf32>
    %456 = arith.addf %451, %455 : vector<8x128xf32>
    %457 = math.tanh %456 : vector<8x128xf32>
    %458 = arith.truncf %454 : vector<8x128xf32> to vector<8x128xbf16>
    %cst_176 = arith.constant dense<0.000000e+00> : vector<8x8xf32>
    %459 = tpu.matmul %458, %7, %cst_176 {dimension_numbers = #tpu.dot_dimension_numbers<[1], [0], [0], [1], [0, 0, 1, 1], [], []>} : vector<8x128xbf16>, vector<128x8xbf16>, vector<8x8xf32> -> vector<8x8xf32>
    %460 = vector.broadcast %9 : vector<1x8xf32> to vector<8x8xf32>
    %461 = arith.addf %459, %460 : vector<8x8xf32>
    %462 = arith.truncf %457 : vector<8x128xf32> to vector<8x128xbf16>
    %cst_177 = arith.constant dense<0.000000e+00> : vector<8x8xf32>
    %463 = tpu.matmul %462, %7, %cst_177 {dimension_numbers = #tpu.dot_dimension_numbers<[1], [0], [0], [1], [0, 0, 1, 1], [], []>} : vector<8x128xbf16>, vector<128x8xbf16>, vector<8x8xf32> -> vector<8x8xf32>
    %464 = vector.broadcast %9 : vector<1x8xf32> to vector<8x8xf32>
    %465 = arith.addf %463, %464 : vector<8x8xf32>
    %cst_178 = arith.constant 9.998840e-01 : f32
    %466 = vector.broadcast %cst_178 : f32 to vector<8x8xf32>
    %467 = arith.mulf %466, %431 : vector<8x8xf32>
    %cst_179 = arith.constant -0.00999916996 : f32
    %468 = vector.broadcast %cst_179 : f32 to vector<8x8xf32>
    %469 = arith.mulf %468, %461 : vector<8x8xf32>
    %470 = arith.addf %467, %469 : vector<8x8xf32>
    %cst_180 = arith.constant 9.998840e-01 : f32
    %471 = vector.broadcast %cst_180 : f32 to vector<8x8xf32>
    %472 = arith.mulf %471, %434 : vector<8x8xf32>
    %cst_181 = arith.constant -0.00999916996 : f32
    %473 = vector.broadcast %cst_181 : f32 to vector<8x8xf32>
    %474 = arith.mulf %473, %465 : vector<8x8xf32>
    %475 = arith.addf %472, %474 : vector<8x8xf32>
    %c0_182 = arith.constant 0 : index
    %c0_183 = arith.constant 0 : index
    %476 = vector.load %arg11[%c0_182, %c0_183] : memref<16x8xf32, #tpu.memory_space<vmem>>, vector<8x8xf32>
    tpu.vector_store %arg11[%c0_182, %c0_183], %470 {strides = array<i32>} : memref<16x8xf32, #tpu.memory_space<vmem>>, vector<8x8xf32>,
    %c8_184 = arith.constant 8 : index
    %c0_185 = arith.constant 0 : index
    %477 = vector.load %arg11[%c8_184, %c0_185] : memref<16x8xf32, #tpu.memory_space<vmem>>, vector<8x8xf32>
    tpu.vector_store %arg11[%c8_184, %c0_185], %475 {strides = array<i32>} : memref<16x8xf32, #tpu.memory_space<vmem>>, vector<8x8xf32>,
    return
  }
  func.func @transform_0(%arg0: i32) -> (i32, i32) {
    %c0_i32 = arith.constant 0 : i32
    %c0_i32_0 = arith.constant 0 : i32
    return %arg0, %c0_i32 : i32, i32
  }
  func.func @transform_1(%arg0: i32) -> (i32, i32) {
    %c0_i32 = arith.constant 0 : i32
    %c0_i32_0 = arith.constant 0 : i32
    return %arg0, %c0_i32 : i32, i32
  }
  func.func @transform_2(%arg0: i32) -> (i32, i32) {
    %c0_i32 = arith.constant 0 : i32
    %c0_i32_0 = arith.constant 0 : i32
    %c0_i32_1 = arith.constant 0 : i32
    return %c0_i32, %c0_i32_0 : i32, i32
  }
  func.func @transform_3(%arg0: i32) -> (i32, i32, i32) {
    %c0_i32 = arith.constant 0 : i32
    %c0_i32_0 = arith.constant 0 : i32
    %c0_i32_1 = arith.constant 0 : i32
    return %c0_i32, %arg0, %c0_i32_0 : i32, i32, i32
  }
  func.func @transform_4(%arg0: i32) -> (i32, i32) {
    %c0_i32 = arith.constant 0 : i32
    %c0_i32_0 = arith.constant 0 : i32
    %c0_i32_1 = arith.constant 0 : i32
    return %c0_i32, %c0_i32_0 : i32, i32
  }
  func.func @transform_5(%arg0: i32) -> (i32, i32) {
    %c0_i32 = arith.constant 0 : i32
    %c0_i32_0 = arith.constant 0 : i32
    %c0_i32_1 = arith.constant 0 : i32
    return %c0_i32, %c0_i32_0 : i32, i32
  }
  func.func @transform_6(%arg0: i32) -> (i32, i32) {
    %c0_i32 = arith.constant 0 : i32
    %c0_i32_0 = arith.constant 0 : i32
    %c0_i32_1 = arith.constant 0 : i32
    return %c0_i32, %c0_i32_0 : i32, i32
  }
  func.func @transform_7(%arg0: i32) -> (i32, i32) {
    %c0_i32 = arith.constant 0 : i32
    %c0_i32_0 = arith.constant 0 : i32
    %c0_i32_1 = arith.constant 0 : i32
    return %c0_i32, %c0_i32_0 : i32, i32
  }
  func.func @transform_8(%arg0: i32) -> (i32, i32) {
    %c0_i32 = arith.constant 0 : i32
    %c0_i32_0 = arith.constant 0 : i32
    %c0_i32_1 = arith.constant 0 : i32
    return %c0_i32, %c0_i32_0 : i32, i32
  }
  func.func @transform_9(%arg0: i32) -> (i32, i32) {
    %c0_i32 = arith.constant 0 : i32
    %c0_i32_0 = arith.constant 0 : i32
    %c0_i32_1 = arith.constant 0 : i32
    return %c0_i32, %c0_i32_0 : i32, i32
  }
  func.func @transform_10(%arg0: i32) -> (i32, i32) {
    %c0_i32 = arith.constant 0 : i32
    %c0_i32_0 = arith.constant 0 : i32
    return %arg0, %c0_i32 : i32, i32
  }
}

</mosaic_0001>

<bundles_post_ra>
// kernel: tpu_custom_call.1
= control target key start
LH: loop header
LB: loop body
LE: loop exit
PB: predicated region body
PF: predicated region fallthrough
CT: control target
= control target key end

     0   :  { %vm166_vm0 = vcmask 1043456   ;;  %vm40_vm1 = vcmask 130048   ;;  %v4550_v2 = vmov 0.0   ;;  %vm4551_vm2 = vmmov 0   ;;  %s5978_s5 = inlined_call_operand.vmem [shape: f32[16,128], index: 5, kind: input, shape index: {}]   ;;  %s5979_s4 = inlined_call_operand.vmem [shape: bf16[8,128], index: 4, kind: input, shape index: {}]   ;;  %s5980_s1 = inlined_call_operand.vmem [shape: f32[16,16], index: 1, kind: input, shape index: {}]   ;;  %s5981_s0 = inlined_call_operand.vmem [shape: f32[16,8], index: 0, kind: input, shape index: {}]   ;;  %s5982_s6 = inlined_call_operand.vmem [shape: bf16[128,128], index: 6, kind: input, shape index: {}]   ;;  %s5983_s8 = inlined_call_operand.vmem [shape: bf16[128,8], index: 8, kind: input, shape index: {}]   ;;  %s5984_s2 = inlined_call_operand.vmem [shape: f32[10,128], index: 2, kind: input, shape index: {}]   ;;  %s5985_s7 = inlined_call_operand.vmem [shape: f32[1,128], index: 7, kind: input, shape index: {}]   ;;  %s5986_s9 = inlined_call_operand.vmem [shape: f32[1,8], index: 9, kind: input, shape index: {}]   ;;  %s5987_s3 = inlined_call_operand.vmem [shape: f32[10,16,8], index: 3, kind: input, shape index: {}]   ;;  %s5988_s10 = inlined_call_operand.vmem [shape: f32[16,8], index: 10, kind: output, shape index: {}]  }
   0x1   :  { %v38_v0 = vld [vmem:[%s5978_s5] sm:$0xff]  ;;  %v39_v1 = vld [vmem:[%s5978_s5 + $0x8] sm:$0xff]  ;;  %3492 = vmatprep.subr.bf16.mxu1 %v4550_v2  ;;  %3494 = vmatprep.mubr.msk.bf16.mxu1 %vm4551_vm2, %v4550_v2  ;;  %vm162_vm3 = vcmask 64512   ;;  %v4669_v14 = vld [vmem:[%s5982_s6 + $0x10] sm:$0xff]  }
   0x2   :  { %v122_v3 = vld [vmem:[%s5979_s4] sm:$0xf]  ;;  %v4412_v4 = vpack.c.bf16 %v39_v1, %v38_v0  ;;  %v37_v8 = vld [vmem:[%s5980_s1 + $0x8] sm:$0xff]  ;;  %v4686_v15 = vld [vmem:[%s5982_s6 + $0x18] sm:$0xff]  }
   0x3   :  { %v4619_v5 = vsel %vm166_vm0, %v122_v3, 0  ;;  %v36_v6 = vld [vmem:[%s5980_s1] sm:$0xff]  ;;  %v4645_v11 = vld [vmem:[%s5981_s0 + $0x8] sm:$0xff]  ;;  %v4713_v18 = vld [vmem:[%s5982_s6 + $0x30] sm:$0xff]  }
   0x4   :  { %v4627_v7 = vld [vmem:[%s5981_s0] sm:$0xff]  ;;  %3493 = vmatpush3.bf16.msra.mxu1 %v4619_v5  ;;  %3489 = vmatprep.mubr.msk.f32.mxu0 %vm40_vm1, %v36_v6  ;;  %v4652_v12 = vld [vmem:[%s5982_s6 + $0x8] sm:$0xff]   ;;  %v161_v13 = vpack.c.bf16 %v4645_v11, %v4645_v11  ;;  %v4722_v19 = vld [vmem:[%s5982_s6 + $0x38] sm:$0xff]  }
   0x5   :  { %v160_v9 = vpack.c.bf16 %v4627_v7, %v4627_v7  ;;  %4413 = vmatprep.subr.bf16.mxu0 %v4412_v4  ;;  %3504 = vmatprep.subr.bf16.mxu1 %v4550_v2  ;;  %v4640_v10 = vld [vmem:[%s5982_s6] sm:$0xff]   ;;  %v4704_v17 = vld [vmem:[%s5982_s6 + $0x28] sm:$0xff]   ;;  %v4759_v41 = vld [vmem:[%s5983_s8 + $0x10] sm:$0xff]   ;;  %v535_v1 = vmul.f32 1.0101528, %v4627_v7 }
   0x6   :  { %4415 = vmatpush3.bf16.msra.mxu0 %v4412_v4  ;;  %v4695_v16 = vld [vmem:[%s5982_s6 + $0x20] sm:$0xff]   ;;  %v3016_v25 = vld [vmem:[%s5984_s2 + $0x9] ss:$0 sm:$0xff]  ;;  %v4768_v42 = vld [vmem:[%s5983_s8 + $0x18] sm:$0xff]  }
   0x7   :  { %3498 = vmatprep.subr.bf16.mxu0 %v4550_v2  ;;  %3495 = vmatmul.mubr.msk.bf16.vlgmr.msra.gmra.mrb[0].mxu1 %vm162_vm3, %v160_v9  ;;  %v4740_v36 = vld [vmem:[%s5983_s8] sm:$0xff]   ;;  %v4746_v40 = vld [vmem:[%s5983_s8 + $0x8] sm:$0xff]   ;;  %v4798_v45 = vld [vmem:[%s5983_s8 + $0x30] sm:$0xff]  }
   0x8   :  { %3505 = vmatpush3.bf16.msra.mxu1 %v4640_v10  ;;  %3520 = vmatprep.mubr.msk.bf16.mxu1 %vm4551_vm2, %v4550_v2  ;;  %v4780_v43 = vld [vmem:[%s5983_s8 + $0x20] sm:$0xff]   ;;  %v4789_v44 = vld [vmem:[%s5983_s8 + $0x28] sm:$0xff]   ;;  %v4807_v46 = vld [vmem:[%s5983_s8 + $0x38] sm:$0xff]  }
   0x9   :  { %3490 = vmatmul.mubr.msk.f32.vlgmr.msra.gmra.mrb[0].mxu0 %vm40_vm1, %v37_v8  ;;  %3506 = vmatprep.subr.bf16.mxu1 %v4550_v2  ;;  %v4816_v47 = vld [vmem:[%s5985_s7] ss:$0 sm:$0xff]  ;;  %v3037_v7 = vld [vmem:[%s5987_s3 + $0x98] sm:$0xff] }
   0xa   :  { %3499 = vmatpush3.bf16.msra.mxu0 %v4619_v5  ;;  %3500 = vmatprep.mubr.msk.bf16.mxu0 %vm4551_vm2, %v4550_v2  ;;  %v4831_v62 = vld [vmem:[%s5986_s9] ss:$0 sm:$0xff] }
   0xb   :  { %3524 = vmatprep.subr.bf16.mxu0 %v4550_v2 }
   0xc   :  { %3507 = vmatpush3.bf16.msra.mxu1 %v4652_v12 }
   0xd   :  { %3501 = vmatmul.mubr.msk.bf16.vlgmr.msra.gmra.mrb[4].mxu0 %vm162_vm3, %v161_v13  ;;  %3508 = vmatprep.subr.bf16.mxu1 %v4550_v2  ;;  %v3036_v13 = vld [vmem:[%s5987_s3 + $0x90] sm:$0xff] }
   0xe   :  { %3525 = vmatpush3.bf16.msra.mxu0 %v4640_v10  ;;  %3540 = vmatprep.mubr.msk.bf16.mxu0 %vm4551_vm2, %v4550_v2 }
   0xf   :  { %3526 = vmatprep.subr.bf16.mxu0 %v4550_v2 }
  0x10   :  { %3509 = vmatpush3.bf16.msra.mxu1 %v4669_v14 }
  0x11   :  { %3510 = vmatprep.subr.bf16.mxu1 %v4550_v2 }
  0x12   :  { %3527 = vmatpush3.bf16.msra.mxu0 %v4652_v12 }
  0x13   :  { %3528 = vmatprep.subr.bf16.mxu0 %v4550_v2 }
  0x14   :  { %3511 = vmatpush3.bf16.msra.mxu1 %v4686_v15 }
  0x15   :  { %3512 = vmatprep.subr.bf16.mxu1 %v4550_v2 }
  0x16   :  { %3529 = vmatpush3.bf16.msra.mxu0 %v4669_v14 }
  0x17   :  { %3530 = vmatprep.subr.bf16.mxu0 %v4550_v2 }
  0x18   :  { %3513 = vmatpush3.bf16.msra.mxu1 %v4695_v16 }
  0x19   :  { %3514 = vmatprep.subr.bf16.mxu1 %v4550_v2 }
  0x1a   :  { %3531 = vmatpush3.bf16.msra.mxu0 %v4686_v15 }
  0x1b   :  { %3532 = vmatprep.subr.bf16.mxu0 %v4550_v2 }
  0x1c   :  { %3515 = vmatpush3.bf16.msra.mxu1 %v4704_v17 }
  0x1d   :  { %3516 = vmatprep.subr.bf16.mxu1 %v4550_v2 }
  0x1e   :  { %3533 = vmatpush3.bf16.msra.mxu0 %v4695_v16 }
  0x1f   :  { %3534 = vmatprep.subr.bf16.mxu0 %v4550_v2 }
  0x20   :  { %3517 = vmatpush3.bf16.msra.mxu1 %v4713_v18 }
  0x21   :  { %3518 = vmatprep.subr.bf16.mxu1 %v4550_v2 }
  0x22   :  { %3535 = vmatpush3.bf16.msra.mxu0 %v4704_v17 }
  0x23   :  { %3536 = vmatprep.subr.bf16.mxu0 %v4550_v2 }
  0x24   :  { %3519 = vmatpush3.bf16.msra.mxu1 %v4722_v19 }
  0x25   :  { %3544 = vmatprep.subr.bf16.mxu1 %v4550_v2 }
  0x26   :  { %3537 = vmatpush3.bf16.msra.mxu0 %v4713_v18 }
  0x27   :  { %3538 = vmatprep.subr.bf16.mxu0 %v4550_v2 }
  0x2a   :  { %3539 = vmatpush3.bf16.msra.mxu0 %v4722_v19 }
  0x2b   :  { %3564 = vmatprep.subr.bf16.mxu0 %v4550_v2 }
  0xda   :  { %v204_v20 = vpop.f32.mrb[0].mxu1 }
  0xdb   :  { %v3496_v21 = vpop.f32.mrb[1].mxu1 }
  0xdc   :  { %v4728_v22 = vpop.f32.mrb[0].mxu0  ;;  %v207_v23 = vpop.f32.mrb[2].mxu1  ;;  %v538_v21 = vmul.f32 1.0101528, %v4645_v11 }
  0xdd   :  { %v4730_v24 = vpop.f32.mrb[1].mxu0  ;;  %v3497_v26 = vpop.f32.mrb[3].mxu1 }
  0xde   :  { %v205_v27 = vadd.f32 %v204_v20, %v4730_v24 }
  0xe0   :  { %v214_v28 = vadd.f32 %v3016_v25, %v205_v27  ;;  %v253_v29 = vpop.f32.mrb[4].mxu0 }
  0xe1   :  { %v254_v30 = vadd.f32 %v4728_v22, %v253_v29  ;;  %v3502_v31 = vpop.f32.mrb[5].mxu0 }
  0xe2   :  { %4434 = vtanh.f32 %v214_v28  ;;  %v256_v32 = vpop.f32.mrb[6].mxu0 }
  0xe3   :  { %v259_v33 = vadd.f32 %v3016_v25, %v254_v30  ;;  %v3503_v34 = vpop.f32.mrb[7].mxu0 }
  0xe5   :  { %4436 = vtanh.f32 %v259_v33  ;;  %v3039_v33 = vld [vmem:[%s5984_s2 + $0x8] ss:$0 sm:$0xff] }
  0xec   :  { %v4435_v35 = vpop.eup %4434 }
  0xed   :  { %v261_v37 = vpack.c.bf16 %v4435_v35, %v4435_v35 }
  0xef   :  { %v4437_v38 = vpop.eup %4436  ;;  %3521 = vmatmul.mubr.bf16.vlgmr.msra.gmra.mrb[4].mxu1 %v261_v37 }
  0xf0   :  { %v262_v39 = vpack.c.bf16 %v4437_v38, %v4437_v38  ;;  %3545 = vmatpush3.bf16.msra.mxu1 %v4740_v36  ;;  %3560 = vmatprep.mubr.msk.bf16.mxu1 %vm4551_vm2, %v4550_v2 }
  0xf1   :  { %3546 = vmatprep.subr.bf16.mxu1 %v4550_v2 }
  0xf2   :  { %3541 = vmatmul.mubr.bf16.vlgmr.msra.gmra.mrb[8].mxu0 %v262_v39 }
  0xf3   :  { %3565 = vmatpush3.bf16.msra.mxu0 %v4740_v36  ;;  %3580 = vmatprep.mubr.msk.bf16.mxu0 %vm4551_vm2, %v4550_v2 }
  0xf4   :  { %3547 = vmatpush3.bf16.msra.mxu1 %v4746_v40  ;;  %3566 = vmatprep.subr.bf16.mxu0 %v4550_v2 }
  0xf5   :  { %3548 = vmatprep.subr.bf16.mxu1 %v4550_v2 }
  0xf7   :  { %3567 = vmatpush3.bf16.msra.mxu0 %v4746_v40 }
  0xf8   :  { %3549 = vmatpush3.bf16.msra.mxu1 %v4759_v41  ;;  %3568 = vmatprep.subr.bf16.mxu0 %v4550_v2 }
  0xf9   :  { %3550 = vmatprep.subr.bf16.mxu1 %v4550_v2 }
  0xfb   :  { %3569 = vmatpush3.bf16.msra.mxu0 %v4759_v41 }
  0xfc   :  { %3551 = vmatpush3.bf16.msra.mxu1 %v4768_v42  ;;  %3570 = vmatprep.subr.bf16.mxu0 %v4550_v2 }
  0xfd   :  { %3552 = vmatprep.subr.bf16.mxu1 %v4550_v2 }
  0xff   :  { %3571 = vmatpush3.bf16.msra.mxu0 %v4768_v42 }
 0x100   :  { %3572 = vmatprep.subr.bf16.mxu0 %v4550_v2  ;;  %3553 = vmatpush3.bf16.msra.mxu1 %v4780_v43 }
 0x101   :  { %3554 = vmatprep.subr.bf16.mxu1 %v4550_v2 }
 0x103   :  { %3573 = vmatpush3.bf16.msra.mxu0 %v4780_v43 }
 0x104   :  { %3574 = vmatprep.subr.bf16.mxu0 %v4550_v2  ;;  %3555 = vmatpush3.bf16.msra.mxu1 %v4789_v44 }
 0x105   :  { %3556 = vmatprep.subr.bf16.mxu1 %v4550_v2 }
 0x107   :  { %3575 = vmatpush3.bf16.msra.mxu0 %v4789_v44 }
 0x108   :  { %3576 = vmatprep.subr.bf16.mxu0 %v4550_v2  ;;  %3557 = vmatpush3.bf16.msra.mxu1 %v4798_v45 }
 0x109   :  { %3558 = vmatprep.subr.bf16.mxu1 %v4550_v2 }
 0x10b   :  { %3577 = vmatpush3.bf16.msra.mxu0 %v4798_v45 }
 0x10c   :  { %3578 = vmatprep.subr.bf16.mxu0 %v4550_v2  ;;  %3559 = vmatpush3.bf16.msra.mxu1 %v4807_v46 }
 0x10d   :  { %3584 = vmatprep.subr.bf16.mxu1 %v4550_v2 }
 0x10f   :  { %3579 = vmatpush3.bf16.msra.mxu0 %v4807_v46 }
 0x110   :  { %3590 = vmatprep.subr.bf16.mxu0 %v4550_v2 }
 0x1c2   :  { %v351_v48 = vpop.f32.mrb[4].mxu1 }
 0x1c3   :  { %v352_v49 = vadd.f32 %v4816_v47, %v351_v48  ;;  %v3522_v50 = vpop.f32.mrb[5].mxu1 }
 0x1c4   :  { %v354_v51 = vpop.f32.mrb[6].mxu1 }
 0x1c5   :  { %4438 = vtanh.f32 %v352_v49  ;;  %v3523_v52 = vpop.f32.mrb[7].mxu1  ;;  %v392_v53 = vpop.f32.mrb[8].mxu0 }
 0x1c6   :  { %v393_v54 = vadd.f32 %v4816_v47, %v392_v53  ;;  %v3542_v55 = vpop.f32.mrb[9].mxu0 }
 0x1c7   :  { %v395_v56 = vpop.f32.mrb[10].mxu0 }
 0x1c8   :  { %4440 = vtanh.f32 %v393_v54  ;;  %v3543_v57 = vpop.f32.mrb[11].mxu0 }
 0x1cf   :  { %v4439_v58 = vpop.eup %4438 }
 0x1d0   :  { %v399_v59 = vpack.c.bf16 %v4439_v58, %v4439_v58 }
 0x1d2   :  { %v4441_v60 = vpop.eup %4440  ;;  %3561 = vmatmul.mubr.bf16.vlgmr.msra.gmra.mrb[8].mxu1 %v399_v59 }
 0x1d3   :  { %v494_v61 = vpack.c.bf16 %v4441_v60, %v4441_v60  ;;  %3585 = vmatpush3.bf16.msra.mxu1 %v4619_v5  ;;  %3586 = vmatprep.mubr.msk.bf16.mxu1 %vm4551_vm2, %v4550_v2 }
 0x1d4   :  { %3596 = vmatprep.subr.bf16.mxu1 %v4550_v2 }
 0x1d5   :  { %3581 = vmatmul.mubr.bf16.vlgmr.msra.gmra.mrb[12].mxu0 %v494_v61 }
 0x1d6   :  { %3591 = vmatpush3.bf16.msra.mxu0 %v4619_v5  ;;  %3592 = vmatprep.mubr.msk.bf16.mxu0 %vm4551_vm2, %v4550_v2 }
 0x1d7   :  { %3616 = vmatprep.subr.bf16.mxu0 %v4550_v2 }
 0x2a5   :  { %v488_v63 = vpop.f32.mrb[8].mxu1 }
 0x2a6   :  { %v489_v0 = vadd.f32 %v4831_v62, %v488_v63  ;;  %v3562_v3 = vpop.f32.mrb[9].mxu1 }
 0x2a7   :  { %v491_v4 = vpop.f32.mrb[10].mxu1 }
 0x2a8   :  { %v536_v6 = vmul.f32 -0.06511676, %v489_v0  ;;  %v3563_v8 = vpop.f32.mrb[11].mxu1  ;;  %v529_v9 = vpop.f32.mrb[12].mxu0 }
 0x2a9   :  { %v530_v20 = vadd.f32 %v4831_v62, %v529_v9  ;;  %v3582_v23 = vpop.f32.mrb[13].mxu0 }
 0x2aa   :  { %v537_v25 = vadd.f32 %v536_v6, %v535_v1  ;;  %v532_v26 = vpop.f32.mrb[14].mxu0 }
 0x2ab   :  { %v539_v27 = vmul.f32 -0.06511676, %v530_v20  ;;  %v3583_v28 = vpop.f32.mrb[15].mxu0 }
 0x2ac   :  { %v4840_v29 = vadd.f32 %v3036_v13, %v537_v25 }
 0x2ad   :  { %v540_v30 = vadd.f32 %v539_v27, %v538_v21 }
 0x2ae   :  { %v547_v31 = vpack.c.bf16 %v4840_v29, %v4840_v29  ;;  %v809_v28 = vmul.f32 1.0090151, %v4840_v29  ;;  %v3042_v29 = vld [vmem:[%s5987_s3 + $0x88] sm:$0xff] }
 0x2af   :  { %v4847_v32 = vadd.f32 %v3037_v7, %v540_v30 }
 0x2b0   :  { %3587 = vmatmul.mubr.msk.bf16.vlgmr.msra.gmra.mrb[12].mxu1 %vm162_vm3, %v547_v31 }
 0x2b1   :  { %v548_v11 = vpack.c.bf16 %v4847_v32, %v4847_v32  ;;  %3597 = vmatpush3.bf16.msra.mxu1 %v4640_v10  ;;  %3612 = vmatprep.mubr.msk.bf16.mxu1 %vm4551_vm2, %v4550_v2 }
 0x2b2   :  { %3598 = vmatprep.subr.bf16.mxu1 %v4550_v2 }
 0x2b3   :  { %3593 = vmatmul.mubr.msk.bf16.vlgmr.msra.gmra.mrb[16].mxu0 %vm162_vm3, %v548_v11  ;;  %v3041_v11 = vld [vmem:[%s5987_s3 + $0x80] sm:$0xff] }
 0x2b4   :  { %3617 = vmatpush3.bf16.msra.mxu0 %v4640_v10  ;;  %3632 = vmatprep.mubr.msk.bf16.mxu0 %vm4551_vm2, %v4550_v2 }
 0x2b5   :  { %3599 = vmatpush3.bf16.msra.mxu1 %v4652_v12  ;;  %3618 = vmatprep.subr.bf16.mxu0 %v4550_v2 }
 0x2b6   :  { %3600 = vmatprep.subr.bf16.mxu1 %v4550_v2 }
 0x2b8   :  { %3619 = vmatpush3.bf16.msra.mxu0 %v4652_v12 }
 0x2b9   :  { %3601 = vmatpush3.bf16.msra.mxu1 %v4669_v14  ;;  %3620 = vmatprep.subr.bf16.mxu0 %v4550_v2 }
 0x2ba   :  { %3602 = vmatprep.subr.bf16.mxu1 %v4550_v2 }
 0x2bc   :  { %3621 = vmatpush3.bf16.msra.mxu0 %v4669_v14 }
 0x2bd   :  { %3603 = vmatpush3.bf16.msra.mxu1 %v4686_v15  ;;  %3622 = vmatprep.subr.bf16.mxu0 %v4550_v2 }
 0x2be   :  { %3604 = vmatprep.subr.bf16.mxu1 %v4550_v2 }
 0x2c0   :  { %3623 = vmatpush3.bf16.msra.mxu0 %v4686_v15 }
 0x2c1   :  { %3605 = vmatpush3.bf16.msra.mxu1 %v4695_v16  ;;  %3624 = vmatprep.subr.bf16.mxu0 %v4550_v2 }
 0x2c2   :  { %3606 = vmatprep.subr.bf16.mxu1 %v4550_v2 }
 0x2c4   :  { %3625 = vmatpush3.bf16.msra.mxu0 %v4695_v16 }
 0x2c5   :  { %3607 = vmatpush3.bf16.msra.mxu1 %v4704_v17  ;;  %3626 = vmatprep.subr.bf16.mxu0 %v4550_v2 }
 0x2c6   :  { %3608 = vmatprep.subr.bf16.mxu1 %v4550_v2 }
 0x2c8   :  { %3627 = vmatpush3.bf16.msra.mxu0 %v4704_v17 }
 0x2c9   :  { %3609 = vmatpush3.bf16.msra.mxu1 %v4713_v18  ;;  %3628 = vmatprep.subr.bf16.mxu0 %v4550_v2 }
 0x2ca   :  { %3610 = vmatprep.subr.bf16.mxu1 %v4550_v2 }
 0x2cc   :  { %3629 = vmatpush3.bf16.msra.mxu0 %v4713_v18 }
 0x2cd   :  { %3611 = vmatpush3.bf16.msra.mxu1 %v4722_v19  ;;  %3630 = vmatprep.subr.bf16.mxu0 %v4550_v2 }
 0x2ce   :  { %3636 = vmatprep.subr.bf16.mxu1 %v4550_v2 }
 0x2d0   :  { %3631 = vmatpush3.bf16.msra.mxu0 %v4722_v19 }
 0x2d1   :  { %3656 = vmatprep.subr.bf16.mxu0 %v4550_v2 }
 0x383   :  { %v586_v34 = vpop.f32.mrb[12].mxu1 }
 0x384   :  { %v587_v35 = vadd.f32 %v586_v34, %v4730_v24  ;;  %v3588_v37 = vpop.f32.mrb[13].mxu1 }
 0x385   :  { %v589_v38 = vpop.f32.mrb[14].mxu1 }
 0x386   :  { %v596_v39 = vadd.f32 %v3039_v33, %v587_v35  ;;  %v3589_v48 = vpop.f32.mrb[15].mxu1  ;;  %v635_v49 = vpop.f32.mrb[16].mxu0  ;;  %v812_v38 = vmul.f32 1.0090151, %v4847_v32  ;;  %v3044_v32 = vld [vmem:[%s5984_s2 + $0x7] ss:$0 sm:$0xff] }
 0x387   :  { %v636_v50 = vadd.f32 %v4728_v22, %v635_v49  ;;  %v3594_v51 = vpop.f32.mrb[17].mxu0 }
 0x388   :  { %4442 = vtanh.f32 %v596_v39  ;;  %v638_v52 = vpop.f32.mrb[18].mxu0 }
 0x389   :  { %v641_v53 = vadd.f32 %v3039_v33, %v636_v50  ;;  %v3595_v54 = vpop.f32.mrb[19].mxu0 }
 0x38b   :  { %4444 = vtanh.f32 %v641_v53 }
 0x392   :  { %v4443_v55 = vpop.eup %4442 }
 0x393   :  { %v643_v56 = vpack.c.bf16 %v4443_v55, %v4443_v55 }
 0x395   :  { %v4445_v57 = vpop.eup %4444  ;;  %3613 = vmatmul.mubr.bf16.vlgmr.msra.gmra.mrb[16].mxu1 %v643_v56 }
 0x396   :  { %v644_v58 = vpack.c.bf16 %v4445_v57, %v4445_v57  ;;  %3637 = vmatpush3.bf16.msra.mxu1 %v4740_v36  ;;  %3652 = vmatprep.mubr.msk.bf16.mxu1 %vm4551_vm2, %v4550_v2 }
 0x397   :  { %3638 = vmatprep.subr.bf16.mxu1 %v4550_v2 }
 0x398   :  { %3633 = vmatmul.mubr.bf16.vlgmr.msra.gmra.mrb[20].mxu0 %v644_v58 }
 0x399   :  { %3657 = vmatpush3.bf16.msra.mxu0 %v4740_v36  ;;  %3672 = vmatprep.mubr.msk.bf16.mxu0 %vm4551_vm2, %v4550_v2 }
 0x39a   :  { %3639 = vmatpush3.bf16.msra.mxu1 %v4746_v40  ;;  %3658 = vmatprep.subr.bf16.mxu0 %v4550_v2 }
 0x39b   :  { %3640 = vmatprep.subr.bf16.mxu1 %v4550_v2 }
 0x39d   :  { %3659 = vmatpush3.bf16.msra.mxu0 %v4746_v40 }
 0x39e   :  { %3641 = vmatpush3.bf16.msra.mxu1 %v4759_v41  ;;  %3660 = vmatprep.subr.bf16.mxu0 %v4550_v2 }
 0x39f   :  { %3642 = vmatprep.subr.bf16.mxu1 %v4550_v2 }
 0x3a1   :  { %3661 = vmatpush3.bf16.msra.mxu0 %v4759_v41 }
 0x3a2   :  { %3643 = vmatpush3.bf16.msra.mxu1 %v4768_v42  ;;  %3662 = vmatprep.subr.bf16.mxu0 %v4550_v2 }
 0x3a3   :  { %3644 = vmatprep.subr.bf16.mxu1 %v4550_v2 }
 0x3a5   :  { %3663 = vmatpush3.bf16.msra.mxu0 %v4768_v42 }
 0x3a6   :  { %3645 = vmatpush3.bf16.msra.mxu1 %v4780_v43  ;;  %3664 = vmatprep.subr.bf16.mxu0 %v4550_v2 }
 0x3a7   :  { %3646 = vmatprep.subr.bf16.mxu1 %v4550_v2 }
 0x3a9   :  { %3665 = vmatpush3.bf16.msra.mxu0 %v4780_v43 }
 0x3aa   :  { %3647 = vmatpush3.bf16.msra.mxu1 %v4789_v44  ;;  %3666 = vmatprep.subr.bf16.mxu0 %v4550_v2 }
 0x3ab   :  { %3648 = vmatprep.subr.bf16.mxu1 %v4550_v2 }
 0x3ad   :  { %3667 = vmatpush3.bf16.msra.mxu0 %v4789_v44 }
 0x3ae   :  { %3649 = vmatpush3.bf16.msra.mxu1 %v4798_v45  ;;  %3668 = vmatprep.subr.bf16.mxu0 %v4550_v2 }
 0x3af   :  { %3650 = vmatprep.subr.bf16.mxu1 %v4550_v2 }
 0x3b1   :  { %3669 = vmatpush3.bf16.msra.mxu0 %v4798_v45 }
 0x3b2   :  { %3651 = vmatpush3.bf16.msra.mxu1 %v4807_v46  ;;  %3670 = vmatprep.subr.bf16.mxu0 %v4550_v2 }
 0x3b3   :  { %3676 = vmatprep.subr.bf16.mxu1 %v4550_v2 }
 0x3b5   :  { %3671 = vmatpush3.bf16.msra.mxu0 %v4807_v46 }
 0x3b6   :  { %3682 = vmatprep.subr.bf16.mxu0 %v4550_v2 }
 0x468   :  { %v679_v59 = vpop.f32.mrb[16].mxu1 }
 0x469   :  { %v680_v60 = vadd.f32 %v4816_v47, %v679_v59  ;;  %v3614_v61 = vpop.f32.mrb[17].mxu1 }
 0x46a   :  { %v682_v63 = vpop.f32.mrb[18].mxu1 }
 0x46b   :  { %4446 = vtanh.f32 %v680_v60  ;;  %v3615_v0 = vpop.f32.mrb[19].mxu1  ;;  %v720_v1 = vpop.f32.mrb[20].mxu0 }
 0x46c   :  { %v721_v3 = vadd.f32 %v4816_v47, %v720_v1  ;;  %v3634_v4 = vpop.f32.mrb[21].mxu0 }
 0x46d   :  { %v723_v6 = vpop.f32.mrb[22].mxu0 }
 0x46e   :  { %4448 = vtanh.f32 %v721_v3  ;;  %v3635_v8 = vpop.f32.mrb[23].mxu0 }
 0x475   :  { %v4447_v9 = vpop.eup %4446 }
 0x476   :  { %v727_v13 = vpack.c.bf16 %v4447_v9, %v4447_v9 }
 0x478   :  { %v4449_v20 = vpop.eup %4448  ;;  %3653 = vmatmul.mubr.bf16.vlgmr.msra.gmra.mrb[20].mxu1 %v727_v13 }
 0x479   :  { %v768_v21 = vpack.c.bf16 %v4449_v20, %v4449_v20  ;;  %3677 = vmatpush3.bf16.msra.mxu1 %v4619_v5  ;;  %3678 = vmatprep.mubr.msk.bf16.mxu1 %vm4551_vm2, %v4550_v2 }
 0x47a   :  { %3688 = vmatprep.subr.bf16.mxu1 %v4550_v2 }
 0x47b   :  { %3673 = vmatmul.mubr.bf16.vlgmr.msra.gmra.mrb[24].mxu0 %v768_v21 }
 0x47c   :  { %3683 = vmatpush3.bf16.msra.mxu0 %v4619_v5  ;;  %3684 = vmatprep.mubr.msk.bf16.mxu0 %vm4551_vm2, %v4550_v2 }
 0x47d   :  { %3708 = vmatprep.subr.bf16.mxu0 %v4550_v2 }
 0x54b   :  { %v762_v23 = vpop.f32.mrb[20].mxu1 }
 0x54c   :  { %v763_v25 = vadd.f32 %v4831_v62, %v762_v23  ;;  %v3654_v26 = vpop.f32.mrb[21].mxu1 }
 0x54d   :  { %v765_v27 = vpop.f32.mrb[22].mxu1 }
 0x54e   :  { %v810_v7 = vmul.f32 -0.064344205, %v763_v25  ;;  %v3655_v30 = vpop.f32.mrb[23].mxu1  ;;  %v803_v31 = vpop.f32.mrb[24].mxu0 }
 0x54f   :  { %v804_v33 = vadd.f32 %v4831_v62, %v803_v31  ;;  %v3674_v34 = vpop.f32.mrb[25].mxu0 }
 0x550   :  { %v811_v35 = vadd.f32 %v810_v7, %v809_v28  ;;  %v806_v37 = vpop.f32.mrb[26].mxu0 }
 0x551   :  { %v813_v39 = vmul.f32 -0.064344205, %v804_v33  ;;  %v3675_v48 = vpop.f32.mrb[27].mxu0 }
 0x552   :  { %v4947_v49 = vadd.f32 %v3041_v11, %v811_v35 }
 0x553   :  { %v814_v50 = vadd.f32 %v813_v39, %v812_v38 }
 0x554   :  { %v821_v51 = vpack.c.bf16 %v4947_v49, %v4947_v49  ;;  %v1083_v48 = vmul.f32 1.0078812, %v4947_v49  ;;  %v3047_v49 = vld [vmem:[%s5987_s3 + $0x78] sm:$0xff] }
 0x555   :  { %v4954_v52 = vadd.f32 %v3042_v29, %v814_v50 }
 0x556   :  { %3679 = vmatmul.mubr.msk.bf16.vlgmr.msra.gmra.mrb[24].mxu1 %vm162_vm3, %v821_v51 }
 0x557   :  { %v822_v53 = vpack.c.bf16 %v4954_v52, %v4954_v52  ;;  %3689 = vmatpush3.bf16.msra.mxu1 %v4640_v10  ;;  %3704 = vmatprep.mubr.msk.bf16.mxu1 %vm4551_vm2, %v4550_v2 }
 0x558   :  { %3690 = vmatprep.subr.bf16.mxu1 %v4550_v2 }
 0x559   :  { %3685 = vmatmul.mubr.msk.bf16.vlgmr.msra.gmra.mrb[28].mxu0 %vm162_vm3, %v822_v53  ;;  %v3046_v53 = vld [vmem:[%s5987_s3 + $0x70] sm:$0xff] }
 0x55a   :  { %3709 = vmatpush3.bf16.msra.mxu0 %v4640_v10  ;;  %3724 = vmatprep.mubr.msk.bf16.mxu0 %vm4551_vm2, %v4550_v2 }
 0x55b   :  { %3691 = vmatpush3.bf16.msra.mxu1 %v4652_v12  ;;  %3710 = vmatprep.subr.bf16.mxu0 %v4550_v2 }
 0x55c   :  { %3692 = vmatprep.subr.bf16.mxu1 %v4550_v2 }
 0x55e   :  { %3711 = vmatpush3.bf16.msra.mxu0 %v4652_v12 }
 0x55f   :  { %3693 = vmatpush3.bf16.msra.mxu1 %v4669_v14  ;;  %3712 = vmatprep.subr.bf16.mxu0 %v4550_v2 }
 0x560   :  { %3694 = vmatprep.subr.bf16.mxu1 %v4550_v2 }
 0x562   :  { %3713 = vmatpush3.bf16.msra.mxu0 %v4669_v14 }
 0x563   :  { %3695 = vmatpush3.bf16.msra.mxu1 %v4686_v15  ;;  %3714 = vmatprep.subr.bf16.mxu0 %v4550_v2 }
 0x564   :  { %3696 = vmatprep.subr.bf16.mxu1 %v4550_v2 }
 0x566   :  { %3715 = vmatpush3.bf16.msra.mxu0 %v4686_v15 }
 0x567   :  { %3697 = vmatpush3.bf16.msra.mxu1 %v4695_v16  ;;  %3716 = vmatprep.subr.bf16.mxu0 %v4550_v2 }
 0x568   :  { %3698 = vmatprep.subr.bf16.mxu1 %v4550_v2 }
 0x56a   :  { %3717 = vmatpush3.bf16.msra.mxu0 %v4695_v16 }
 0x56b   :  { %3699 = vmatpush3.bf16.msra.mxu1 %v4704_v17  ;;  %3718 = vmatprep.subr.bf16.mxu0 %v4550_v2 }
 0x56c   :  { %3700 = vmatprep.subr.bf16.mxu1 %v4550_v2 }
 0x56e   :  { %3719 = vmatpush3.bf16.msra.mxu0 %v4704_v17 }
 0x56f   :  { %3701 = vmatpush3.bf16.msra.mxu1 %v4713_v18  ;;  %3720 = vmatprep.subr.bf16.mxu0 %v4550_v2 }
 0x570   :  { %3702 = vmatprep.subr.bf16.mxu1 %v4550_v2 }
 0x572   :  { %3721 = vmatpush3.bf16.msra.mxu0 %v4713_v18 }
 0x573   :  { %3703 = vmatpush3.bf16.msra.mxu1 %v4722_v19  ;;  %3722 = vmatprep.subr.bf16.mxu0 %v4550_v2 }
 0x574   :  { %3728 = vmatprep.subr.bf16.mxu1 %v4550_v2 }
 0x576   :  { %3723 = vmatpush3.bf16.msra.mxu0 %v4722_v19 }
 0x577   :  { %3748 = vmatprep.subr.bf16.mxu0 %v4550_v2 }
 0x629   :  { %v860_v54 = vpop.f32.mrb[24].mxu1 }
 0x62a   :  { %v861_v55 = vadd.f32 %v860_v54, %v4730_v24  ;;  %v3680_v56 = vpop.f32.mrb[25].mxu1 }
 0x62b   :  { %v863_v57 = vpop.f32.mrb[26].mxu1 }
 0x62c   :  { %v870_v58 = vadd.f32 %v3044_v32, %v861_v55  ;;  %v3681_v59 = vpop.f32.mrb[27].mxu1  ;;  %v909_v60 = vpop.f32.mrb[28].mxu0  ;;  %v1086_v57 = vmul.f32 1.0078812, %v4954_v52 }
 0x62d   :  { %v910_v61 = vadd.f32 %v4728_v22, %v909_v60  ;;  %v3686_v63 = vpop.f32.mrb[29].mxu0 }
 0x62e   :  { %4450 = vtanh.f32 %v870_v58  ;;  %v912_v0 = vpop.f32.mrb[30].mxu0 }
 0x62f   :  { %v915_v1 = vadd.f32 %v3044_v32, %v910_v61  ;;  %v3687_v3 = vpop.f32.mrb[31].mxu0 }
 0x631   :  { %4452 = vtanh.f32 %v915_v1 }
 0x638   :  { %v4451_v4 = vpop.eup %4450 }
 0x639   :  { %v917_v6 = vpack.c.bf16 %v4451_v4, %v4451_v4 }
 0x63b   :  { %v4453_v8 = vpop.eup %4452  ;;  %3705 = vmatmul.mubr.bf16.vlgmr.msra.gmra.mrb[28].mxu1 %v917_v6 }
 0x63c   :  { %v918_v9 = vpack.c.bf16 %v4453_v8, %v4453_v8  ;;  %3729 = vmatpush3.bf16.msra.mxu1 %v4740_v36  ;;  %3744 = vmatprep.mubr.msk.bf16.mxu1 %vm4551_vm2, %v4550_v2 }
 0x63d   :  { %3730 = vmatprep.subr.bf16.mxu1 %v4550_v2 }
 0x63e   :  { %3725 = vmatmul.mubr.bf16.vlgmr.msra.gmra.mrb[32].mxu0 %v918_v9 }
 0x63f   :  { %3749 = vmatpush3.bf16.msra.mxu0 %v4740_v36  ;;  %3764 = vmatprep.mubr.msk.bf16.mxu0 %vm4551_vm2, %v4550_v2 }
 0x640   :  { %3731 = vmatpush3.bf16.msra.mxu1 %v4746_v40  ;;  %3750 = vmatprep.subr.bf16.mxu0 %v4550_v2 }
 0x641   :  { %3732 = vmatprep.subr.bf16.mxu1 %v4550_v2 }
 0x643   :  { %3751 = vmatpush3.bf16.msra.mxu0 %v4746_v40 }
 0x644   :  { %3733 = vmatpush3.bf16.msra.mxu1 %v4759_v41  ;;  %3752 = vmatprep.subr.bf16.mxu0 %v4550_v2 }
 0x645   :  { %3734 = vmatprep.subr.bf16.mxu1 %v4550_v2 }
 0x647   :  { %3753 = vmatpush3.bf16.msra.mxu0 %v4759_v41 }
 0x648   :  { %3735 = vmatpush3.bf16.msra.mxu1 %v4768_v42  ;;  %3754 = vmatprep.subr.bf16.mxu0 %v4550_v2 }
 0x649   :  { %3736 = vmatprep.subr.bf16.mxu1 %v4550_v2 }
 0x64b   :  { %3755 = vmatpush3.bf16.msra.mxu0 %v4768_v42 }
 0x64c   :  { %3737 = vmatpush3.bf16.msra.mxu1 %v4780_v43  ;;  %3756 = vmatprep.subr.bf16.mxu0 %v4550_v2 }
 0x64d   :  { %3738 = vmatprep.subr.bf16.mxu1 %v4550_v2 }
 0x64f   :  { %3757 = vmatpush3.bf16.msra.mxu0 %v4780_v43 }
 0x650   :  { %3739 = vmatpush3.bf16.msra.mxu1 %v4789_v44  ;;  %3758 = vmatprep.subr.bf16.mxu0 %v4550_v2 }
 0x651   :  { %3740 = vmatprep.subr.bf16.mxu1 %v4550_v2 }
 0x653   :  { %3759 = vmatpush3.bf16.msra.mxu0 %v4789_v44 }
 0x654   :  { %3741 = vmatpush3.bf16.msra.mxu1 %v4798_v45  ;;  %3760 = vmatprep.subr.bf16.mxu0 %v4550_v2 }
 0x655   :  { %3742 = vmatprep.subr.bf16.mxu1 %v4550_v2 }
 0x657   :  { %3761 = vmatpush3.bf16.msra.mxu0 %v4798_v45 }
 0x658   :  { %3743 = vmatpush3.bf16.msra.mxu1 %v4807_v46  ;;  %3762 = vmatprep.subr.bf16.mxu0 %v4550_v2 }
 0x659   :  { %3768 = vmatprep.subr.bf16.mxu1 %v4550_v2 }
 0x65b   :  { %3763 = vmatpush3.bf16.msra.mxu0 %v4807_v46 }
 0x65c   :  { %3774 = vmatprep.subr.bf16.mxu0 %v4550_v2 }
 0x70e   :  { %v953_v13 = vpop.f32.mrb[28].mxu1 }
 0x70f   :  { %v954_v20 = vadd.f32 %v4816_v47, %v953_v13  ;;  %v3706_v21 = vpop.f32.mrb[29].mxu1 }
 0x710   :  { %v956_v23 = vpop.f32.mrb[30].mxu1 }
 0x711   :  { %4454 = vtanh.f32 %v954_v20  ;;  %v3707_v25 = vpop.f32.mrb[31].mxu1  ;;  %v994_v26 = vpop.f32.mrb[32].mxu0 }
 0x712   :  { %v995_v27 = vadd.f32 %v4816_v47, %v994_v26  ;;  %v3726_v28 = vpop.f32.mrb[33].mxu0 }
 0x713   :  { %v997_v7 = vpop.f32.mrb[34].mxu0 }
 0x714   :  { %4456 = vtanh.f32 %v995_v27  ;;  %v3727_v30 = vpop.f32.mrb[35].mxu0 }
 0x71b   :  { %v4455_v31 = vpop.eup %4454 }
 0x71c   :  { %v1001_v11 = vpack.c.bf16 %v4455_v31, %v4455_v31 }
 0x71e   :  { %v4457_v33 = vpop.eup %4456  ;;  %3745 = vmatmul.mubr.bf16.vlgmr.msra.gmra.mrb[32].mxu1 %v1001_v11 }
 0x71f   :  { %v1042_v34 = vpack.c.bf16 %v4457_v33, %v4457_v33  ;;  %3769 = vmatpush3.bf16.msra.mxu1 %v4619_v5  ;;  %3770 = vmatprep.mubr.msk.bf16.mxu1 %vm4551_vm2, %v4550_v2 }
 0x720   :  { %3780 = vmatprep.subr.bf16.mxu1 %v4550_v2 }
 0x721   :  { %3765 = vmatmul.mubr.bf16.vlgmr.msra.gmra.mrb[36].mxu0 %v1042_v34 }
 0x722   :  { %3775 = vmatpush3.bf16.msra.mxu0 %v4619_v5  ;;  %3776 = vmatprep.mubr.msk.bf16.mxu0 %vm4551_vm2, %v4550_v2 }
 0x723   :  { %3800 = vmatprep.subr.bf16.mxu0 %v4550_v2 }
 0x7f1   :  { %v1036_v35 = vpop.f32.mrb[32].mxu1 }
 0x7f2   :  { %v1037_v37 = vadd.f32 %v4831_v62, %v1036_v35  ;;  %v3746_v38 = vpop.f32.mrb[33].mxu1 }
 0x7f3   :  { %v1039_v39 = vpop.f32.mrb[34].mxu1  ;;  %v3051_v38 = vld [vmem:[%s5987_s3 + $0x60] sm:$0xff] }
 0x7f4   :  { %v1084_v29 = vmul.f32 -0.06350971, %v1037_v37  ;;  %v3747_v50 = vpop.f32.mrb[35].mxu1  ;;  %v1077_v51 = vpop.f32.mrb[36].mxu0 }
 0x7f5   :  { %v1078_v32 = vadd.f32 %v4831_v62, %v1077_v51  ;;  %v3766_v54 = vpop.f32.mrb[37].mxu0 }
 0x7f6   :  { %v1085_v55 = vadd.f32 %v1084_v29, %v1083_v48  ;;  %v1080_v56 = vpop.f32.mrb[38].mxu0 }
 0x7f7   :  { %v1087_v58 = vmul.f32 -0.06350971, %v1078_v32  ;;  %v3767_v59 = vpop.f32.mrb[39].mxu0 }
 0x7f8   :  { %v5054_v60 = vadd.f32 %v3046_v53, %v1085_v55  ;;  %v3052_v55 = vld [vmem:[%s5987_s3 + $0x68] sm:$0xff]  ;;  %v5176_v59 = vld [vmem:[%s5982_s6] sm:$0xff]  }
 0x7f9   :  { %v1088_v61 = vadd.f32 %v1087_v58, %v1086_v57 }
 0x7fa   :  { %v1095_v63 = vpack.c.bf16 %v5054_v60, %v5054_v60  ;;  %v1357_v33 = vmul.f32 1.0067517, %v5054_v60  ;;  %v5189_v60 = vld [vmem:[%s5982_s6 + $0x8] sm:$0xff]  }
 0x7fb   :  { %v5061_v0 = vadd.f32 %v3047_v49, %v1088_v61  ;;  %v5198_v49 = vld [vmem:[%s5982_s6 + $0x10] sm:$0xff]   ;;  %v5207_v61 = vld [vmem:[%s5982_s6 + $0x18] sm:$0xff]  }
 0x7fc   :  { %3771 = vmatmul.mubr.msk.bf16.vlgmr.msra.gmra.mrb[36].mxu1 %vm162_vm3, %v1095_v63  ;;  %v5216_v63 = vld [vmem:[%s5982_s6 + $0x20] sm:$0xff]  }
 0x7fd   :  { %v1096_v1 = vpack.c.bf16 %v5061_v0, %v5061_v0  ;;  %3781 = vmatpush3.bf16.msra.mxu1 %v4640_v10  ;;  %3796 = vmatprep.mubr.msk.bf16.mxu1 %vm4551_vm2, %v4550_v2  ;;  %v1360_v51 = vmul.f32 1.0067517, %v5061_v0  ;;  %v5225_v0 = vld [vmem:[%s5982_s6 + $0x28] sm:$0xff]  }
 0x7fe   :  { %3782 = vmatprep.subr.bf16.mxu1 %v4550_v2 }
 0x7ff   :  { %3777 = vmatmul.mubr.msk.bf16.vlgmr.msra.gmra.mrb[40].mxu0 %vm162_vm3, %v1096_v1  ;;  %v5234_v1 = vld [vmem:[%s5982_s6 + $0x30] sm:$0xff]  }
 0x800   :  { %3801 = vmatpush3.bf16.msra.mxu0 %v4640_v10  ;;  %3816 = vmatprep.mubr.msk.bf16.mxu0 %vm4551_vm2, %v4550_v2  ;;  %v3049_v10 = vld [vmem:[%s5984_s2 + $0x6] ss:$0 sm:$0xff] }
 0x801   :  { %3783 = vmatpush3.bf16.msra.mxu1 %v4652_v12  ;;  %3802 = vmatprep.subr.bf16.mxu0 %v4550_v2 }
 0x802   :  { %3784 = vmatprep.subr.bf16.mxu1 %v4550_v2 }
 0x804   :  { %3803 = vmatpush3.bf16.msra.mxu0 %v4652_v12 }
 0x805   :  { %3785 = vmatpush3.bf16.msra.mxu1 %v4669_v14  ;;  %3804 = vmatprep.subr.bf16.mxu0 %v4550_v2 }
 0x806   :  { %3786 = vmatprep.subr.bf16.mxu1 %v4550_v2 }
 0x808   :  { %3805 = vmatpush3.bf16.msra.mxu0 %v4669_v14 }
 0x809   :  { %3787 = vmatpush3.bf16.msra.mxu1 %v4686_v15  ;;  %3806 = vmatprep.subr.bf16.mxu0 %v4550_v2 }
 0x80a   :  { %3788 = vmatprep.subr.bf16.mxu1 %v4550_v2 }
 0x80c   :  { %3807 = vmatpush3.bf16.msra.mxu0 %v4686_v15 }
 0x80d   :  { %3789 = vmatpush3.bf16.msra.mxu1 %v4695_v16  ;;  %3808 = vmatprep.subr.bf16.mxu0 %v4550_v2 }
 0x80e   :  { %3790 = vmatprep.subr.bf16.mxu1 %v4550_v2 }
 0x810   :  { %3809 = vmatpush3.bf16.msra.mxu0 %v4695_v16 }
 0x811   :  { %3791 = vmatpush3.bf16.msra.mxu1 %v4704_v17  ;;  %3810 = vmatprep.subr.bf16.mxu0 %v4550_v2 }
 0x812   :  { %3792 = vmatprep.subr.bf16.mxu1 %v4550_v2 }
 0x814   :  { %3811 = vmatpush3.bf16.msra.mxu0 %v4704_v17 }
 0x815   :  { %3793 = vmatpush3.bf16.msra.mxu1 %v4713_v18  ;;  %3812 = vmatprep.subr.bf16.mxu0 %v4550_v2 }
 0x816   :  { %3794 = vmatprep.subr.bf16.mxu1 %v4550_v2 }
 0x818   :  { %3813 = vmatpush3.bf16.msra.mxu0 %v4713_v18 }
 0x819   :  { %3795 = vmatpush3.bf16.msra.mxu1 %v4722_v19  ;;  %3814 = vmatprep.subr.bf16.mxu0 %v4550_v2 }
 0x81a   :  { %3820 = vmatprep.subr.bf16.mxu1 %v4550_v2 }
 0x81c   :  { %3815 = vmatpush3.bf16.msra.mxu0 %v4722_v19 }
 0x81d   :  { %3840 = vmatprep.subr.bf16.mxu0 %v4550_v2 }
 0x8cf   :  { %v1134_v12 = vpop.f32.mrb[36].mxu1 }
 0x8d0   :  { %v1135_v14 = vadd.f32 %v1134_v12, %v4730_v24  ;;  %v3772_v15 = vpop.f32.mrb[37].mxu1  ;;  %v3054_v12 = vld [vmem:[%s5984_s2 + $0x5] ss:$0 sm:$0xff] }
 0x8d1   :  { %v1137_v16 = vpop.f32.mrb[38].mxu1 }
 0x8d2   :  { %v1144_v17 = vadd.f32 %v3049_v10, %v1135_v14  ;;  %v3773_v18 = vpop.f32.mrb[39].mxu1  ;;  %v1183_v52 = vpop.f32.mrb[40].mxu0 }
 0x8d3   :  { %v1184_v3 = vadd.f32 %v4728_v22, %v1183_v52  ;;  %v3778_v4 = vpop.f32.mrb[41].mxu0 }
 0x8d4   :  { %4458 = vtanh.f32 %v1144_v17  ;;  %v1186_v6 = vpop.f32.mrb[42].mxu0 }
 0x8d5   :  { %v1189_v19 = vadd.f32 %v3049_v10, %v1184_v3  ;;  %v3779_v8 = vpop.f32.mrb[43].mxu0  ;;  %v5243_v10 = vld [vmem:[%s5982_s6 + $0x38] sm:$0xff]  }
 0x8d7   :  { %4460 = vtanh.f32 %v1189_v19 }
 0x8de   :  { %v4459_v9 = vpop.eup %4458 }
 0x8df   :  { %v1191_v13 = vpack.c.bf16 %v4459_v9, %v4459_v9 }
 0x8e1   :  { %v4461_v20 = vpop.eup %4460  ;;  %3797 = vmatmul.mubr.bf16.vlgmr.msra.gmra.mrb[40].mxu1 %v1191_v13 }
 0x8e2   :  { %v1192_v21 = vpack.c.bf16 %v4461_v20, %v4461_v20  ;;  %3821 = vmatpush3.bf16.msra.mxu1 %v4740_v36  ;;  %3836 = vmatprep.mubr.msk.bf16.mxu1 %vm4551_vm2, %v4550_v2 }
 0x8e3   :  { %3822 = vmatprep.subr.bf16.mxu1 %v4550_v2 }
 0x8e4   :  { %3817 = vmatmul.mubr.bf16.vlgmr.msra.gmra.mrb[44].mxu0 %v1192_v21 }
 0x8e5   :  { %3841 = vmatpush3.bf16.msra.mxu0 %v4740_v36  ;;  %3856 = vmatprep.mubr.msk.bf16.mxu0 %vm4551_vm2, %v4550_v2 }
 0x8e6   :  { %3823 = vmatpush3.bf16.msra.mxu1 %v4746_v40  ;;  %3842 = vmatprep.subr.bf16.mxu0 %v4550_v2 }
 0x8e7   :  { %3824 = vmatprep.subr.bf16.mxu1 %v4550_v2 }
 0x8e9   :  { %3843 = vmatpush3.bf16.msra.mxu0 %v4746_v40 }
 0x8ea   :  { %3825 = vmatpush3.bf16.msra.mxu1 %v4759_v41  ;;  %3844 = vmatprep.subr.bf16.mxu0 %v4550_v2 }
 0x8eb   :  { %3826 = vmatprep.subr.bf16.mxu1 %v4550_v2 }
 0x8ed   :  { %3845 = vmatpush3.bf16.msra.mxu0 %v4759_v41 }
 0x8ee   :  { %3827 = vmatpush3.bf16.msra.mxu1 %v4768_v42  ;;  %3846 = vmatprep.subr.bf16.mxu0 %v4550_v2 }
 0x8ef   :  { %3828 = vmatprep.subr.bf16.mxu1 %v4550_v2 }
 0x8f1   :  { %3847 = vmatpush3.bf16.msra.mxu0 %v4768_v42 }
 0x8f2   :  { %3829 = vmatpush3.bf16.msra.mxu1 %v4780_v43  ;;  %3848 = vmatprep.subr.bf16.mxu0 %v4550_v2 }
 0x8f3   :  { %3830 = vmatprep.subr.bf16.mxu1 %v4550_v2 }
 0x8f5   :  { %3849 = vmatpush3.bf16.msra.mxu0 %v4780_v43 }
 0x8f6   :  { %3831 = vmatpush3.bf16.msra.mxu1 %v4789_v44  ;;  %3850 = vmatprep.subr.bf16.mxu0 %v4550_v2 }
 0x8f7   :  { %3832 = vmatprep.subr.bf16.mxu1 %v4550_v2 }
 0x8f9   :  { %3851 = vmatpush3.bf16.msra.mxu0 %v4789_v44 }
 0x8fa   :  { %3833 = vmatpush3.bf16.msra.mxu1 %v4798_v45  ;;  %3852 = vmatprep.subr.bf16.mxu0 %v4550_v2 }
 0x8fb   :  { %3834 = vmatprep.subr.bf16.mxu1 %v4550_v2 }
 0x8fd   :  { %3853 = vmatpush3.bf16.msra.mxu0 %v4798_v45 }
 0x8fe   :  { %3835 = vmatpush3.bf16.msra.mxu1 %v4807_v46  ;;  %3854 = vmatprep.subr.bf16.mxu0 %v4550_v2 }
 0x8ff   :  { %3860 = vmatprep.subr.bf16.mxu1 %v4550_v2 }
 0x901   :  { %3855 = vmatpush3.bf16.msra.mxu0 %v4807_v46 }
 0x902   :  { %3866 = vmatprep.subr.bf16.mxu0 %v4550_v2 }
 0x9b4   :  { %v1227_v36 = vpop.f32.mrb[40].mxu1 }
 0x9b5   :  { %v1228_v40 = vadd.f32 %v4816_v47, %v1227_v36  ;;  %v3798_v41 = vpop.f32.mrb[41].mxu1 }
 0x9b6   :  { %v1230_v42 = vpop.f32.mrb[42].mxu1  ;;  %v5270_v41 = vld [vmem:[%s5983_s8 + $0x8] sm:$0xff]  }
 0x9b7   :  { %4462 = vtanh.f32 %v1228_v40  ;;  %v3799_v43 = vpop.f32.mrb[43].mxu1  ;;  %v1268_v44 = vpop.f32.mrb[44].mxu0  ;;  %v5258_v40 = vld [vmem:[%s5983_s8] sm:$0xff]   ;;  %v5279_v42 = vld [vmem:[%s5983_s8 + $0x10] sm:$0xff]  }
 0x9b8   :  { %v1269_v45 = vadd.f32 %v4816_v47, %v1268_v44  ;;  %v3818_v23 = vpop.f32.mrb[45].mxu0  ;;  %v5288_v43 = vld [vmem:[%s5983_s8 + $0x18] sm:$0xff]   ;;  %v5297_v44 = vld [vmem:[%s5983_s8 + $0x20] sm:$0xff]  }
 0x9b9   :  { %v1271_v25 = vpop.f32.mrb[46].mxu0  ;;  %v5315_v23 = vld [vmem:[%s5983_s8 + $0x30] sm:$0xff]  }
 0x9ba   :  { %4464 = vtanh.f32 %v1269_v45  ;;  %v3819_v26 = vpop.f32.mrb[47].mxu0  ;;  %v5306_v45 = vld [vmem:[%s5983_s8 + $0x28] sm:$0xff]   ;;  %v5324_v25 = vld [vmem:[%s5983_s8 + $0x38] sm:$0xff]  }
 0x9c1   :  { %v4463_v27 = vpop.eup %4462 }
 0x9c2   :  { %v1275_v28 = vpack.c.bf16 %v4463_v27, %v4463_v27  ;;  %v5334_v27 = vld [vmem:[%s5985_s7] ss:$0 sm:$0xff] }
 0x9c4   :  { %v4465_v7 = vpop.eup %4464  ;;  %3837 = vmatmul.mubr.bf16.vlgmr.msra.gmra.mrb[44].mxu1 %v1275_v28 }
 0x9c5   :  { %v1316_v46 = vpack.c.bf16 %v4465_v7, %v4465_v7  ;;  %3861 = vmatpush3.bf16.msra.mxu1 %v4619_v5  ;;  %3862 = vmatprep.mubr.msk.bf16.mxu1 %vm4551_vm2, %v4550_v2 }
 0x9c6   :  { %3872 = vmatprep.subr.bf16.mxu1 %v4550_v2 }
 0x9c7   :  { %3857 = vmatmul.mubr.bf16.vlgmr.msra.gmra.mrb[48].mxu0 %v1316_v46 }
 0x9c8   :  { %3867 = vmatpush3.bf16.msra.mxu0 %v4619_v5  ;;  %3868 = vmatprep.mubr.msk.bf16.mxu0 %vm4551_vm2, %v4550_v2 }
 0x9c9   :  { %3892 = vmatprep.subr.bf16.mxu0 %v4550_v2 }
 0xa97   :  { %v1310_v47 = vpop.f32.mrb[44].mxu1 }
 0xa98   :  { %v1311_v30 = vadd.f32 %v4831_v62, %v1310_v47  ;;  %v3838_v31 = vpop.f32.mrb[45].mxu1 }
 0xa99   :  { %v1313_v11 = vpop.f32.mrb[46].mxu1 }
 0xa9a   :  { %v1358_v34 = vmul.f32 -0.062567905, %v1311_v30  ;;  %v3839_v35 = vpop.f32.mrb[47].mxu1  ;;  %v1351_v37 = vpop.f32.mrb[48].mxu0 }
 0xa9b   :  { %v1352_v39 = vadd.f32 %v4831_v62, %v1351_v37  ;;  %v3858_v48 = vpop.f32.mrb[49].mxu0 }
 0xa9c   :  { %v1359_v29 = vadd.f32 %v1358_v34, %v1357_v33  ;;  %v1354_v50 = vpop.f32.mrb[50].mxu0 }
 0xa9d   :  { %v1361_v53 = vmul.f32 -0.062567905, %v1352_v39  ;;  %v3859_v32 = vpop.f32.mrb[51].mxu0 }
 0xa9e   :  { %v5161_v54 = vadd.f32 %v3051_v38, %v1359_v29  ;;  %v5349_v29 = vld [vmem:[%s5986_s9] ss:$0 sm:$0xff] }
 0xa9f   :  { %v1362_v56 = vadd.f32 %v1361_v53, %v1360_v51 }
 0xaa0   :  { %v1369_v57 = vpack.c.bf16 %v5161_v54, %v5161_v54  ;;  %v1631_v32 = vmul.f32 1.0056245, %v5161_v54  ;;  %v3057_v54 = vld [vmem:[%s5987_s3 + $0x58] sm:$0xff] }
 0xaa1   :  { %v5168_v58 = vadd.f32 %v3052_v55, %v1362_v56 }
 0xaa2   :  { %3863 = vmatmul.mubr.msk.bf16.vlgmr.msra.gmra.mrb[48].mxu1 %vm162_vm3, %v1369_v57 }
 0xaa3   :  { %v1370_v62 = vpack.c.bf16 %v5168_v58, %v5168_v58  ;;  %3873 = vmatpush3.bf16.msra.mxu1 %v5176_v59  ;;  %3888 = vmatprep.mubr.msk.bf16.mxu1 %vm4551_vm2, %v4550_v2 }
 0xaa4   :  { %3874 = vmatprep.subr.bf16.mxu1 %v4550_v2 }
 0xaa5   :  { %3869 = vmatmul.mubr.msk.bf16.vlgmr.msra.gmra.mrb[52].mxu0 %vm162_vm3, %v1370_v62  ;;  %v3056_v62 = vld [vmem:[%s5987_s3 + $0x50] sm:$0xff] }
 0xaa6   :  { %3893 = vmatpush3.bf16.msra.mxu0 %v5176_v59  ;;  %3908 = vmatprep.mubr.msk.bf16.mxu0 %vm4551_vm2, %v4550_v2 }
 0xaa7   :  { %3875 = vmatpush3.bf16.msra.mxu1 %v5189_v60  ;;  %3894 = vmatprep.subr.bf16.mxu0 %v4550_v2 }
 0xaa8   :  { %3876 = vmatprep.subr.bf16.mxu1 %v4550_v2 }
 0xaaa   :  { %3895 = vmatpush3.bf16.msra.mxu0 %v5189_v60 }
 0xaab   :  { %3877 = vmatpush3.bf16.msra.mxu1 %v5198_v49  ;;  %3896 = vmatprep.subr.bf16.mxu0 %v4550_v2 }
 0xaac   :  { %3878 = vmatprep.subr.bf16.mxu1 %v4550_v2 }
 0xaae   :  { %3897 = vmatpush3.bf16.msra.mxu0 %v5198_v49 }
 0xaaf   :  { %3879 = vmatpush3.bf16.msra.mxu1 %v5207_v61  ;;  %3898 = vmatprep.subr.bf16.mxu0 %v4550_v2 }
 0xab0   :  { %3880 = vmatprep.subr.bf16.mxu1 %v4550_v2 }
 0xab2   :  { %3899 = vmatpush3.bf16.msra.mxu0 %v5207_v61 }
 0xab3   :  { %3881 = vmatpush3.bf16.msra.mxu1 %v5216_v63  ;;  %3900 = vmatprep.subr.bf16.mxu0 %v4550_v2 }
 0xab4   :  { %3882 = vmatprep.subr.bf16.mxu1 %v4550_v2 }
 0xab6   :  { %3901 = vmatpush3.bf16.msra.mxu0 %v5216_v63 }
 0xab7   :  { %3883 = vmatpush3.bf16.msra.mxu1 %v5225_v0  ;;  %3902 = vmatprep.subr.bf16.mxu0 %v4550_v2 }
 0xab8   :  { %3884 = vmatprep.subr.bf16.mxu1 %v4550_v2 }
 0xaba   :  { %3903 = vmatpush3.bf16.msra.mxu0 %v5225_v0 }
 0xabb   :  { %3885 = vmatpush3.bf16.msra.mxu1 %v5234_v1  ;;  %3904 = vmatprep.subr.bf16.mxu0 %v4550_v2 }
 0xabc   :  { %3886 = vmatprep.subr.bf16.mxu1 %v4550_v2 }
 0xabe   :  { %3905 = vmatpush3.bf16.msra.mxu0 %v5234_v1 }
 0xabf   :  { %3887 = vmatpush3.bf16.msra.mxu1 %v5243_v10  ;;  %3906 = vmatprep.subr.bf16.mxu0 %v4550_v2 }
 0xac0   :  { %3912 = vmatprep.subr.bf16.mxu1 %v4550_v2 }
 0xac2   :  { %3907 = vmatpush3.bf16.msra.mxu0 %v5243_v10 }
 0xac3   :  { %3932 = vmatprep.subr.bf16.mxu0 %v4550_v2 }
 0xb75   :  { %v1408_v14 = vpop.f32.mrb[48].mxu1 }
 0xb76   :  { %v1409_v15 = vadd.f32 %v1408_v14, %v4730_v24  ;;  %v3864_v16 = vpop.f32.mrb[49].mxu1 }
 0xb77   :  { %v1411_v17 = vpop.f32.mrb[50].mxu1 }
 0xb78   :  { %v1418_v18 = vadd.f32 %v3054_v12, %v1409_v15  ;;  %v3865_v52 = vpop.f32.mrb[51].mxu1  ;;  %v1457_v3 = vpop.f32.mrb[52].mxu0  ;;  %v1634_v17 = vmul.f32 1.0056245, %v5168_v58  ;;  %v3059_v58 = vld [vmem:[%s5984_s2 + $0x4] ss:$0 sm:$0xff] }
 0xb79   :  { %v1458_v4 = vadd.f32 %v4728_v22, %v1457_v3  ;;  %v3870_v6 = vpop.f32.mrb[53].mxu0 }
 0xb7a   :  { %4466 = vtanh.f32 %v1418_v18  ;;  %v1460_v19 = vpop.f32.mrb[54].mxu0 }
 0xb7b   :  { %v1463_v8 = vadd.f32 %v3054_v12, %v1458_v4  ;;  %v3871_v9 = vpop.f32.mrb[55].mxu0 }
 0xb7d   :  { %4468 = vtanh.f32 %v1463_v8 }
 0xb84   :  { %v4467_v13 = vpop.eup %4466 }
 0xb85   :  { %v1465_v20 = vpack.c.bf16 %v4467_v13, %v4467_v13 }
 0xb87   :  { %v4469_v21 = vpop.eup %4468  ;;  %3889 = vmatmul.mubr.bf16.vlgmr.msra.gmra.mrb[52].mxu1 %v1465_v20 }
 0xb88   :  { %v1466_v36 = vpack.c.bf16 %v4469_v21, %v4469_v21  ;;  %3913 = vmatpush3.bf16.msra.mxu1 %v5258_v40  ;;  %3928 = vmatprep.mubr.msk.bf16.mxu1 %vm4551_vm2, %v4550_v2 }
 0xb89   :  { %3914 = vmatprep.subr.bf16.mxu1 %v4550_v2 }
 0xb8a   :  { %3909 = vmatmul.mubr.bf16.vlgmr.msra.gmra.mrb[56].mxu0 %v1466_v36 }
 0xb8b   :  { %3933 = vmatpush3.bf16.msra.mxu0 %v5258_v40  ;;  %3948 = vmatprep.mubr.msk.bf16.mxu0 %vm4551_vm2, %v4550_v2 }
 0xb8c   :  { %3915 = vmatpush3.bf16.msra.mxu1 %v5270_v41  ;;  %3934 = vmatprep.subr.bf16.mxu0 %v4550_v2 }
 0xb8d   :  { %3916 = vmatprep.subr.bf16.mxu1 %v4550_v2 }
 0xb8f   :  { %3935 = vmatpush3.bf16.msra.mxu0 %v5270_v41 }
 0xb90   :  { %3917 = vmatpush3.bf16.msra.mxu1 %v5279_v42  ;;  %3936 = vmatprep.subr.bf16.mxu0 %v4550_v2 }
 0xb91   :  { %3918 = vmatprep.subr.bf16.mxu1 %v4550_v2 }
 0xb93   :  { %3937 = vmatpush3.bf16.msra.mxu0 %v5279_v42 }
 0xb94   :  { %3919 = vmatpush3.bf16.msra.mxu1 %v5288_v43  ;;  %3938 = vmatprep.subr.bf16.mxu0 %v4550_v2 }
 0xb95   :  { %3920 = vmatprep.subr.bf16.mxu1 %v4550_v2 }
 0xb97   :  { %3939 = vmatpush3.bf16.msra.mxu0 %v5288_v43 }
 0xb98   :  { %3921 = vmatpush3.bf16.msra.mxu1 %v5297_v44  ;;  %3940 = vmatprep.subr.bf16.mxu0 %v4550_v2 }
 0xb99   :  { %3922 = vmatprep.subr.bf16.mxu1 %v4550_v2 }
 0xb9b   :  { %3941 = vmatpush3.bf16.msra.mxu0 %v5297_v44 }
 0xb9c   :  { %3923 = vmatpush3.bf16.msra.mxu1 %v5306_v45  ;;  %3942 = vmatprep.subr.bf16.mxu0 %v4550_v2 }
 0xb9d   :  { %3924 = vmatprep.subr.bf16.mxu1 %v4550_v2 }
 0xb9f   :  { %3943 = vmatpush3.bf16.msra.mxu0 %v5306_v45 }
 0xba0   :  { %3925 = vmatpush3.bf16.msra.mxu1 %v5315_v23  ;;  %3944 = vmatprep.subr.bf16.mxu0 %v4550_v2 }
 0xba1   :  { %3926 = vmatprep.subr.bf16.mxu1 %v4550_v2 }
 0xba3   :  { %3945 = vmatpush3.bf16.msra.mxu0 %v5315_v23 }
 0xba4   :  { %3927 = vmatpush3.bf16.msra.mxu1 %v5324_v25  ;;  %3946 = vmatprep.subr.bf16.mxu0 %v4550_v2 }
 0xba5   :  { %3952 = vmatprep.subr.bf16.mxu1 %v4550_v2 }
 0xba7   :  { %3947 = vmatpush3.bf16.msra.mxu0 %v5324_v25 }
 0xba8   :  { %3958 = vmatprep.subr.bf16.mxu0 %v4550_v2 }
 0xc5a   :  { %v1501_v26 = vpop.f32.mrb[52].mxu1 }
 0xc5b   :  { %v1502_v28 = vadd.f32 %v5334_v27, %v1501_v26  ;;  %v3890_v7 = vpop.f32.mrb[53].mxu1 }
 0xc5c   :  { %v1504_v46 = vpop.f32.mrb[54].mxu1 }
 0xc5d   :  { %4470 = vtanh.f32 %v1502_v28  ;;  %v3891_v47 = vpop.f32.mrb[55].mxu1  ;;  %v1542_v30 = vpop.f32.mrb[56].mxu0 }
 0xc5e   :  { %v1543_v31 = vadd.f32 %v5334_v27, %v1542_v30  ;;  %v3910_v11 = vpop.f32.mrb[57].mxu0 }
 0xc5f   :  { %v1545_v33 = vpop.f32.mrb[58].mxu0 }
 0xc60   :  { %4472 = vtanh.f32 %v1543_v31  ;;  %v3911_v34 = vpop.f32.mrb[59].mxu0 }
 0xc67   :  { %v4471_v35 = vpop.eup %4470 }
 0xc68   :  { %v1549_v37 = vpack.c.bf16 %v4471_v35, %v4471_v35 }
 0xc6a   :  { %v4473_v38 = vpop.eup %4472  ;;  %3929 = vmatmul.mubr.bf16.vlgmr.msra.gmra.mrb[56].mxu1 %v1549_v37 }
 0xc6b   :  { %v1590_v39 = vpack.c.bf16 %v4473_v38, %v4473_v38  ;;  %3953 = vmatpush3.bf16.msra.mxu1 %v4619_v5  ;;  %3954 = vmatprep.mubr.msk.bf16.mxu1 %vm4551_vm2, %v4550_v2 }
 0xc6c   :  { %3964 = vmatprep.subr.bf16.mxu1 %v4550_v2 }
 0xc6d   :  { %3949 = vmatmul.mubr.bf16.vlgmr.msra.gmra.mrb[60].mxu0 %v1590_v39 }
 0xc6e   :  { %3959 = vmatpush3.bf16.msra.mxu0 %v4619_v5  ;;  %3960 = vmatprep.mubr.msk.bf16.mxu0 %vm4551_vm2, %v4550_v2 }
 0xc6f   :  { %3984 = vmatprep.subr.bf16.mxu0 %v4550_v2 }
 0xd3d   :  { %v1584_v48 = vpop.f32.mrb[56].mxu1 }
 0xd3e   :  { %v1585_v50 = vadd.f32 %v5349_v29, %v1584_v48  ;;  %v3930_v51 = vpop.f32.mrb[57].mxu1 }
 0xd3f   :  { %v1587_v53 = vpop.f32.mrb[58].mxu1 }
 0xd40   :  { %v1632_v55 = vmul.f32 -0.06144178, %v1585_v50  ;;  %v3931_v56 = vpop.f32.mrb[59].mxu1  ;;  %v1625_v57 = vpop.f32.mrb[60].mxu0 }
 0xd41   :  { %v1626_v12 = vadd.f32 %v5349_v29, %v1625_v57  ;;  %v3950_v14 = vpop.f32.mrb[61].mxu0 }
 0xd42   :  { %v1633_v15 = vadd.f32 %v1632_v55, %v1631_v32  ;;  %v1628_v16 = vpop.f32.mrb[62].mxu0 }
 0xd43   :  { %v1635_v18 = vmul.f32 -0.06144178, %v1626_v12  ;;  %v3951_v52 = vpop.f32.mrb[63].mxu0 }
 0xd44   :  { %v5358_v3 = vadd.f32 %v3056_v62, %v1633_v15 }
 0xd45   :  { %v1636_v4 = vadd.f32 %v1635_v18, %v1634_v17 }
 0xd46   :  { %v1643_v6 = vpack.c.bf16 %v5358_v3, %v5358_v3  ;;  %v1905_v52 = vmul.f32 1.0045016, %v5358_v3  ;;  %v3062_v3 = vld [vmem:[%s5987_s3 + $0x48] sm:$0xff] }
 0xd47   :  { %v5365_v19 = vadd.f32 %v3057_v54, %v1636_v4 }
 0xd48   :  { %3955 = vmatmul.mubr.msk.bf16.vlgmr.msra.gmra.mrb[60].mxu1 %vm162_vm3, %v1643_v6 }
 0xd49   :  { %v1644_v8 = vpack.c.bf16 %v5365_v19, %v5365_v19  ;;  %3965 = vmatpush3.bf16.msra.mxu1 %v5176_v59  ;;  %3980 = vmatprep.mubr.msk.bf16.mxu1 %vm4551_vm2, %v4550_v2 }
 0xd4a   :  { %3966 = vmatprep.subr.bf16.mxu1 %v4550_v2 }
 0xd4b   :  { %3961 = vmatmul.mubr.msk.bf16.vlgmr.msra.gmra.mrb[64].mxu0 %vm162_vm3, %v1644_v8  ;;  %v3061_v8 = vld [vmem:[%s5987_s3 + $0x40] sm:$0xff] }
 0xd4c   :  { %3985 = vmatpush3.bf16.msra.mxu0 %v5176_v59  ;;  %4000 = vmatprep.mubr.msk.bf16.mxu0 %vm4551_vm2, %v4550_v2 }
 0xd4d   :  { %3967 = vmatpush3.bf16.msra.mxu1 %v5189_v60  ;;  %3986 = vmatprep.subr.bf16.mxu0 %v4550_v2 }
 0xd4e   :  { %3968 = vmatprep.subr.bf16.mxu1 %v4550_v2 }
 0xd50   :  { %3987 = vmatpush3.bf16.msra.mxu0 %v5189_v60 }
 0xd51   :  { %3969 = vmatpush3.bf16.msra.mxu1 %v5198_v49  ;;  %3988 = vmatprep.subr.bf16.mxu0 %v4550_v2 }
 0xd52   :  { %3970 = vmatprep.subr.bf16.mxu1 %v4550_v2 }
 0xd54   :  { %3989 = vmatpush3.bf16.msra.mxu0 %v5198_v49 }
 0xd55   :  { %3971 = vmatpush3.bf16.msra.mxu1 %v5207_v61  ;;  %3990 = vmatprep.subr.bf16.mxu0 %v4550_v2 }
 0xd56   :  { %3972 = vmatprep.subr.bf16.mxu1 %v4550_v2 }
 0xd58   :  { %3991 = vmatpush3.bf16.msra.mxu0 %v5207_v61 }
 0xd59   :  { %3973 = vmatpush3.bf16.msra.mxu1 %v5216_v63  ;;  %3992 = vmatprep.subr.bf16.mxu0 %v4550_v2 }
 0xd5a   :  { %3974 = vmatprep.subr.bf16.mxu1 %v4550_v2 }
 0xd5c   :  { %3993 = vmatpush3.bf16.msra.mxu0 %v5216_v63 }
 0xd5d   :  { %3975 = vmatpush3.bf16.msra.mxu1 %v5225_v0  ;;  %3994 = vmatprep.subr.bf16.mxu0 %v4550_v2 }
 0xd5e   :  { %3976 = vmatprep.subr.bf16.mxu1 %v4550_v2 }
 0xd60   :  { %3995 = vmatpush3.bf16.msra.mxu0 %v5225_v0 }
 0xd61   :  { %3977 = vmatpush3.bf16.msra.mxu1 %v5234_v1  ;;  %3996 = vmatprep.subr.bf16.mxu0 %v4550_v2 }
 0xd62   :  { %3978 = vmatprep.subr.bf16.mxu1 %v4550_v2 }
 0xd64   :  { %3997 = vmatpush3.bf16.msra.mxu0 %v5234_v1 }
 0xd65   :  { %3979 = vmatpush3.bf16.msra.mxu1 %v5243_v10  ;;  %3998 = vmatprep.subr.bf16.mxu0 %v4550_v2 }
 0xd66   :  { %4004 = vmatprep.subr.bf16.mxu1 %v4550_v2 }
 0xd68   :  { %3999 = vmatpush3.bf16.msra.mxu0 %v5243_v10 }
 0xd69   :  { %4024 = vmatprep.subr.bf16.mxu0 %v4550_v2 }
 0xe1b   :  { %v1682_v9 = vpop.f32.mrb[60].mxu1 }
 0xe1c   :  { %v1683_v13 = vadd.f32 %v1682_v9, %v4730_v24  ;;  %v3956_v20 = vpop.f32.mrb[61].mxu1 }
 0xe1d   :  { %v1685_v21 = vpop.f32.mrb[62].mxu1 }
 0xe1e   :  { %v1692_v36 = vadd.f32 %v3059_v58, %v1683_v13  ;;  %v3957_v26 = vpop.f32.mrb[63].mxu1  ;;  %v1731_v28 = vpop.f32.mrb[64].mxu0  ;;  %v1908_v21 = vmul.f32 1.0045016, %v5365_v19  ;;  %v3064_v19 = vld [vmem:[%s5984_s2 + $0x3] ss:$0 sm:$0xff] }
 0xe1f   :  { %v1732_v7 = vadd.f32 %v4728_v22, %v1731_v28  ;;  %v3962_v46 = vpop.f32.mrb[65].mxu0 }
 0xe20   :  { %4474 = vtanh.f32 %v1692_v36  ;;  %v1734_v47 = vpop.f32.mrb[66].mxu0 }
 0xe21   :  { %v1737_v30 = vadd.f32 %v3059_v58, %v1732_v7  ;;  %v3963_v31 = vpop.f32.mrb[67].mxu0 }
 0xe23   :  { %4476 = vtanh.f32 %v1737_v30 }
 0xe2a   :  { %v4475_v11 = vpop.eup %4474 }
 0xe2b   :  { %v1739_v33 = vpack.c.bf16 %v4475_v11, %v4475_v11 }
 0xe2d   :  { %v4477_v34 = vpop.eup %4476  ;;  %3981 = vmatmul.mubr.bf16.vlgmr.msra.gmra.mrb[64].mxu1 %v1739_v33 }
 0xe2e   :  { %v1740_v35 = vpack.c.bf16 %v4477_v34, %v4477_v34  ;;  %4005 = vmatpush3.bf16.msra.mxu1 %v5258_v40  ;;  %4020 = vmatprep.mubr.msk.bf16.mxu1 %vm4551_vm2, %v4550_v2 }
 0xe2f   :  { %4006 = vmatprep.subr.bf16.mxu1 %v4550_v2 }
 0xe30   :  { %4001 = vmatmul.mubr.bf16.vlgmr.msra.gmra.mrb[68].mxu0 %v1740_v35 }
 0xe31   :  { %4025 = vmatpush3.bf16.msra.mxu0 %v5258_v40  ;;  %4040 = vmatprep.mubr.msk.bf16.mxu0 %vm4551_vm2, %v4550_v2 }
 0xe32   :  { %4007 = vmatpush3.bf16.msra.mxu1 %v5270_v41  ;;  %4026 = vmatprep.subr.bf16.mxu0 %v4550_v2 }
 0xe33   :  { %4008 = vmatprep.subr.bf16.mxu1 %v4550_v2 }
 0xe35   :  { %4027 = vmatpush3.bf16.msra.mxu0 %v5270_v41 }
 0xe36   :  { %4009 = vmatpush3.bf16.msra.mxu1 %v5279_v42  ;;  %4028 = vmatprep.subr.bf16.mxu0 %v4550_v2 }
 0xe37   :  { %4010 = vmatprep.subr.bf16.mxu1 %v4550_v2 }
 0xe39   :  { %4029 = vmatpush3.bf16.msra.mxu0 %v5279_v42 }
 0xe3a   :  { %4011 = vmatpush3.bf16.msra.mxu1 %v5288_v43  ;;  %4030 = vmatprep.subr.bf16.mxu0 %v4550_v2 }
 0xe3b   :  { %4012 = vmatprep.subr.bf16.mxu1 %v4550_v2 }
 0xe3d   :  { %4031 = vmatpush3.bf16.msra.mxu0 %v5288_v43 }
 0xe3e   :  { %4013 = vmatpush3.bf16.msra.mxu1 %v5297_v44  ;;  %4032 = vmatprep.subr.bf16.mxu0 %v4550_v2 }
 0xe3f   :  { %4014 = vmatprep.subr.bf16.mxu1 %v4550_v2 }
 0xe41   :  { %4033 = vmatpush3.bf16.msra.mxu0 %v5297_v44 }
 0xe42   :  { %4015 = vmatpush3.bf16.msra.mxu1 %v5306_v45  ;;  %4034 = vmatprep.subr.bf16.mxu0 %v4550_v2 }
 0xe43   :  { %4016 = vmatprep.subr.bf16.mxu1 %v4550_v2 }
 0xe45   :  { %4035 = vmatpush3.bf16.msra.mxu0 %v5306_v45 }
 0xe46   :  { %4017 = vmatpush3.bf16.msra.mxu1 %v5315_v23  ;;  %4036 = vmatprep.subr.bf16.mxu0 %v4550_v2 }
 0xe47   :  { %4018 = vmatprep.subr.bf16.mxu1 %v4550_v2 }
 0xe49   :  { %4037 = vmatpush3.bf16.msra.mxu0 %v5315_v23 }
 0xe4a   :  { %4019 = vmatpush3.bf16.msra.mxu1 %v5324_v25  ;;  %4038 = vmatprep.subr.bf16.mxu0 %v4550_v2 }
 0xe4b   :  { %4044 = vmatprep.subr.bf16.mxu1 %v4550_v2 }
 0xe4d   :  { %4039 = vmatpush3.bf16.msra.mxu0 %v5324_v25 }
 0xe4e   :  { %4050 = vmatprep.subr.bf16.mxu0 %v4550_v2 }
 0xf00   :  { %v1775_v37 = vpop.f32.mrb[64].mxu1 }
 0xf01   :  { %v1776_v38 = vadd.f32 %v5334_v27, %v1775_v37  ;;  %v3982_v39 = vpop.f32.mrb[65].mxu1 }
 0xf02   :  { %v1778_v48 = vpop.f32.mrb[66].mxu1 }
 0xf03   :  { %4478 = vtanh.f32 %v1776_v38  ;;  %v3983_v50 = vpop.f32.mrb[67].mxu1  ;;  %v1816_v51 = vpop.f32.mrb[68].mxu0 }
 0xf04   :  { %v1817_v53 = vadd.f32 %v5334_v27, %v1816_v51  ;;  %v4002_v32 = vpop.f32.mrb[69].mxu0 }
 0xf05   :  { %v1819_v55 = vpop.f32.mrb[70].mxu0 }
 0xf06   :  { %4480 = vtanh.f32 %v1817_v53  ;;  %v4003_v56 = vpop.f32.mrb[71].mxu0 }
 0xf0d   :  { %v4479_v57 = vpop.eup %4478 }
 0xf0e   :  { %v1823_v62 = vpack.c.bf16 %v4479_v57, %v4479_v57 }
 0xf10   :  { %v4481_v12 = vpop.eup %4480  ;;  %4021 = vmatmul.mubr.bf16.vlgmr.msra.gmra.mrb[68].mxu1 %v1823_v62 }
 0xf11   :  { %v1864_v14 = vpack.c.bf16 %v4481_v12, %v4481_v12  ;;  %4045 = vmatpush3.bf16.msra.mxu1 %v4619_v5  ;;  %4046 = vmatprep.mubr.msk.bf16.mxu1 %vm4551_vm2, %v4550_v2 }
 0xf12   :  { %4056 = vmatprep.subr.bf16.mxu1 %v4550_v2 }
 0xf13   :  { %4041 = vmatmul.mubr.bf16.vlgmr.msra.gmra.mrb[72].mxu0 %v1864_v14 }
 0xf14   :  { %4051 = vmatpush3.bf16.msra.mxu0 %v4619_v5  ;;  %4052 = vmatprep.mubr.msk.bf16.mxu0 %vm4551_vm2, %v4550_v2 }
 0xf15   :  { %4076 = vmatprep.subr.bf16.mxu0 %v4550_v2 }
 0xfe3   :  { %v1858_v15 = vpop.f32.mrb[68].mxu1 }
 0xfe4   :  { %v1859_v16 = vadd.f32 %v5349_v29, %v1858_v15  ;;  %v4022_v17 = vpop.f32.mrb[69].mxu1 }
 0xfe5   :  { %v1861_v18 = vpop.f32.mrb[70].mxu1 }
 0xfe6   :  { %v1906_v54 = vmul.f32 -0.059989218, %v1859_v16  ;;  %v4023_v4 = vpop.f32.mrb[71].mxu1  ;;  %v1899_v6 = vpop.f32.mrb[72].mxu0 }
 0xfe7   :  { %v1900_v58 = vadd.f32 %v5349_v29, %v1899_v6  ;;  %v4042_v9 = vpop.f32.mrb[73].mxu0 }
 0xfe8   :  { %v1907_v13 = vadd.f32 %v1906_v54, %v1905_v52  ;;  %v1902_v20 = vpop.f32.mrb[74].mxu0 }
 0xfe9   :  { %v1909_v36 = vmul.f32 -0.059989218, %v1900_v58  ;;  %v4043_v26 = vpop.f32.mrb[75].mxu0 }
 0xfea   :  { %v5465_v28 = vadd.f32 %v3061_v8, %v1907_v13 }
 0xfeb   :  { %v1910_v7 = vadd.f32 %v1909_v36, %v1908_v21 }
 0xfec   :  { %v1917_v46 = vpack.c.bf16 %v5465_v28, %v5465_v28  ;;  %v2179_v26 = vmul.f32 1.003382, %v5465_v28  ;;  %v3067_v28 = vld [vmem:[%s5987_s3 + $0x38] sm:$0xff] }
 0xfed   :  { %v5472_v47 = vadd.f32 %v3062_v3, %v1910_v7 }
 0xfee   :  { %4047 = vmatmul.mubr.msk.bf16.vlgmr.msra.gmra.mrb[72].mxu1 %vm162_vm3, %v1917_v46 }
 0xfef   :  { %v1918_v30 = vpack.c.bf16 %v5472_v47, %v5472_v47  ;;  %4057 = vmatpush3.bf16.msra.mxu1 %v5176_v59  ;;  %4072 = vmatprep.mubr.msk.bf16.mxu1 %vm4551_vm2, %v4550_v2 }
 0xff0   :  { %4058 = vmatprep.subr.bf16.mxu1 %v4550_v2 }
 0xff1   :  { %4053 = vmatmul.mubr.msk.bf16.vlgmr.msra.gmra.mrb[76].mxu0 %vm162_vm3, %v1918_v30  ;;  %v3066_v30 = vld [vmem:[%s5987_s3 + $0x30] sm:$0xff] }
 0xff2   :  { %4077 = vmatpush3.bf16.msra.mxu0 %v5176_v59  ;;  %4092 = vmatprep.mubr.msk.bf16.mxu0 %vm4551_vm2, %v4550_v2 }
 0xff3   :  { %4059 = vmatpush3.bf16.msra.mxu1 %v5189_v60  ;;  %4078 = vmatprep.subr.bf16.mxu0 %v4550_v2 }
 0xff4   :  { %4060 = vmatprep.subr.bf16.mxu1 %v4550_v2 }
 0xff6   :  { %4079 = vmatpush3.bf16.msra.mxu0 %v5189_v60 }
 0xff7   :  { %4061 = vmatpush3.bf16.msra.mxu1 %v5198_v49  ;;  %4080 = vmatprep.subr.bf16.mxu0 %v4550_v2 }
 0xff8   :  { %4062 = vmatprep.subr.bf16.mxu1 %v4550_v2 }
 0xffa   :  { %4081 = vmatpush3.bf16.msra.mxu0 %v5198_v49 }
 0xffb   :  { %4063 = vmatpush3.bf16.msra.mxu1 %v5207_v61  ;;  %4082 = vmatprep.subr.bf16.mxu0 %v4550_v2 }
 0xffc   :  { %4064 = vmatprep.subr.bf16.mxu1 %v4550_v2 }
 0xffe   :  { %4083 = vmatpush3.bf16.msra.mxu0 %v5207_v61 }
 0xfff   :  { %4065 = vmatpush3.bf16.msra.mxu1 %v5216_v63  ;;  %4084 = vmatprep.subr.bf16.mxu0 %v4550_v2 }
0x1000   :  { %4066 = vmatprep.subr.bf16.mxu1 %v4550_v2 }
0x1002   :  { %4085 = vmatpush3.bf16.msra.mxu0 %v5216_v63 }
0x1003   :  { %4067 = vmatpush3.bf16.msra.mxu1 %v5225_v0  ;;  %4086 = vmatprep.subr.bf16.mxu0 %v4550_v2 }
0x1004   :  { %4068 = vmatprep.subr.bf16.mxu1 %v4550_v2 }
0x1006   :  { %4087 = vmatpush3.bf16.msra.mxu0 %v5225_v0 }
0x1007   :  { %4069 = vmatpush3.bf16.msra.mxu1 %v5234_v1  ;;  %4088 = vmatprep.subr.bf16.mxu0 %v4550_v2 }
0x1008   :  { %4070 = vmatprep.subr.bf16.mxu1 %v4550_v2 }
0x100a   :  { %4089 = vmatpush3.bf16.msra.mxu0 %v5234_v1 }
0x100b   :  { %4071 = vmatpush3.bf16.msra.mxu1 %v5243_v10  ;;  %4090 = vmatprep.subr.bf16.mxu0 %v4550_v2 }
0x100c   :  { %4096 = vmatprep.subr.bf16.mxu1 %v4550_v2 }
0x100e   :  { %4091 = vmatpush3.bf16.msra.mxu0 %v5243_v10 }
0x100f   :  { %4116 = vmatprep.subr.bf16.mxu0 %v4550_v2 }
0x10c1   :  { %v1956_v31 = vpop.f32.mrb[72].mxu1 }
0x10c2   :  { %v1957_v11 = vadd.f32 %v1956_v31, %v4730_v24  ;;  %v4048_v33 = vpop.f32.mrb[73].mxu1 }
0x10c3   :  { %v1959_v34 = vpop.f32.mrb[74].mxu1 }
0x10c4   :  { %v1966_v35 = vadd.f32 %v3064_v19, %v1957_v11  ;;  %v4049_v37 = vpop.f32.mrb[75].mxu1  ;;  %v2005_v38 = vpop.f32.mrb[76].mxu0  ;;  %v2182_v34 = vmul.f32 1.003382, %v5472_v47 }
0x10c5   :  { %v2006_v39 = vadd.f32 %v4728_v22, %v2005_v38  ;;  %v4054_v48 = vpop.f32.mrb[77].mxu0 }
0x10c6   :  { %4482 = vtanh.f32 %v1966_v35  ;;  %v2008_v50 = vpop.f32.mrb[78].mxu0 }
0x10c7   :  { %v2011_v51 = vadd.f32 %v3064_v19, %v2006_v39  ;;  %v4055_v53 = vpop.f32.mrb[79].mxu0 }
0x10c9   :  { %4484 = vtanh.f32 %v2011_v51 }
0x10d0   :  { %v4483_v32 = vpop.eup %4482 }
0x10d1   :  { %v2013_v55 = vpack.c.bf16 %v4483_v32, %v4483_v32 }
0x10d3   :  { %v4485_v56 = vpop.eup %4484  ;;  %4073 = vmatmul.mubr.bf16.vlgmr.msra.gmra.mrb[76].mxu1 %v2013_v55 }
0x10d4   :  { %v2014_v57 = vpack.c.bf16 %v4485_v56, %v4485_v56  ;;  %4097 = vmatpush3.bf16.msra.mxu1 %v5258_v40  ;;  %4112 = vmatprep.mubr.msk.bf16.mxu1 %vm4551_vm2, %v4550_v2 }
0x10d5   :  { %4098 = vmatprep.subr.bf16.mxu1 %v4550_v2 }
0x10d6   :  { %4093 = vmatmul.mubr.bf16.vlgmr.msra.gmra.mrb[80].mxu0 %v2014_v57 }
0x10d7   :  { %4117 = vmatpush3.bf16.msra.mxu0 %v5258_v40  ;;  %4132 = vmatprep.mubr.msk.bf16.mxu0 %vm4551_vm2, %v4550_v2 }
0x10d8   :  { %4099 = vmatpush3.bf16.msra.mxu1 %v5270_v41  ;;  %4118 = vmatprep.subr.bf16.mxu0 %v4550_v2 }
0x10d9   :  { %4100 = vmatprep.subr.bf16.mxu1 %v4550_v2 }
0x10db   :  { %4119 = vmatpush3.bf16.msra.mxu0 %v5270_v41 }
0x10dc   :  { %4101 = vmatpush3.bf16.msra.mxu1 %v5279_v42  ;;  %4120 = vmatprep.subr.bf16.mxu0 %v4550_v2 }
0x10dd   :  { %4102 = vmatprep.subr.bf16.mxu1 %v4550_v2 }
0x10df   :  { %4121 = vmatpush3.bf16.msra.mxu0 %v5279_v42 }
0x10e0   :  { %4103 = vmatpush3.bf16.msra.mxu1 %v5288_v43  ;;  %4122 = vmatprep.subr.bf16.mxu0 %v4550_v2 }
0x10e1   :  { %4104 = vmatprep.subr.bf16.mxu1 %v4550_v2 }
0x10e3   :  { %4123 = vmatpush3.bf16.msra.mxu0 %v5288_v43 }
0x10e4   :  { %4105 = vmatpush3.bf16.msra.mxu1 %v5297_v44  ;;  %4124 = vmatprep.subr.bf16.mxu0 %v4550_v2 }
0x10e5   :  { %4106 = vmatprep.subr.bf16.mxu1 %v4550_v2 }
0x10e7   :  { %4125 = vmatpush3.bf16.msra.mxu0 %v5297_v44 }
0x10e8   :  { %4107 = vmatpush3.bf16.msra.mxu1 %v5306_v45  ;;  %4126 = vmatprep.subr.bf16.mxu0 %v4550_v2 }
0x10e9   :  { %4108 = vmatprep.subr.bf16.mxu1 %v4550_v2 }
0x10eb   :  { %4127 = vmatpush3.bf16.msra.mxu0 %v5306_v45 }
0x10ec   :  { %4109 = vmatpush3.bf16.msra.mxu1 %v5315_v23  ;;  %4128 = vmatprep.subr.bf16.mxu0 %v4550_v2 }
0x10ed   :  { %4110 = vmatprep.subr.bf16.mxu1 %v4550_v2 }
0x10ef   :  { %4129 = vmatpush3.bf16.msra.mxu0 %v5315_v23 }
0x10f0   :  { %4111 = vmatpush3.bf16.msra.mxu1 %v5324_v25  ;;  %4130 = vmatprep.subr.bf16.mxu0 %v4550_v2 }
0x10f1   :  { %4136 = vmatprep.subr.bf16.mxu1 %v4550_v2 }
0x10f3   :  { %4131 = vmatpush3.bf16.msra.mxu0 %v5324_v25 }
0x10f4   :  { %4142 = vmatprep.subr.bf16.mxu0 %v4550_v2 }
0x11a6   :  { %v2049_v62 = vpop.f32.mrb[76].mxu1 }
0x11a7   :  { %v2050_v12 = vadd.f32 %v5334_v27, %v2049_v62  ;;  %v4074_v14 = vpop.f32.mrb[77].mxu1 }
0x11a8   :  { %v2052_v15 = vpop.f32.mrb[78].mxu1 }
0x11a9   :  { %4486 = vtanh.f32 %v2050_v12  ;;  %v4075_v16 = vpop.f32.mrb[79].mxu1  ;;  %v2090_v17 = vpop.f32.mrb[80].mxu0 }
0x11aa   :  { %v2091_v18 = vadd.f32 %v5334_v27, %v2090_v17  ;;  %v4094_v52 = vpop.f32.mrb[81].mxu0 }
0x11ab   :  { %v2093_v54 = vpop.f32.mrb[82].mxu0 }
0x11ac   :  { %4488 = vtanh.f32 %v2091_v18  ;;  %v4095_v4 = vpop.f32.mrb[83].mxu0 }
0x11b3   :  { %v4487_v6 = vpop.eup %4486 }
0x11b4   :  { %v2097_v8 = vpack.c.bf16 %v4487_v6, %v4487_v6 }
0x11b6   :  { %v4489_v58 = vpop.eup %4488  ;;  %4113 = vmatmul.mubr.bf16.vlgmr.msra.gmra.mrb[80].mxu1 %v2097_v8 }
0x11b7   :  { %v2138_v9 = vpack.c.bf16 %v4489_v58, %v4489_v58  ;;  %4137 = vmatpush3.bf16.msra.mxu1 %v4619_v5  ;;  %4138 = vmatprep.mubr.msk.bf16.mxu1 %vm4551_vm2, %v4550_v2 }
0x11b8   :  { %4148 = vmatprep.subr.bf16.mxu1 %v4550_v2 }
0x11b9   :  { %4133 = vmatmul.mubr.bf16.vlgmr.msra.gmra.mrb[84].mxu0 %v2138_v9 }
0x11ba   :  { %4143 = vmatpush3.bf16.msra.mxu0 %v4619_v5  ;;  %4144 = vmatprep.mubr.msk.bf16.mxu0 %vm4551_vm2, %v4550_v2 }
0x11bb   :  { %4168 = vmatprep.subr.bf16.mxu0 %v4550_v2 }
0x1289   :  { %v2132_v13 = vpop.f32.mrb[80].mxu1 }
0x128a   :  { %v2133_v20 = vadd.f32 %v5349_v29, %v2132_v13  ;;  %v4114_v21 = vpop.f32.mrb[81].mxu1 }
0x128b   :  { %v2135_v36 = vpop.f32.mrb[82].mxu1  ;;  %v3071_v21 = vld [vmem:[%s5987_s3 + $0x20] sm:$0xff] }
0x128c   :  { %v2180_v3 = vmul.f32 -0.057914205, %v2133_v20  ;;  %v4115_v7 = vpop.f32.mrb[83].mxu1  ;;  %v2173_v46 = vpop.f32.mrb[84].mxu0 }
0x128d   :  { %v2174_v19 = vadd.f32 %v5349_v29, %v2173_v46  ;;  %v4134_v31 = vpop.f32.mrb[85].mxu0 }
0x128e   :  { %v2181_v11 = vadd.f32 %v2180_v3, %v2179_v26  ;;  %v2176_v33 = vpop.f32.mrb[86].mxu0 }
0x128f   :  { %v2183_v35 = vmul.f32 -0.057914205, %v2174_v19  ;;  %v4135_v37 = vpop.f32.mrb[87].mxu0 }
0x1290   :  { %v5572_v38 = vadd.f32 %v3066_v30, %v2181_v11  ;;  %v3072_v11 = vld [vmem:[%s5987_s3 + $0x28] sm:$0xff]  ;;  %v5694_v37 = vld [vmem:[%s5982_s6] sm:$0xff]  }
0x1291   :  { %v2184_v39 = vadd.f32 %v2183_v35, %v2182_v34 }
0x1292   :  { %v2191_v48 = vpack.c.bf16 %v5572_v38, %v5572_v38  ;;  %v2453_v58 = vmul.f32 1.0022721, %v5572_v38  ;;  %v5707_v38 = vld [vmem:[%s5982_s6 + $0x8] sm:$0xff]  }
0x1293   :  { %v5579_v50 = vadd.f32 %v3067_v28, %v2184_v39  ;;  %v5716_v28 = vld [vmem:[%s5982_s6 + $0x10] sm:$0xff]   ;;  %v5725_v39 = vld [vmem:[%s5982_s6 + $0x18] sm:$0xff]  }
0x1294   :  { %4139 = vmatmul.mubr.msk.bf16.vlgmr.msra.gmra.mrb[84].mxu1 %vm162_vm3, %v2191_v48  ;;  %v5734_v48 = vld [vmem:[%s5982_s6 + $0x20] sm:$0xff]  }
0x1295   :  { %v2192_v51 = vpack.c.bf16 %v5579_v50, %v5579_v50  ;;  %4149 = vmatpush3.bf16.msra.mxu1 %v5176_v59  ;;  %4164 = vmatprep.mubr.msk.bf16.mxu1 %vm4551_vm2, %v4550_v2  ;;  %v2456_v46 = vmul.f32 1.0022721, %v5579_v50  ;;  %v5743_v50 = vld [vmem:[%s5982_s6 + $0x28] sm:$0xff]  }
0x1296   :  { %4150 = vmatprep.subr.bf16.mxu1 %v4550_v2 }
0x1297   :  { %4145 = vmatmul.mubr.msk.bf16.vlgmr.msra.gmra.mrb[88].mxu0 %vm162_vm3, %v2192_v51  ;;  %v5752_v51 = vld [vmem:[%s5982_s6 + $0x30] sm:$0xff]  }
0x1298   :  { %4169 = vmatpush3.bf16.msra.mxu0 %v5176_v59  ;;  %4184 = vmatprep.mubr.msk.bf16.mxu0 %vm4551_vm2, %v4550_v2  ;;  %v3069_v59 = vld [vmem:[%s5984_s2 + $0x2] ss:$0 sm:$0xff] }
0x1299   :  { %4151 = vmatpush3.bf16.msra.mxu1 %v5189_v60  ;;  %4170 = vmatprep.subr.bf16.mxu0 %v4550_v2 }
0x129a   :  { %4152 = vmatprep.subr.bf16.mxu1 %v4550_v2 }
0x129c   :  { %4171 = vmatpush3.bf16.msra.mxu0 %v5189_v60 }
0x129d   :  { %4153 = vmatpush3.bf16.msra.mxu1 %v5198_v49  ;;  %4172 = vmatprep.subr.bf16.mxu0 %v4550_v2 }
0x129e   :  { %4154 = vmatprep.subr.bf16.mxu1 %v4550_v2 }
0x12a0   :  { %4173 = vmatpush3.bf16.msra.mxu0 %v5198_v49 }
0x12a1   :  { %4155 = vmatpush3.bf16.msra.mxu1 %v5207_v61  ;;  %4174 = vmatprep.subr.bf16.mxu0 %v4550_v2 }
0x12a2   :  { %4156 = vmatprep.subr.bf16.mxu1 %v4550_v2 }
0x12a4   :  { %4175 = vmatpush3.bf16.msra.mxu0 %v5207_v61 }
0x12a5   :  { %4157 = vmatpush3.bf16.msra.mxu1 %v5216_v63  ;;  %4176 = vmatprep.subr.bf16.mxu0 %v4550_v2 }
0x12a6   :  { %4158 = vmatprep.subr.bf16.mxu1 %v4550_v2 }
0x12a8   :  { %4177 = vmatpush3.bf16.msra.mxu0 %v5216_v63 }
0x12a9   :  { %4159 = vmatpush3.bf16.msra.mxu1 %v5225_v0  ;;  %4178 = vmatprep.subr.bf16.mxu0 %v4550_v2 }
0x12aa   :  { %4160 = vmatprep.subr.bf16.mxu1 %v4550_v2 }
0x12ac   :  { %4179 = vmatpush3.bf16.msra.mxu0 %v5225_v0 }
0x12ad   :  { %4161 = vmatpush3.bf16.msra.mxu1 %v5234_v1  ;;  %4180 = vmatprep.subr.bf16.mxu0 %v4550_v2 }
0x12ae   :  { %4162 = vmatprep.subr.bf16.mxu1 %v4550_v2 }
0x12b0   :  { %4181 = vmatpush3.bf16.msra.mxu0 %v5234_v1 }
0x12b1   :  { %4163 = vmatpush3.bf16.msra.mxu1 %v5243_v10  ;;  %4182 = vmatprep.subr.bf16.mxu0 %v4550_v2 }
0x12b2   :  { %4188 = vmatprep.subr.bf16.mxu1 %v4550_v2 }
0x12b4   :  { %4183 = vmatpush3.bf16.msra.mxu0 %v5243_v10 }
0x12b5   :  { %4208 = vmatprep.subr.bf16.mxu0 %v4550_v2 }
0x1367   :  { %v2230_v60 = vpop.f32.mrb[84].mxu1 }
0x1368   :  { %v2231_v49 = vadd.f32 %v2230_v60, %v4730_v24  ;;  %v4140_v61 = vpop.f32.mrb[85].mxu1  ;;  %v3074_v60 = vld [vmem:[%s5984_s2 + $0x1] ss:$0 sm:$0xff] }
0x1369   :  { %v2233_v63 = vpop.f32.mrb[86].mxu1 }
0x136a   :  { %v2240_v0 = vadd.f32 %v3069_v59, %v2231_v49  ;;  %v4141_v1 = vpop.f32.mrb[87].mxu1  ;;  %v2279_v47 = vpop.f32.mrb[88].mxu0 }
0x136b   :  { %v2280_v53 = vadd.f32 %v4728_v22, %v2279_v47  ;;  %v4146_v32 = vpop.f32.mrb[89].mxu0 }
0x136c   :  { %4490 = vtanh.f32 %v2240_v0  ;;  %v2282_v55 = vpop.f32.mrb[90].mxu0 }
0x136d   :  { %v2285_v10 = vadd.f32 %v3069_v59, %v2280_v53  ;;  %v4147_v56 = vpop.f32.mrb[91].mxu0  ;;  %v5761_v59 = vld [vmem:[%s5982_s6 + $0x38] sm:$0xff]  }
0x136f   :  { %4492 = vtanh.f32 %v2285_v10 }
0x1376   :  { %v4491_v57 = vpop.eup %4490 }
0x1377   :  { %v2287_v62 = vpack.c.bf16 %v4491_v57, %v4491_v57 }
0x1379   :  { %v4493_v12 = vpop.eup %4492  ;;  %4165 = vmatmul.mubr.bf16.vlgmr.msra.gmra.mrb[88].mxu1 %v2287_v62 }
0x137a   :  { %v2288_v14 = vpack.c.bf16 %v4493_v12, %v4493_v12  ;;  %4189 = vmatpush3.bf16.msra.mxu1 %v5258_v40  ;;  %4204 = vmatprep.mubr.msk.bf16.mxu1 %vm4551_vm2, %v4550_v2 }
0x137b   :  { %4190 = vmatprep.subr.bf16.mxu1 %v4550_v2 }
0x137c   :  { %4185 = vmatmul.mubr.bf16.vlgmr.msra.gmra.mrb[92].mxu0 %v2288_v14 }
0x137d   :  { %4209 = vmatpush3.bf16.msra.mxu0 %v5258_v40  ;;  %4224 = vmatprep.mubr.msk.bf16.mxu0 %vm4551_vm2, %v4550_v2 }
0x137e   :  { %4191 = vmatpush3.bf16.msra.mxu1 %v5270_v41  ;;  %4210 = vmatprep.subr.bf16.mxu0 %v4550_v2 }
0x137f   :  { %4192 = vmatprep.subr.bf16.mxu1 %v4550_v2 }
0x1381   :  { %4211 = vmatpush3.bf16.msra.mxu0 %v5270_v41 }
0x1382   :  { %4193 = vmatpush3.bf16.msra.mxu1 %v5279_v42  ;;  %4212 = vmatprep.subr.bf16.mxu0 %v4550_v2 }
0x1383   :  { %4194 = vmatprep.subr.bf16.mxu1 %v4550_v2 }
0x1385   :  { %4213 = vmatpush3.bf16.msra.mxu0 %v5279_v42 }
0x1386   :  { %4195 = vmatpush3.bf16.msra.mxu1 %v5288_v43  ;;  %4214 = vmatprep.subr.bf16.mxu0 %v4550_v2 }
0x1387   :  { %4196 = vmatprep.subr.bf16.mxu1 %v4550_v2 }
0x1389   :  { %4215 = vmatpush3.bf16.msra.mxu0 %v5288_v43 }
0x138a   :  { %4197 = vmatpush3.bf16.msra.mxu1 %v5297_v44  ;;  %4216 = vmatprep.subr.bf16.mxu0 %v4550_v2 }
0x138b   :  { %4198 = vmatprep.subr.bf16.mxu1 %v4550_v2 }
0x138d   :  { %4217 = vmatpush3.bf16.msra.mxu0 %v5297_v44 }
0x138e   :  { %4199 = vmatpush3.bf16.msra.mxu1 %v5306_v45  ;;  %4218 = vmatprep.subr.bf16.mxu0 %v4550_v2 }
0x138f   :  { %4200 = vmatprep.subr.bf16.mxu1 %v4550_v2 }
0x1391   :  { %4219 = vmatpush3.bf16.msra.mxu0 %v5306_v45 }
0x1392   :  { %4201 = vmatpush3.bf16.msra.mxu1 %v5315_v23  ;;  %4220 = vmatprep.subr.bf16.mxu0 %v4550_v2 }
0x1393   :  { %4202 = vmatprep.subr.bf16.mxu1 %v4550_v2 }
0x1395   :  { %4221 = vmatpush3.bf16.msra.mxu0 %v5315_v23 }
0x1396   :  { %4203 = vmatpush3.bf16.msra.mxu1 %v5324_v25  ;;  %4222 = vmatprep.subr.bf16.mxu0 %v4550_v2 }
0x1397   :  { %4228 = vmatprep.subr.bf16.mxu1 %v4550_v2 }
0x1399   :  { %4223 = vmatpush3.bf16.msra.mxu0 %v5324_v25 }
0x139a   :  { %4234 = vmatprep.subr.bf16.mxu0 %v4550_v2 }
0x144c   :  { %v2323_v40 = vpop.f32.mrb[88].mxu1 }
0x144d   :  { %v2324_v41 = vadd.f32 %v5334_v27, %v2323_v40  ;;  %v4166_v42 = vpop.f32.mrb[89].mxu1 }
0x144e   :  { %v2326_v43 = vpop.f32.mrb[90].mxu1  ;;  %v5788_v42 = vld [vmem:[%s5983_s8 + $0x8] sm:$0xff]  }
0x144f   :  { %4494 = vtanh.f32 %v2324_v41  ;;  %v4167_v44 = vpop.f32.mrb[91].mxu1  ;;  %v2364_v45 = vpop.f32.mrb[92].mxu0  ;;  %v5776_v41 = vld [vmem:[%s5983_s8] sm:$0xff]   ;;  %v5797_v43 = vld [vmem:[%s5983_s8 + $0x10] sm:$0xff]  }
0x1450   :  { %v2365_v23 = vadd.f32 %v5334_v27, %v2364_v45  ;;  %v4186_v15 = vpop.f32.mrb[93].mxu0  ;;  %v5806_v44 = vld [vmem:[%s5983_s8 + $0x18] sm:$0xff]   ;;  %v5815_v45 = vld [vmem:[%s5983_s8 + $0x20] sm:$0xff]  }
0x1451   :  { %v2367_v16 = vpop.f32.mrb[94].mxu0  ;;  %v5833_v15 = vld [vmem:[%s5983_s8 + $0x30] sm:$0xff]  }
0x1452   :  { %4496 = vtanh.f32 %v2365_v23  ;;  %v4187_v17 = vpop.f32.mrb[95].mxu0  ;;  %v5824_v23 = vld [vmem:[%s5983_s8 + $0x28] sm:$0xff]   ;;  %v5842_v16 = vld [vmem:[%s5983_s8 + $0x38] sm:$0xff]  }
0x1459   :  { %v4495_v18 = vpop.eup %4494 }
0x145a   :  { %v2371_v52 = vpack.c.bf16 %v4495_v18, %v4495_v18  ;;  %v5852_v18 = vld [vmem:[%s5985_s7] ss:$0 sm:$0xff] }
0x145c   :  { %v4497_v54 = vpop.eup %4496  ;;  %4205 = vmatmul.mubr.bf16.vlgmr.msra.gmra.mrb[92].mxu1 %v2371_v52 }
0x145d   :  { %v2412_v25 = vpack.c.bf16 %v4497_v54, %v4497_v54  ;;  %4229 = vmatpush3.bf16.msra.mxu1 %v4619_v5  ;;  %4230 = vmatprep.mubr.msk.bf16.mxu1 %vm4551_vm2, %v4550_v2 }
0x145e   :  { %4240 = vmatprep.subr.bf16.mxu1 %v4550_v2 }
0x145f   :  { %4225 = vmatmul.mubr.bf16.vlgmr.msra.gmra.mrb[96].mxu0 %v2412_v25 }
0x1460   :  { %4235 = vmatpush3.bf16.msra.mxu0 %v4619_v5  ;;  %4236 = vmatprep.mubr.msk.bf16.mxu0 %vm4551_vm2, %v4550_v2 }
0x1461   :  { %4260 = vmatprep.subr.bf16.mxu0 %v4550_v2 }
0x152f   :  { %v2406_v27 = vpop.f32.mrb[92].mxu1 }
0x1530   :  { %v2407_v4 = vadd.f32 %v5349_v29, %v2406_v27  ;;  %v4206_v6 = vpop.f32.mrb[93].mxu1 }
0x1531   :  { %v2409_v8 = vpop.f32.mrb[94].mxu1 }
0x1532   :  { %v2454_v9 = vmul.f32 -0.05447705, %v2407_v4  ;;  %v4207_v13 = vpop.f32.mrb[95].mxu1  ;;  %v2447_v20 = vpop.f32.mrb[96].mxu0 }
0x1533   :  { %v2448_v36 = vadd.f32 %v5349_v29, %v2447_v20  ;;  %v4226_v26 = vpop.f32.mrb[97].mxu0 }
0x1534   :  { %v2455_v3 = vadd.f32 %v2454_v9, %v2453_v58  ;;  %v2450_v7 = vpop.f32.mrb[98].mxu0 }
0x1535   :  { %v2457_v30 = vmul.f32 -0.05447705, %v2448_v36  ;;  %v4227_v19 = vpop.f32.mrb[99].mxu0 }
0x1536   :  { %v5679_v31 = vadd.f32 %v3071_v21, %v2455_v3  ;;  %v5867_v3 = vld [vmem:[%s5986_s9] ss:$0 sm:$0xff] }
0x1537   :  { %v2458_v33 = vadd.f32 %v2457_v30, %v2456_v46 }
0x1538   :  { %v2465_v34 = vpack.c.bf16 %v5679_v31, %v5679_v31  ;;  %v2727_v19 = vmul.f32 1.0011609, %v5679_v31  ;;  %v3077_v31 = vld [vmem:[%s5987_s3 + $0x18] sm:$0xff] }
0x1539   :  { %v5686_v35 = vadd.f32 %v3072_v11, %v2458_v33 }
0x153a   :  { %4231 = vmatmul.mubr.msk.bf16.vlgmr.msra.gmra.mrb[96].mxu1 %vm162_vm3, %v2465_v34  ;;  %v3076_v34 = vld [vmem:[%s5987_s3 + $0x10] sm:$0xff] }
0x153b   :  { %v2466_v29 = vpack.c.bf16 %v5686_v35, %v5686_v35  ;;  %4241 = vmatpush3.bf16.msra.mxu1 %v5694_v37  ;;  %4256 = vmatprep.mubr.msk.bf16.mxu1 %vm4551_vm2, %v4550_v2 }
0x153c   :  { %4242 = vmatprep.subr.bf16.mxu1 %v4550_v2 }
0x153d   :  { %4237 = vmatmul.mubr.msk.bf16.vlgmr.msra.gmra.mrb[100].mxu0 %vm162_vm3, %v2466_v29 }
0x153e   :  { %4261 = vmatpush3.bf16.msra.mxu0 %v5694_v37  ;;  %4276 = vmatprep.mubr.msk.bf16.mxu0 %vm4551_vm2, %v4550_v2 }
0x153f   :  { %4243 = vmatpush3.bf16.msra.mxu1 %v5707_v38  ;;  %4262 = vmatprep.subr.bf16.mxu0 %v4550_v2 }
0x1540   :  { %4244 = vmatprep.subr.bf16.mxu1 %v4550_v2 }
0x1542   :  { %4263 = vmatpush3.bf16.msra.mxu0 %v5707_v38 }
0x1543   :  { %4245 = vmatpush3.bf16.msra.mxu1 %v5716_v28  ;;  %4264 = vmatprep.subr.bf16.mxu0 %v4550_v2 }
0x1544   :  { %4246 = vmatprep.subr.bf16.mxu1 %v4550_v2 }
0x1546   :  { %4265 = vmatpush3.bf16.msra.mxu0 %v5716_v28 }
0x1547   :  { %4247 = vmatpush3.bf16.msra.mxu1 %v5725_v39  ;;  %4266 = vmatprep.subr.bf16.mxu0 %v4550_v2 }
0x1548   :  { %4248 = vmatprep.subr.bf16.mxu1 %v4550_v2 }
0x154a   :  { %4267 = vmatpush3.bf16.msra.mxu0 %v5725_v39 }
0x154b   :  { %4249 = vmatpush3.bf16.msra.mxu1 %v5734_v48  ;;  %4268 = vmatprep.subr.bf16.mxu0 %v4550_v2 }
0x154c   :  { %4250 = vmatprep.subr.bf16.mxu1 %v4550_v2 }
0x154e   :  { %4269 = vmatpush3.bf16.msra.mxu0 %v5734_v48 }
0x154f   :  { %4251 = vmatpush3.bf16.msra.mxu1 %v5743_v50  ;;  %4270 = vmatprep.subr.bf16.mxu0 %v4550_v2 }
0x1550   :  { %4252 = vmatprep.subr.bf16.mxu1 %v4550_v2 }
0x1552   :  { %4271 = vmatpush3.bf16.msra.mxu0 %v5743_v50 }
0x1553   :  { %4253 = vmatpush3.bf16.msra.mxu1 %v5752_v51  ;;  %4272 = vmatprep.subr.bf16.mxu0 %v4550_v2 }
0x1554   :  { %4254 = vmatprep.subr.bf16.mxu1 %v4550_v2 }
0x1556   :  { %4273 = vmatpush3.bf16.msra.mxu0 %v5752_v51 }
0x1557   :  { %4255 = vmatpush3.bf16.msra.mxu1 %v5761_v59  ;;  %4274 = vmatprep.subr.bf16.mxu0 %v4550_v2 }
0x1558   :  { %4280 = vmatprep.subr.bf16.mxu1 %v4550_v2 }
0x155a   :  { %4275 = vmatpush3.bf16.msra.mxu0 %v5761_v59 }
0x155b   :  { %4300 = vmatprep.subr.bf16.mxu0 %v4550_v2 }
0x160d   :  { %v2504_v49 = vpop.f32.mrb[96].mxu1 }
0x160e   :  { %v2505_v61 = vadd.f32 %v2504_v49, %v4730_v24  ;;  %v4232_v63 = vpop.f32.mrb[97].mxu1 }
0x160f   :  { %v2507_v0 = vpop.f32.mrb[98].mxu1  ;;  %v2730_v63 = vmul.f32 1.0011609, %v5686_v35  ;;  %v3079_v35 = vld [vmem:[%s5984_s2] ss:$0 sm:$0xff] }
0x1610   :  { %v2514_v1 = vadd.f32 %v3074_v60, %v2505_v61  ;;  %v4233_v47 = vpop.f32.mrb[99].mxu1  ;;  %v2553_v53 = vpop.f32.mrb[100].mxu0 }
0x1611   :  { %v2554_v32 = vadd.f32 %v4728_v22, %v2553_v53  ;;  %v4238_v55 = vpop.f32.mrb[101].mxu0 }
0x1612   :  { %4498 = vtanh.f32 %v2514_v1  ;;  %v2556_v10 = vpop.f32.mrb[102].mxu0 }
0x1613   :  { %v2559_v56 = vadd.f32 %v3074_v60, %v2554_v32  ;;  %v4239_v57 = vpop.f32.mrb[103].mxu0 }
0x1615   :  { %4500 = vtanh.f32 %v2559_v56 }
0x161c   :  { %v4499_v62 = vpop.eup %4498 }
0x161d   :  { %v2561_v12 = vpack.c.bf16 %v4499_v62, %v4499_v62 }
0x161f   :  { %v4501_v14 = vpop.eup %4500  ;;  %4257 = vmatmul.mubr.bf16.vlgmr.msra.gmra.mrb[100].mxu1 %v2561_v12 }
0x1620   :  { %v2562_v40 = vpack.c.bf16 %v4501_v14, %v4501_v14  ;;  %4281 = vmatpush3.bf16.msra.mxu1 %v5776_v41  ;;  %4296 = vmatprep.mubr.msk.bf16.mxu1 %vm4551_vm2, %v4550_v2 }
0x1621   :  { %4282 = vmatprep.subr.bf16.mxu1 %v4550_v2 }
0x1622   :  { %4277 = vmatmul.mubr.bf16.vlgmr.msra.gmra.mrb[104].mxu0 %v2562_v40 }
0x1623   :  { %4301 = vmatpush3.bf16.msra.mxu0 %v5776_v41  ;;  %4316 = vmatprep.mubr.msk.bf16.mxu0 %vm4551_vm2, %v4550_v2 }
0x1624   :  { %4283 = vmatpush3.bf16.msra.mxu1 %v5788_v42  ;;  %4302 = vmatprep.subr.bf16.mxu0 %v4550_v2 }
0x1625   :  { %4284 = vmatprep.subr.bf16.mxu1 %v4550_v2 }
0x1627   :  { %4303 = vmatpush3.bf16.msra.mxu0 %v5788_v42 }
0x1628   :  { %4285 = vmatpush3.bf16.msra.mxu1 %v5797_v43  ;;  %4304 = vmatprep.subr.bf16.mxu0 %v4550_v2 }
0x1629   :  { %4286 = vmatprep.subr.bf16.mxu1 %v4550_v2 }
0x162b   :  { %4305 = vmatpush3.bf16.msra.mxu0 %v5797_v43 }
0x162c   :  { %4287 = vmatpush3.bf16.msra.mxu1 %v5806_v44  ;;  %4306 = vmatprep.subr.bf16.mxu0 %v4550_v2 }
0x162d   :  { %4288 = vmatprep.subr.bf16.mxu1 %v4550_v2 }
0x162f   :  { %4307 = vmatpush3.bf16.msra.mxu0 %v5806_v44 }
0x1630   :  { %4289 = vmatpush3.bf16.msra.mxu1 %v5815_v45  ;;  %4308 = vmatprep.subr.bf16.mxu0 %v4550_v2 }
0x1631   :  { %4290 = vmatprep.subr.bf16.mxu1 %v4550_v2 }
0x1633   :  { %4309 = vmatpush3.bf16.msra.mxu0 %v5815_v45 }
0x1634   :  { %4291 = vmatpush3.bf16.msra.mxu1 %v5824_v23  ;;  %4310 = vmatprep.subr.bf16.mxu0 %v4550_v2 }
0x1635   :  { %4292 = vmatprep.subr.bf16.mxu1 %v4550_v2 }
0x1637   :  { %4311 = vmatpush3.bf16.msra.mxu0 %v5824_v23 }
0x1638   :  { %4293 = vmatpush3.bf16.msra.mxu1 %v5833_v15  ;;  %4312 = vmatprep.subr.bf16.mxu0 %v4550_v2 }
0x1639   :  { %4294 = vmatprep.subr.bf16.mxu1 %v4550_v2 }
0x163b   :  { %4313 = vmatpush3.bf16.msra.mxu0 %v5833_v15 }
0x163c   :  { %4295 = vmatpush3.bf16.msra.mxu1 %v5842_v16  ;;  %4314 = vmatprep.subr.bf16.mxu0 %v4550_v2 }
0x163d   :  { %4320 = vmatprep.subr.bf16.mxu1 %v4550_v2 }
0x163f   :  { %4315 = vmatpush3.bf16.msra.mxu0 %v5842_v16 }
0x1640   :  { %4326 = vmatprep.subr.bf16.mxu0 %v4550_v2 }
0x16f2   :  { %v2597_v17 = vpop.f32.mrb[100].mxu1 }
0x16f3   :  { %v2598_v52 = vadd.f32 %v5852_v18, %v2597_v17  ;;  %v4258_v54 = vpop.f32.mrb[101].mxu1 }
0x16f4   :  { %v2600_v25 = vpop.f32.mrb[102].mxu1 }
0x16f5   :  { %4502 = vtanh.f32 %v2598_v52  ;;  %v4259_v27 = vpop.f32.mrb[103].mxu1  ;;  %v2638_v4 = vpop.f32.mrb[104].mxu0 }
0x16f6   :  { %v2639_v6 = vadd.f32 %v5852_v18, %v2638_v4  ;;  %v4278_v8 = vpop.f32.mrb[105].mxu0 }
0x16f7   :  { %v2641_v58 = vpop.f32.mrb[106].mxu0 }
0x16f8   :  { %4504 = vtanh.f32 %v2639_v6  ;;  %v4279_v9 = vpop.f32.mrb[107].mxu0 }
0x16ff   :  { %v4503_v13 = vpop.eup %4502 }
0x1700   :  { %v2645_v20 = vpack.c.bf16 %v4503_v13, %v4503_v13 }
0x1702   :  { %v4505_v21 = vpop.eup %4504  ;;  %4297 = vmatmul.mubr.bf16.vlgmr.msra.gmra.mrb[104].mxu1 %v2645_v20 }
0x1703   :  { %v2686_v36 = vpack.c.bf16 %v4505_v21, %v4505_v21  ;;  %4321 = vmatpush3.bf16.msra.mxu1 %v4619_v5  ;;  %4322 = vmatprep.mubr.msk.bf16.mxu1 %vm4551_vm2, %v4550_v2 }
0x1704   :  { %4332 = vmatprep.subr.bf16.mxu1 %v4550_v2 }
0x1705   :  { %4317 = vmatmul.mubr.bf16.vlgmr.msra.gmra.mrb[108].mxu0 %v2686_v36 }
0x1706   :  { %4327 = vmatpush3.bf16.msra.mxu0 %v4619_v5  ;;  %4328 = vmatprep.mubr.msk.bf16.mxu0 %vm4551_vm2, %v4550_v2 }
0x1707   :  { %4352 = vmatprep.subr.bf16.mxu0 %v4550_v2 }
0x17d5   :  { %v2680_v26 = vpop.f32.mrb[104].mxu1 }
0x17d6   :  { %v2681_v7 = vadd.f32 %v5867_v3, %v2680_v26  ;;  %v4298_v46 = vpop.f32.mrb[105].mxu1 }
0x17d7   :  { %v2683_v30 = vpop.f32.mrb[106].mxu1 }
0x17d8   :  { %v2728_v11 = vmul.f32 -0.047123335, %v2681_v7  ;;  %v4299_v33 = vpop.f32.mrb[107].mxu1  ;;  %v2721_v5 = vpop.f32.mrb[108].mxu0 }
0x17d9   :  { %v2722_v29 = vadd.f32 %v5867_v3, %v2721_v5  ;;  %v4318_v60 = vpop.f32.mrb[109].mxu0 }
0x17da   :  { %v2729_v49 = vadd.f32 %v2728_v11, %v2727_v19  ;;  %v2724_v61 = vpop.f32.mrb[110].mxu0 }
0x17db   :  { %v2731_v0 = vmul.f32 -0.047123335, %v2722_v29  ;;  %v4319_v1 = vpop.f32.mrb[111].mxu0 }
0x17dc   :  { %v5876_v47 = vadd.f32 %v3076_v34, %v2729_v49 }
0x17dd   :  { %v2732_v53 = vadd.f32 %v2731_v0, %v2730_v63 }
0x17de   :  { %v2739_v32 = vpack.c.bf16 %v5876_v47, %v5876_v47  ;;  %v3001_v9 = vmul.f32 0.999884, %v5876_v47 }
0x17df   :  { %v5883_v55 = vadd.f32 %v3077_v31, %v2732_v53 }
0x17e0   :  { %4323 = vmatmul.mubr.msk.bf16.vlgmr.msra.gmra.mrb[108].mxu1 %vm162_vm3, %v2739_v32 }
0x17e1   :  { %v2740_v10 = vpack.c.bf16 %v5883_v55, %v5883_v55  ;;  %4333 = vmatpush3.bf16.msra.mxu1 %v5694_v37  ;;  %4348 = vmatprep.mubr.msk.bf16.mxu1 %vm4551_vm2, %v4550_v2  ;;  %v3004_v46 = vmul.f32 0.999884, %v5883_v55 }
0x17e2   :  { %4334 = vmatprep.subr.bf16.mxu1 %v4550_v2 }
0x17e3   :  { %4329 = vmatmul.mubr.msk.bf16.vlgmr.msra.gmra.mrb[112].mxu0 %vm162_vm3, %v2740_v10 }
0x17e4   :  { %4353 = vmatpush3.bf16.msra.mxu0 %v5694_v37  ;;  %4368 = vmatprep.mubr.msk.bf16.mxu0 %vm4551_vm2, %v4550_v2 }
0x17e5   :  { %4335 = vmatpush3.bf16.msra.mxu1 %v5707_v38  ;;  %4354 = vmatprep.subr.bf16.mxu0 %v4550_v2 }
0x17e6   :  { %4336 = vmatprep.subr.bf16.mxu1 %v4550_v2 }
0x17e8   :  { %4355 = vmatpush3.bf16.msra.mxu0 %v5707_v38 }
0x17e9   :  { %4337 = vmatpush3.bf16.msra.mxu1 %v5716_v28  ;;  %4356 = vmatprep.subr.bf16.mxu0 %v4550_v2 }
0x17ea   :  { %4338 = vmatprep.subr.bf16.mxu1 %v4550_v2 }
0x17ec   :  { %4357 = vmatpush3.bf16.msra.mxu0 %v5716_v28 }
0x17ed   :  { %4339 = vmatpush3.bf16.msra.mxu1 %v5725_v39  ;;  %4358 = vmatprep.subr.bf16.mxu0 %v4550_v2 }
0x17ee   :  { %4340 = vmatprep.subr.bf16.mxu1 %v4550_v2 }
0x17f0   :  { %4359 = vmatpush3.bf16.msra.mxu0 %v5725_v39 }
0x17f1   :  { %4341 = vmatpush3.bf16.msra.mxu1 %v5734_v48  ;;  %4360 = vmatprep.subr.bf16.mxu0 %v4550_v2 }
0x17f2   :  { %4342 = vmatprep.subr.bf16.mxu1 %v4550_v2 }
0x17f4   :  { %4361 = vmatpush3.bf16.msra.mxu0 %v5734_v48 }
0x17f5   :  { %4343 = vmatpush3.bf16.msra.mxu1 %v5743_v50  ;;  %4362 = vmatprep.subr.bf16.mxu0 %v4550_v2 }
0x17f6   :  { %4344 = vmatprep.subr.bf16.mxu1 %v4550_v2 }
0x17f8   :  { %4363 = vmatpush3.bf16.msra.mxu0 %v5743_v50 }
0x17f9   :  { %4345 = vmatpush3.bf16.msra.mxu1 %v5752_v51  ;;  %4364 = vmatprep.subr.bf16.mxu0 %v4550_v2 }
0x17fa   :  { %4346 = vmatprep.subr.bf16.mxu1 %v4550_v2 }
0x17fc   :  { %4365 = vmatpush3.bf16.msra.mxu0 %v5752_v51 }
0x17fd   :  { %4347 = vmatpush3.bf16.msra.mxu1 %v5761_v59  ;;  %4366 = vmatprep.subr.bf16.mxu0 %v4550_v2 }
0x17fe   :  { %4372 = vmatprep.subr.bf16.mxu1 %v4550_v2 }
0x1800   :  { %4367 = vmatpush3.bf16.msra.mxu0 %v5761_v59 }
0x1801   :  { %4392 = vmatprep.subr.bf16.mxu0 %v4550_v2 }
0x18b3   :  { %v2778_v37 = vpop.f32.mrb[108].mxu1 }
0x18b4   :  { %v2779_v38 = vadd.f32 %v2778_v37, %v4730_v24  ;;  %v4324_v28 = vpop.f32.mrb[109].mxu1 }
0x18b5   :  { %v2781_v39 = vpop.f32.mrb[110].mxu1 }
0x18b6   :  { %v2788_v48 = vadd.f32 %v3079_v35, %v2779_v38  ;;  %v4325_v50 = vpop.f32.mrb[111].mxu1  ;;  %v2827_v51 = vpop.f32.mrb[112].mxu0 }
0x18b7   :  { %v2828_v56 = vadd.f32 %v4728_v22, %v2827_v51  ;;  %v4330_v57 = vpop.f32.mrb[113].mxu0 }
0x18b8   :  { %4506 = vtanh.f32 %v2788_v48  ;;  %v2830_v62 = vpop.f32.mrb[114].mxu0 }
0x18b9   :  { %v2833_v59 = vadd.f32 %v3079_v35, %v2828_v56  ;;  %v4331_v12 = vpop.f32.mrb[115].mxu0 }
0x18bb   :  { %4508 = vtanh.f32 %v2833_v59 }
0x18c2   :  { %v4507_v14 = vpop.eup %4506 }
0x18c3   :  { %v2835_v40 = vpack.c.bf16 %v4507_v14, %v4507_v14 }
0x18c5   :  { %v4509_v17 = vpop.eup %4508  ;;  %4349 = vmatmul.mubr.bf16.vlgmr.msra.gmra.mrb[112].mxu1 %v2835_v40 }
0x18c6   :  { %v2836_v52 = vpack.c.bf16 %v4509_v17, %v4509_v17  ;;  %4373 = vmatpush3.bf16.msra.mxu1 %v5776_v41  ;;  %4388 = vmatprep.mubr.msk.bf16.mxu1 %vm4551_vm2, %v4550_v2 }
0x18c7   :  { %4374 = vmatprep.subr.bf16.mxu1 %v4550_v2 }
0x18c8   :  { %4369 = vmatmul.mubr.bf16.vlgmr.msra.gmra.mrb[116].mxu0 %v2836_v52 }
0x18c9   :  { %4393 = vmatpush3.bf16.msra.mxu0 %v5776_v41  ;;  %4408 = vmatprep.mubr.msk.bf16.mxu0 %vm4551_vm2, %v4550_v2 }
0x18ca   :  { %4375 = vmatpush3.bf16.msra.mxu1 %v5788_v42  ;;  %4394 = vmatprep.subr.bf16.mxu0 %v4550_v2 }
0x18cb   :  { %4376 = vmatprep.subr.bf16.mxu1 %v4550_v2 }
0x18cd   :  { %4395 = vmatpush3.bf16.msra.mxu0 %v5788_v42 }
0x18ce   :  { %4377 = vmatpush3.bf16.msra.mxu1 %v5797_v43  ;;  %4396 = vmatprep.subr.bf16.mxu0 %v4550_v2 }
0x18cf   :  { %4378 = vmatprep.subr.bf16.mxu1 %v4550_v2 }
0x18d1   :  { %4397 = vmatpush3.bf16.msra.mxu0 %v5797_v43 }
0x18d2   :  { %4379 = vmatpush3.bf16.msra.mxu1 %v5806_v44  ;;  %4398 = vmatprep.subr.bf16.mxu0 %v4550_v2 }
0x18d3   :  { %4380 = vmatprep.subr.bf16.mxu1 %v4550_v2 }
0x18d5   :  { %4399 = vmatpush3.bf16.msra.mxu0 %v5806_v44 }
0x18d6   :  { %4381 = vmatpush3.bf16.msra.mxu1 %v5815_v45  ;;  %4400 = vmatprep.subr.bf16.mxu0 %v4550_v2 }
0x18d7   :  { %4382 = vmatprep.subr.bf16.mxu1 %v4550_v2 }
0x18d9   :  { %4401 = vmatpush3.bf16.msra.mxu0 %v5815_v45 }
0x18da   :  { %4383 = vmatpush3.bf16.msra.mxu1 %v5824_v23  ;;  %4402 = vmatprep.subr.bf16.mxu0 %v4550_v2 }
0x18db   :  { %4384 = vmatprep.subr.bf16.mxu1 %v4550_v2 }
0x18dd   :  { %4403 = vmatpush3.bf16.msra.mxu0 %v5824_v23 }
0x18de   :  { %4385 = vmatpush3.bf16.msra.mxu1 %v5833_v15  ;;  %4404 = vmatprep.subr.bf16.mxu0 %v4550_v2 }
0x18df   :  { %4386 = vmatprep.subr.bf16.mxu1 %v4550_v2 }
0x18e1   :  { %4405 = vmatpush3.bf16.msra.mxu0 %v5833_v15 }
0x18e2   :  { %4387 = vmatpush3.bf16.msra.mxu1 %v5842_v16  ;;  %4406 = vmatprep.subr.bf16.mxu0 %v4550_v2 }
0x18e5   :  { %4407 = vmatpush3.bf16.msra.mxu0 %v5842_v16 }
0x1998   :  { %v2871_v22 = vpop.f32.mrb[112].mxu1 }
0x1999   :  { %v2872_v24 = vadd.f32 %v5852_v18, %v2871_v22  ;;  %v4350_v41 = vpop.f32.mrb[113].mxu1 }
0x199a   :  { %v2874_v42 = vpop.f32.mrb[114].mxu1 }
0x199b   :  { %4510 = vtanh.f32 %v2872_v24  ;;  %v4351_v43 = vpop.f32.mrb[115].mxu1  ;;  %v2912_v44 = vpop.f32.mrb[116].mxu0 }
0x199c   :  { %v2913_v45 = vadd.f32 %v5852_v18, %v2912_v44  ;;  %v4370_v23 = vpop.f32.mrb[117].mxu0 }
0x199d   :  { %v2915_v54 = vpop.f32.mrb[118].mxu0 }
0x199e   :  { %4512 = vtanh.f32 %v2913_v45  ;;  %v4371_v15 = vpop.f32.mrb[119].mxu0 }
0x19a5   :  { %v4511_v25 = vpop.eup %4510 }
0x19a6   :  { %v2919_v27 = vpack.c.bf16 %v4511_v25, %v4511_v25 }
0x19a8   :  { %v4513_v4 = vpop.eup %4512  ;;  %4389 = vmatmul.mubr.bf16.vlgmr.msra.gmra.mrb[116].mxu1 %v2919_v27 }
0x19a9   :  { %v2960_v2 = vpack.c.bf16 %v4513_v4, %v4513_v4 }
0x19ab   :  { %4409 = vmatmul.mubr.bf16.vlgmr.msra.gmra.mrb[120].mxu0 %v2960_v2 }
0x1a7b   :  { %v2954_v16 = vpop.f32.mrb[116].mxu1 }
0x1a7c   :  { %v2955_v6 = vadd.f32 %v5867_v3, %v2954_v16  ;;  %v4390_v8 = vpop.f32.mrb[117].mxu1 }
0x1a7d   :  { %v2957_v58 = vpop.f32.mrb[118].mxu1 }
0x1a7e   :  { %v3002_v13 = vmul.f32 -0.00999917, %v2955_v6  ;;  %v4391_v20 = vpop.f32.mrb[119].mxu1  ;;  %v2995_v18 = vpop.f32.mrb[120].mxu0 }
0x1a7f   :  { %v2996_v21 = vadd.f32 %v5867_v3, %v2995_v18  ;;  %v4410_v36 = vpop.f32.mrb[121].mxu0 }
0x1a80   :  { %v3003_v26 = vadd.f32 %v3002_v13, %v3001_v9  ;;  %v2998_v7 = vpop.f32.mrb[122].mxu0 }
0x1a81   :  { %v3005_v30 = vmul.f32 -0.00999917, %v2996_v21  ;;  %v4411_v19 = vpop.f32.mrb[123].mxu0 }
0x1a82   :  { %3007 = vst.msk [vmem:[%s5988_s10] sm:$0xff] %vm162_vm3, %v3003_v26 }
0x1a83   :  { %v3006_v11 = vadd.f32 %v3005_v30, %v3004_v46 }
0x1a85   :  { %3008 = vst.msk [vmem:[%s5988_s10 + $0x8] sm:$0xff] %vm162_vm3, %v3006_v11 }

</bundles_post_ra>
